<compile_context>
chip_gen: v7x
topology: tpu7x:2x2x1
jax: 0.10.0
libtpu: 0.0.40
codegen_flags: <defaults>
</compile_context>

<pallas_src>
import jax
import jax.numpy as jnp
from jax.experimental import pallas as pl
from jax.experimental.pallas import tpu as pltpu

# ----------------------------- configuration --------------------------------
L_FREQS = 4                            # positional-encoding frequencies
IN_DIM = 3                             # xyz
PE_DIM = IN_DIM * (2 * L_FREQS + 1)    # 3 + 3*2*L = 27
HIDDEN = 32                            # decoder hidden width
TM = 2048                              # points per grid step (lane-dense tile)


# ------------------------------ Pallas kernel -------------------------------
def tensorf_kernel(x_ref, scale_ref, shift_ref, w1t_ref, b1_ref, w2t_ref, b2_ref,
                   o_ref):
    # x_ref:    (3, TM)       points, feature-major (points on lanes)
    # scale/shift: (3, 1)     precomputed normalization
    # w1t_ref:  (HIDDEN, PE_DIM)   first layer, transposed
    # b1_ref:   (HIDDEN, 1)
    # w2t_ref:  (1, HIDDEN)        second layer, transposed
    # b2_ref:   (1, 1)
    # o_ref:    (1, TM)            lane-dense output block
    x = x_ref[...]                                          # (3, TM)
    x_ts = x * scale_ref[...] + shift_ref[...]              # normalize to [-1, 1]

    w1t = w1t_ref[...]                                      # (HIDDEN, PE_DIM)

    # identity feature group
    h = jnp.dot(w1t[:, 0:IN_DIM], x_ts,
                preferred_element_type=jnp.float32)         # (HIDDEN, TM)

    # frequency groups: exact sin/cos only at 2^0, then double-angle recurrence
    s = jnp.sin(x_ts)
    c = jnp.cos(x_ts)
    col = IN_DIM
    for i in range(L_FREQS):
        h = h + jnp.dot(w1t[:, col:col + IN_DIM], s,
                        preferred_element_type=jnp.float32)
        h = h + jnp.dot(w1t[:, col + IN_DIM:col + 2 * IN_DIM], c,
                        preferred_element_type=jnp.float32)
        col += 2 * IN_DIM
        if i + 1 < L_FREQS:
            # sin(2a) = 2 sin a cos a ; cos(2a) = 1 - 2 sin^2 a   (VPU only)
            s, c = 2.0 * s * c, 1.0 - 2.0 * s * s

    h = jnp.maximum(h + b1_ref[...], 0.0)                   # (HIDDEN, TM)
    y = jnp.dot(w2t_ref[...], h,
                preferred_element_type=jnp.float32) + b2_ref[...]   # (1, TM)

    o_ref[...] = y.astype(o_ref.dtype)


# ------------------------------- wrapper -------------------------------------
def tensorf_forward(x, xyz_min, xyz_max, w1, b1, w2, b2, *, tm=TM):
    """TensoRF forward (noise_std=None, do_grad=False). x: (N, 3) -> y: (N,)."""
    assert tm % 128 == 0
    N = x.shape[0]
    num_tiles = (N + tm - 1) // tm
    n_pad = num_tiles * tm

    # feature-major layout + ragged-N padding
    xt = jnp.transpose(x.astype(jnp.float32))               # (3, N)
    if n_pad != N:
        xt = jnp.pad(xt, ((0, 0), (0, n_pad - N)))

    xyz_min = xyz_min.astype(jnp.float32)
    xyz_max = xyz_max.astype(jnp.float32)
    scale = (2.0 / (xyz_max - xyz_min)).reshape(IN_DIM, 1)
    shift = (-2.0 * xyz_min / (xyz_max - xyz_min) - 1.0).reshape(IN_DIM, 1)

    w1t = jnp.transpose(w1.astype(jnp.float32))              # (HIDDEN, PE_DIM)
    b1c = b1.astype(jnp.float32).reshape(HIDDEN, 1)
    w2t = jnp.transpose(w2.astype(jnp.float32))              # (1, HIDDEN)
    b2c = b2.astype(jnp.float32).reshape(1, 1)

    y2d = pl.pallas_call(
        tensorf_kernel,
        out_shape=jax.ShapeDtypeStruct((1, n_pad), jnp.float32),
        grid_spec=pltpu.PrefetchScalarGridSpec(
            num_scalar_prefetch=0,
            grid=(num_tiles,),
            in_specs=[
                pl.BlockSpec((IN_DIM, tm), lambda i: (0, i)),       # x tile
                pl.BlockSpec((IN_DIM, 1), lambda i: (0, 0)),        # scale
                pl.BlockSpec((IN_DIM, 1), lambda i: (0, 0)),        # shift
                pl.BlockSpec((HIDDEN, PE_DIM), lambda i: (0, 0)),   # W1^T
                pl.BlockSpec((HIDDEN, 1), lambda i: (0, 0)),        # b1
                pl.BlockSpec((1, HIDDEN), lambda i: (0, 0)),        # W2^T
                pl.BlockSpec((1, 1), lambda i: (0, 0)),             # b2
            ],
            out_specs=pl.BlockSpec((1, tm), lambda i: (0, i)),      # lane-dense
        ),
        compiler_params=pltpu.CompilerParams(
            dimension_semantics=("parallel",)),
    )(xt, scale, shift, w1t, b1c, w2t, b2c)

    # glue: drop padding + squeeze(-1) equivalent
    return y2d[0, :N]


# --------------------------- pure-JAX reference ------------------------------
def tensorf_reference(x, xyz_min, xyz_max, w1, b1, w2, b2):
    x_ts = (x - xyz_min[None, :]) / (xyz_max[None, :] - xyz_min[None, :]) * 2.0 - 1.0
    feats = [x_ts]
    for i in range(L_FREQS):
        freq = 2.0 ** i
        feats.append(jnp.sin(x_ts * freq))
        feats.append(jnp.cos(x_ts * freq))
    x_pe = jnp.concatenate(feats, axis=-1)
    h = jnp.maximum(x_pe @ w1 + b1[None, :], 0.0)
    y = h @ w2 + b2[None, :]
    return y[:, 0]


# --------------------------------- main --------------------------------------
if __name__ == "__main__":
    key = jax.random.PRNGKey(0)
    k_x, k_w1, k_b1, k_w2, k_b2 = jax.random.split(key, 5)

    N = 4100   # ragged on purpose: pads to 3 tiles of TM=2048
    xyz_min = jnp.array([-1.5, -1.5, -1.5], dtype=jnp.float32)
    xyz_max = jnp.array([1.5, 1.5, 1.5], dtype=jnp.float32)

    # query points inside the bounding box
    x = jax.random.uniform(k_x, (N, IN_DIM), dtype=jnp.float32,
                           minval=-1.5, maxval=1.5)

    # deterministic synthetic decoder parameters
    w1 = jax.random.normal(k_w1, (PE_DIM, HIDDEN), dtype=jnp.float32) * 0.1
    b1 = jax.random.normal(k_b1, (HIDDEN,), dtype=jnp.float32) * 0.01
    w2 = jax.random.normal(k_w2, (HIDDEN, 1), dtype=jnp.float32) * 0.1
    b2 = jax.random.normal(k_b2, (1,), dtype=jnp.float32) * 0.01

    y = tensorf_forward(x, xyz_min, xyz_max, w1, b1, w2, b2)
    y = jax.block_until_ready(y)

    y_ref = tensorf_reference(x, xyz_min, xyz_max, w1, b1, w2, b2)
    assert y.shape == (N,)
    # slightly relaxed tolerance: double-angle recurrence differs from exact
    # sin/cos at high frequencies by a few ulps
    assert jnp.allclose(y, y_ref, atol=1e-4, rtol=1e-4), "mismatch vs reference"

    print("KERNEL_OK")
</pallas_src>

<mosaic_0001>
module attributes {stable_mosaic.version = 11 : i64} {
  func.func @tensorf_kernel(%arg0: i32, %arg1: memref<3x2048xf32, #tpu.memory_space<vmem>>, %arg2: memref<3x1xf32, #tpu.memory_space<vmem>>, %arg3: memref<3x1xf32, #tpu.memory_space<vmem>>, %arg4: memref<32x27xf32, #tpu.memory_space<vmem>>, %arg5: memref<32x1xf32, #tpu.memory_space<vmem>>, %arg6: memref<1x32xf32, #tpu.memory_space<vmem>>, %arg7: memref<1x1xf32, #tpu.memory_space<vmem>>, %arg8: memref<1x2048xf32, #tpu.memory_space<vmem>>) attributes {dimension_semantics = [#tpu.dimension_semantics<parallel>], iteration_bounds = array<i64: 3>, scalar_prefetch = 0 : i64, scratch_operands = 0 : i64, tpu.core_type = #tpu.core_type<tc>, window_params = [{transform_indices = @transform_0, window_bounds = array<i64: 3, 2048>}, {pipeline_mode = #tpu.pipeline_mode<synchronous>, transform_indices = @transform_1, window_bounds = array<i64: 3, 1>}, {pipeline_mode = #tpu.pipeline_mode<synchronous>, transform_indices = @transform_2, window_bounds = array<i64: 3, 1>}, {pipeline_mode = #tpu.pipeline_mode<synchronous>, transform_indices = @transform_3, window_bounds = array<i64: 32, 27>}, {pipeline_mode = #tpu.pipeline_mode<synchronous>, transform_indices = @transform_4, window_bounds = array<i64: 32, 1>}, {pipeline_mode = #tpu.pipeline_mode<synchronous>, transform_indices = @transform_5, window_bounds = array<i64: 1, 32>}, {pipeline_mode = #tpu.pipeline_mode<synchronous>, transform_indices = @transform_6, window_bounds = array<i64: 1, 1>}, {transform_indices = @transform_7, window_bounds = array<i64: 1, 2048>}]} {
    %c0 = arith.constant 0 : index
    %c0_0 = arith.constant 0 : index
    %0 = vector.load %arg1[%c0, %c0_0] : memref<3x2048xf32, #tpu.memory_space<vmem>>, vector<3x2048xf32>
    %c0_1 = arith.constant 0 : index
    %c0_2 = arith.constant 0 : index
    %1 = vector.load %arg2[%c0_1, %c0_2] : memref<3x1xf32, #tpu.memory_space<vmem>>, vector<3x1xf32>
    %2 = vector.broadcast %1 : vector<3x1xf32> to vector<3x2048xf32>
    %3 = arith.mulf %0, %2 : vector<3x2048xf32>
    %c0_3 = arith.constant 0 : index
    %c0_4 = arith.constant 0 : index
    %4 = vector.load %arg3[%c0_3, %c0_4] : memref<3x1xf32, #tpu.memory_space<vmem>>, vector<3x1xf32>
    %5 = vector.broadcast %4 : vector<3x1xf32> to vector<3x2048xf32>
    %6 = arith.addf %3, %5 : vector<3x2048xf32>
    %c0_5 = arith.constant 0 : index
    %c0_6 = arith.constant 0 : index
    %7 = vector.load %arg4[%c0_5, %c0_6] : memref<32x27xf32, #tpu.memory_space<vmem>>, vector<32x27xf32>
    %8 = vector.extract_strided_slice %7 {offsets = [0, 0], sizes = [32, 3], strides = [1, 1]} : vector<32x27xf32> to vector<32x3xf32>
    %cst = arith.constant dense<0.000000e+00> : vector<32x2048xf32>
    %9 = tpu.matmul %8, %6, %cst {dimension_numbers = #tpu.dot_dimension_numbers<[1], [0], [0], [1], [0, 0, 1, 1], [], []>} : vector<32x3xf32>, vector<3x2048xf32>, vector<32x2048xf32> -> vector<32x2048xf32>
    %10 = math.sin %6 : vector<3x2048xf32>
    %11 = math.cos %6 : vector<3x2048xf32>
    %12 = vector.extract_strided_slice %7 {offsets = [0, 3], sizes = [32, 3], strides = [1, 1]} : vector<32x27xf32> to vector<32x3xf32>
    %cst_7 = arith.constant dense<0.000000e+00> : vector<32x2048xf32>
    %13 = tpu.matmul %12, %10, %cst_7 {dimension_numbers = #tpu.dot_dimension_numbers<[1], [0], [0], [1], [0, 0, 1, 1], [], []>} : vector<32x3xf32>, vector<3x2048xf32>, vector<32x2048xf32> -> vector<32x2048xf32>
    %14 = arith.addf %9, %13 : vector<32x2048xf32>
    %15 = vector.extract_strided_slice %7 {offsets = [0, 6], sizes = [32, 3], strides = [1, 1]} : vector<32x27xf32> to vector<32x3xf32>
    %cst_8 = arith.constant dense<0.000000e+00> : vector<32x2048xf32>
    %16 = tpu.matmul %15, %11, %cst_8 {dimension_numbers = #tpu.dot_dimension_numbers<[1], [0], [0], [1], [0, 0, 1, 1], [], []>} : vector<32x3xf32>, vector<3x2048xf32>, vector<32x2048xf32> -> vector<32x2048xf32>
    %17 = arith.addf %14, %16 : vector<32x2048xf32>
    %cst_9 = arith.constant 2.000000e+00 : f32
    %18 = vector.broadcast %cst_9 : f32 to vector<3x2048xf32>
    %19 = arith.mulf %18, %10 : vector<3x2048xf32>
    %20 = arith.mulf %19, %11 : vector<3x2048xf32>
    %cst_10 = arith.constant 2.000000e+00 : f32
    %21 = vector.broadcast %cst_10 : f32 to vector<3x2048xf32>
    %22 = arith.mulf %21, %10 : vector<3x2048xf32>
    %23 = arith.mulf %22, %10 : vector<3x2048xf32>
    %cst_11 = arith.constant 1.000000e+00 : f32
    %24 = vector.broadcast %cst_11 : f32 to vector<3x2048xf32>
    %25 = arith.subf %24, %23 : vector<3x2048xf32>
    %26 = vector.extract_strided_slice %7 {offsets = [0, 9], sizes = [32, 3], strides = [1, 1]} : vector<32x27xf32> to vector<32x3xf32>
    %cst_12 = arith.constant dense<0.000000e+00> : vector<32x2048xf32>
    %27 = tpu.matmul %26, %20, %cst_12 {dimension_numbers = #tpu.dot_dimension_numbers<[1], [0], [0], [1], [0, 0, 1, 1], [], []>} : vector<32x3xf32>, vector<3x2048xf32>, vector<32x2048xf32> -> vector<32x2048xf32>
    %28 = arith.addf %17, %27 : vector<32x2048xf32>
    %29 = vector.extract_strided_slice %7 {offsets = [0, 12], sizes = [32, 3], strides = [1, 1]} : vector<32x27xf32> to vector<32x3xf32>
    %cst_13 = arith.constant dense<0.000000e+00> : vector<32x2048xf32>
    %30 = tpu.matmul %29, %25, %cst_13 {dimension_numbers = #tpu.dot_dimension_numbers<[1], [0], [0], [1], [0, 0, 1, 1], [], []>} : vector<32x3xf32>, vector<3x2048xf32>, vector<32x2048xf32> -> vector<32x2048xf32>
    %31 = arith.addf %28, %30 : vector<32x2048xf32>
    %cst_14 = arith.constant 2.000000e+00 : f32
    %32 = vector.broadcast %cst_14 : f32 to vector<3x2048xf32>
    %33 = arith.mulf %32, %20 : vector<3x2048xf32>
    %34 = arith.mulf %33, %25 : vector<3x2048xf32>
    %cst_15 = arith.constant 2.000000e+00 : f32
    %35 = vector.broadcast %cst_15 : f32 to vector<3x2048xf32>
    %36 = arith.mulf %35, %20 : vector<3x2048xf32>
    %37 = arith.mulf %36, %20 : vector<3x2048xf32>
    %cst_16 = arith.constant 1.000000e+00 : f32
    %38 = vector.broadcast %cst_16 : f32 to vector<3x2048xf32>
    %39 = arith.subf %38, %37 : vector<3x2048xf32>
    %40 = vector.extract_strided_slice %7 {offsets = [0, 15], sizes = [32, 3], strides = [1, 1]} : vector<32x27xf32> to vector<32x3xf32>
    %cst_17 = arith.constant dense<0.000000e+00> : vector<32x2048xf32>
    %41 = tpu.matmul %40, %34, %cst_17 {dimension_numbers = #tpu.dot_dimension_numbers<[1], [0], [0], [1], [0, 0, 1, 1], [], []>} : vector<32x3xf32>, vector<3x2048xf32>, vector<32x2048xf32> -> vector<32x2048xf32>
    %42 = arith.addf %31, %41 : vector<32x2048xf32>
    %43 = vector.extract_strided_slice %7 {offsets = [0, 18], sizes = [32, 3], strides = [1, 1]} : vector<32x27xf32> to vector<32x3xf32>
    %cst_18 = arith.constant dense<0.000000e+00> : vector<32x2048xf32>
    %44 = tpu.matmul %43, %39, %cst_18 {dimension_numbers = #tpu.dot_dimension_numbers<[1], [0], [0], [1], [0, 0, 1, 1], [], []>} : vector<32x3xf32>, vector<3x2048xf32>, vector<32x2048xf32> -> vector<32x2048xf32>
    %45 = arith.addf %42, %44 : vector<32x2048xf32>
    %cst_19 = arith.constant 2.000000e+00 : f32
    %46 = vector.broadcast %cst_19 : f32 to vector<3x2048xf32>
    %47 = arith.mulf %46, %34 : vector<3x2048xf32>
    %48 = arith.mulf %47, %39 : vector<3x2048xf32>
    %cst_20 = arith.constant 2.000000e+00 : f32
    %49 = vector.broadcast %cst_20 : f32 to vector<3x2048xf32>
    %50 = arith.mulf %49, %34 : vector<3x2048xf32>
    %51 = arith.mulf %50, %34 : vector<3x2048xf32>
    %cst_21 = arith.constant 1.000000e+00 : f32
    %52 = vector.broadcast %cst_21 : f32 to vector<3x2048xf32>
    %53 = arith.subf %52, %51 : vector<3x2048xf32>
    %54 = vector.extract_strided_slice %7 {offsets = [0, 21], sizes = [32, 3], strides = [1, 1]} : vector<32x27xf32> to vector<32x3xf32>
    %cst_22 = arith.constant dense<0.000000e+00> : vector<32x2048xf32>
    %55 = tpu.matmul %54, %48, %cst_22 {dimension_numbers = #tpu.dot_dimension_numbers<[1], [0], [0], [1], [0, 0, 1, 1], [], []>} : vector<32x3xf32>, vector<3x2048xf32>, vector<32x2048xf32> -> vector<32x2048xf32>
    %56 = arith.addf %45, %55 : vector<32x2048xf32>
    %57 = vector.extract_strided_slice %7 {offsets = [0, 24], sizes = [32, 3], strides = [1, 1]} : vector<32x27xf32> to vector<32x3xf32>
    %cst_23 = arith.constant dense<0.000000e+00> : vector<32x2048xf32>
    %58 = tpu.matmul %57, %53, %cst_23 {dimension_numbers = #tpu.dot_dimension_numbers<[1], [0], [0], [1], [0, 0, 1, 1], [], []>} : vector<32x3xf32>, vector<3x2048xf32>, vector<32x2048xf32> -> vector<32x2048xf32>
    %59 = arith.addf %56, %58 : vector<32x2048xf32>
    %c0_24 = arith.constant 0 : index
    %c0_25 = arith.constant 0 : index
    %60 = vector.load %arg5[%c0_24, %c0_25] : memref<32x1xf32, #tpu.memory_space<vmem>>, vector<32x1xf32>
    %61 = vector.broadcast %60 : vector<32x1xf32> to vector<32x2048xf32>
    %62 = arith.addf %59, %61 : vector<32x2048xf32>
    %cst_26 = arith.constant 0.000000e+00 : f32
    %63 = vector.broadcast %cst_26 : f32 to vector<32x2048xf32>
    %64 = arith.maximumf %62, %63 : vector<32x2048xf32>
    %c0_27 = arith.constant 0 : index
    %c0_28 = arith.constant 0 : index
    %65 = vector.load %arg6[%c0_27, %c0_28] : memref<1x32xf32, #tpu.memory_space<vmem>>, vector<1x32xf32>
    %cst_29 = arith.constant dense<0.000000e+00> : vector<1x2048xf32>
    %66 = tpu.matmul %65, %64, %cst_29 {dimension_numbers = #tpu.dot_dimension_numbers<[1], [0], [0], [1], [0, 0, 1, 1], [], []>} : vector<1x32xf32>, vector<32x2048xf32>, vector<1x2048xf32> -> vector<1x2048xf32>
    %c0_30 = arith.constant 0 : index
    %c0_31 = arith.constant 0 : index
    %67 = vector.load %arg7[%c0_30, %c0_31] : memref<1x1xf32, #tpu.memory_space<vmem>>, vector<1x1xf32>
    %68 = vector.broadcast %67 : vector<1x1xf32> to vector<1x2048xf32>
    %69 = arith.addf %66, %68 : vector<1x2048xf32>
    %c0_32 = arith.constant 0 : index
    %c0_33 = arith.constant 0 : index
    %70 = vector.load %arg8[%c0_32, %c0_33] : memref<1x2048xf32, #tpu.memory_space<vmem>>, vector<1x2048xf32>
    tpu.vector_store %arg8[%c0_32, %c0_33], %69 {strides = array<i32>} : memref<1x2048xf32, #tpu.memory_space<vmem>>, vector<1x2048xf32>,
    return
  }
  func.func @transform_0(%arg0: i32) -> (i32, i32) {
    %c0_i32 = arith.constant 0 : i32
    %c0_i32_0 = arith.constant 0 : i32
    return %c0_i32, %arg0 : i32, i32
  }
  func.func @transform_1(%arg0: i32) -> (i32, i32) {
    %c0_i32 = arith.constant 0 : i32
    %c0_i32_0 = arith.constant 0 : i32
    %c0_i32_1 = arith.constant 0 : i32
    return %c0_i32, %c0_i32_0 : i32, i32
  }
  func.func @transform_2(%arg0: i32) -> (i32, i32) {
    %c0_i32 = arith.constant 0 : i32
    %c0_i32_0 = arith.constant 0 : i32
    %c0_i32_1 = arith.constant 0 : i32
    return %c0_i32, %c0_i32_0 : i32, i32
  }
  func.func @transform_3(%arg0: i32) -> (i32, i32) {
    %c0_i32 = arith.constant 0 : i32
    %c0_i32_0 = arith.constant 0 : i32
    %c0_i32_1 = arith.constant 0 : i32
    return %c0_i32, %c0_i32_0 : i32, i32
  }
  func.func @transform_4(%arg0: i32) -> (i32, i32) {
    %c0_i32 = arith.constant 0 : i32
    %c0_i32_0 = arith.constant 0 : i32
    %c0_i32_1 = arith.constant 0 : i32
    return %c0_i32, %c0_i32_0 : i32, i32
  }
  func.func @transform_5(%arg0: i32) -> (i32, i32) {
    %c0_i32 = arith.constant 0 : i32
    %c0_i32_0 = arith.constant 0 : i32
    %c0_i32_1 = arith.constant 0 : i32
    return %c0_i32, %c0_i32_0 : i32, i32
  }
  func.func @transform_6(%arg0: i32) -> (i32, i32) {
    %c0_i32 = arith.constant 0 : i32
    %c0_i32_0 = arith.constant 0 : i32
    %c0_i32_1 = arith.constant 0 : i32
    return %c0_i32, %c0_i32_0 : i32, i32
  }
  func.func @transform_7(%arg0: i32) -> (i32, i32) {
    %c0_i32 = arith.constant 0 : i32
    %c0_i32_0 = arith.constant 0 : i32
    return %c0_i32, %arg0 : i32, i32
  }
}

</mosaic_0001>

<bundles_post_ra>
// kernel: tpu_custom_call.1
= control target key start
LH: loop header
LB: loop body
LE: loop exit
PB: predicated region body
PF: predicated region fallthrough
CT: control target
= control target key end

     0   :  { %s14450_s0 = inlined_call_operand.hbm [shape: f32[3,6144], index: 0, kind: input, shape index: {}]   ;;  %s14451_s1 = inlined_call_operand.vmem [shape: f32[3,1], index: 1, kind: input, shape index: {}]   ;;  %s14452_s2 = inlined_call_operand.vmem [shape: f32[3,1], index: 2, kind: input, shape index: {}]   ;;  %s14453_s3 = inlined_call_operand.vmem [shape: f32[32,27], index: 3, kind: input, shape index: {}]   ;;  %s14454_s4 = inlined_call_operand.vmem [shape: f32[32,1], index: 4, kind: input, shape index: {}]   ;;  %s14455_s5 = inlined_call_operand.vmem [shape: f32[1,32], index: 5, kind: input, shape index: {}]   ;;  %s14456_s6 = inlined_call_operand.<no memory space> [shape: f32[1,1], index: 6, kind: input, shape index: {}]   ;;  %s14457_s7 = inlined_call_operand.hbm [shape: f32[1,6144], index: 7, kind: output, shape index: {}]  }
   0x1   :  { %v12_v0 = vstv %s14456_s6 }
   0x2   :  { %13 = vst [vmem:[#allocation2] sm:$0x1] %v12_v0 }
   0x3   :  { %14 = vsyncpa [#allocation4], 0 }
   0x4   :  { %16 = vsyncpa [#allocation4 + $0x1], 0 }
   0x5   :  { %17 = vsyncpa [#allocation5], 0 }
   0x6   :  { %19 = vsyncpa [#allocation5 + $0x1], 0  ;;  %s11864_s26 = smov 0   ;;  %s11866_s27 = smov 0  }
   0x7   :  { %s11868_s28 = smov 0   ;;  %s11870_s29 = smov 0  }
   0x8 LB: > { %s11885_s6 = sadd.s32 4294967295, %s11799_s29   ;;  %s10473_s30 = sadd.s32 4294967294, %s11799_s29   ;;  %s11799_s29 = sphi %s11870_s29, %s14786_s29   ;;  %s11795_s28 = sphi %s11868_s28, %s14785_s28   ;;  %s11791_s27 = sphi %s11866_s27, %s14784_s27   ;;  %s11787_s26 = sphi %s11864_s26, %s14783_s26  }
   0x9   : > { %s11889_s8 = sadd.s32 1, %s11799_s29   ;;  %s32_s9 = sadd.s32 1, %s11795_s28 }
   0xa   : > { %s29_s10 = ssub.s32 %s11799_s29, %s11889_s8  ;;  %p39_p0 = scmp.ne.s32.totalorder %s11795_s28, %s11791_s27 }
   0xb   : > { %p30_p1 = scmp.eq.s32.totalorder %s29_s10, 0  ;;  %p40_p2 = scmp.eq.s32.totalorder %s11799_s29, 0 }
   0xc   : > { %p45_p3 = scmp.ne.s32.totalorder %s11791_s27, %s11787_s26  ;;  %p46_p4 = scmp.eq.s32.totalorder %s11885_s6, 0 }
   0xd   : > { %s11901_s11 = scalar_select %p30_p1, %s11795_s28, %s32_s9  }
   0xe   : > { %p11903_p5 = por %p40_p2, %p39_p0  ;;  %p11907_p6 = por %p46_p4, %p45_p3 }
   0xf   : > { %p195_p7 = scmp.eq.s32.totalorder %s11885_s6, 2  ;;  %p201_p8 = scmp.eq.s32.totalorder %s10473_s30, 2 }
  0x10   : > { %p11613_p9 = scmp.lt.s32.totalorder %s11799_s29, 3  ;;  %s239_s16 = sand.u32 1, %s11795_s28  }
  0x11   : > { %p11913_p10 = por %p195_p7, %p39_p0  ;;  %p11917_p11 = por %p201_p8, %p45_p3 }
  0x12   : > { %s10991_s17 = sshll.u32 %s11799_s29, 10  ;;  %s10476_s18 = sshll.u32 %s239_s16, 6 }
  0x13   : > { %s14480_s14 = scalar_select %p11913_p10, 1, 0 }
  0x14   : > { %s14481_s15 = scalar_select %p11917_p11, 1, 0 }
  0x15   : > { %s11926_s21 = scalar_lea.hbm %s14450_s0, %s10991_s17  ;;  %s243_s22 = scalar_lea.vmem [#allocation3], %s10476_s18 }
  0x16   : > { %s251_s23 = sshll.u32 %s243_s22, 4  ;;  %p11930_p12 = pnand %p11613_p9, %p11903_p5  ;;  %s11934_s23 = int_to_ptr.vmem [resolvable:$true] %s251_s23 }
  0x17   : > { %s240_s25 = scalar_lea.sflag [#allocation4], %s239_s16  ;;  %s11703_s30 = scalar_lea.hbm %s11926_s21, 1024 }
  0x18   : > { %p11704_p1 = scmp.ne.s32.totalorder %s11926_s21, %s11703_s30  ;;  %p11705_p2 = pneg %p11930_p12 }
  0x19   : > { %s11708_s12 = scalar_lea.hbm %s14450_s0, 3072  ;;  %p11709_p5 = scmp.lt.u32.totalorder %s11926_s21, %s14450_s0 }
  0x1a   : > { %p11706_p3 = pnand %p11705_p2, %p11704_p1  ;;  %p11710_p7 = scmp.lt.u32.totalorder %s11708_s12, %s11703_s30 }
  0x1b   : > { %p11712_p9 = scmp.lt.u32.totalorder %s11703_s30, %s11926_s21 }
  0x1c   : > { %p11707_p4 = pneg %p11706_p3  ;;  %p11711_p8 = por %p11710_p7, %p11709_p5 }
  0x1e   : > { %p11713_p13 = por %p11712_p9, %p11711_p8 }
  0x20   : > { %p11714_p0 = pnand %p11713_p13, %p11707_p4 }
  0x22   : > { %11717 = shalt.err (!%p11714_p0)
}
  0x23   : > { %s11718_s16 = scalar_lea.vmem %s11934_s23, 1024  ;;  %s11801_s19 = smov [#allocation3]  }
  0x24   : > { %p11719_p1 = scmp.ne.s32.totalorder %s11934_s23, %s11718_s16  ;;  %s11723_s20 = sshll.u32 %s11801_s19, 4  ;;  %s11724_s20 = int_to_ptr.vmem [resolvable:$false] %s11723_s20 }
  0x25   : > { %s11725_s22 = scalar_lea.vmem %s11724_s20, 2048  ;;  %p11726_p10 = scmp.lt.s32.totalorder %s11934_s23, %s11724_s20 }
  0x26   : > { %p11721_p3 = pnand %p11719_p1, %p11705_p2  ;;  %p11727_p5 = scmp.lt.s32.totalorder %s11725_s22, %s11718_s16 }
  0x28   : > { %p11722_p11 = pneg %p11721_p3  ;;  %p11728_p7 = por %p11727_p5, %p11726_p10 }
  0x2a   : > { %p11729_p8 = pnand %p11728_p7, %p11722_p11 }
  0x2c   : > { %11732 = shalt.err (!%p11729_p8)
}
  0x2d   : > { %11608 = dma.hbm_to_vmem [thread:$0]  (!%p11930_p12), %s11926_s21, 1024, %s11934_s23, %s240_s25  }
  0x2e   : > { %p14483_p13 = scmp.lt.s32.totalorder %s11799_s29, 4  ;;  %p14484_p0 = scmp.ge.s32.totalorder %s11799_s29, 1 }
  0x30   : > { %p257_p2 = pnand %p14484_p0, %p14483_p13 }
  0x31   : > { %s11968_s30 = sand.u32 (!%p257_p2), 1, %s11791_s27  }
  0x32   : > { %260 = sbr.rel (%p257_p2) target bundleno = 1431 (0x597), region = 48  ;;  %s10480_s9 = sshll.u32 (!%p257_p2), %s11968_s30, 6 }
  0x33   : > { %s263_s10 = scalar_lea.sflag (!%p257_p2), [#allocation4], %s11968_s30  ;;  %s11972_s12 = scalar_lea.vmem (!%p257_p2), [#allocation3], %s10480_s9 }
  0x39   : > { %11778 = dma.done.wait (%p11907_p6), %s263_s10, 1024  }
  0x3a   : > { %11780 = vsyncadd (%p11907_p6), %s263_s10, 4294966272  ;;  %v11802_v1 = vmov 0   ;;  %v307_v2 = vld [vmem:[%s14451_s1] sm:$0x7]  ;;  %s11803_s16 = smov 125   ;;  %v350_v5 = vld [vmem:[%s14453_s3 + $0x8] sm:$0xff]  ;;  %v315_v14 = vlaneseq }
  0x3b   : > { %11665 = vset.pattern.permute.xlu0 %v11802_v1  ;;  %11666 = vset.pattern.permute.xlu1 %v11802_v1  ;;  %v349_v3 = vld [vmem:[%s14453_s3] sm:$0xff]  ;;  %v351_v6 = vld [vmem:[%s14453_s3 + $0x10] sm:$0xff]  ;;  %v352_v7 = vld [vmem:[%s14453_s3 + $0x18] sm:$0xff]  ;;  %s11804_s21 = smov 122   ;;  %s11805_s23 = smov 119   ;;  %v14473_v11 = vmov 0.0  }
  0x3c   : > { %310 = vperm.xlu0 %11665, %v307_v2   ;;  %v328_v4 = vld [vmem:[%s14452_s2] sm:$0x7]  ;;  %2013 = vrot.lane.b32.xlu1 %v349_v3, %s11803_s16  ;;  %s11806_s24 = smov 116   ;;  %s11807_s25 = smov 113   ;;  %v9537_v9 = vld [vmem:[%s14454_s4 + $0x10] sm:$0xff]  ;;  %v12004_v16 = vshrl.u32 %v315_v14, 7 }
  0x3d   : > { %s11808_s17 = smov 110   ;;  %s11809_s18 = smov 107   ;;  %v9535_v8 = vld [vmem:[%s14454_s4] sm:$0xff]  ;;  %2143 = vmatprep.mubr.f32.mxu0 %v14473_v11  ;;  %2232 = vmatprep.mubr.f32.mxu1 %v14473_v11  ;;  %v11812_v12 = vmov 839922192  }
  0x3e   : > { %v9688_v10 = vld [vmem:[#allocation2] sm:$0x1]  ;;  %v313_v13 = vunpack.c.l.s4 %v11812_v12  ;;  %v299_v19 = vld [vmem:[%s11972_s12] sm:$0x77]  ;;  %v301_v20 = vld [vmem:[%s11972_s12 + $0x10] sm:$0x77] }
  0x3f   : > { %v302_v22 = vld [vmem:[%s11972_s12 + $0x18] sm:$0x77]  ;;  %v303_v23 = vld [vmem:[%s11972_s12 + $0x20] sm:$0x77]  ;;  %v304_v24 = vld [vmem:[%s11972_s12 + $0x28] sm:$0x77] }
  0x40   : > { %331 = vperm.xlu0 %11665, %v328_v4   ;;  %2015 = vrot.lane.b32.xlu1 %v350_v5, %s11803_s16  ;;  %v314_v15 = vunpack.c.0.s8 %v313_v13  ;;  %v300_v25 = vld [vmem:[%s11972_s12 + $0x8] sm:$0x77]  ;;  %v305_v26 = vld [vmem:[%s11972_s12 + $0x30] sm:$0x77]  ;;  %v306_v27 = vld [vmem:[%s11972_s12 + $0x38] sm:$0x77] }
  0x41   : > { %v14469_v14 = vmov 2475754826   ;;  %s10481_s12 = sshll.u32 %s11968_s30, 4  ;;  %s10992_s10 = sshll.u32 %s11885_s6, 8 }
  0x42   : > { %v317_v17 = vsub.s32 %v314_v15, %v12004_v16  ;;  %s296_s9 = scalar_lea.vmem [#allocation6], %s10481_s12  ;;  %p14781_p10 = scmp.ne.s32.totalorder %s14480_s14, 0 }
  0x43   : > { %s11820_s6 = smov [#allocation6]  }
  0x44   : > { %2017 = vrot.lane.b32.xlu0 %v351_v6, %s11803_s16  ;;  %2019 = vrot.lane.b32.xlu1 %v352_v7, %s11803_s16  ;;  %s11810_s16 = smov 104  }
  0x48   : > { %3559 = vrot.lane.b32.xlu0 %v349_v3, %s11804_s21  ;;  %3561 = vrot.lane.b32.xlu1 %v350_v5, %s11804_s21 }
  0x4c   : > { %3563 = vrot.lane.b32.xlu0 %v351_v6, %s11804_s21  ;;  %3565 = vrot.lane.b32.xlu1 %v352_v7, %s11804_s21  ;;  %s10403_s21 = sshll.u32 %s296_s9, 4  ;;  %s14409_s21 = int_to_ptr.vmem [resolvable:$true] %s10403_s21 }
  0x50   : > { %4431 = vrot.lane.b32.xlu0 %v349_v3, %s11805_s23  ;;  %4433 = vrot.lane.b32.xlu1 %v350_v5, %s11805_s23 }
  0x54   : > { %4435 = vrot.lane.b32.xlu0 %v351_v6, %s11805_s23  ;;  %4437 = vrot.lane.b32.xlu1 %v352_v7, %s11805_s23 }
  0x58   : > { %5271 = vrot.lane.b32.xlu0 %v349_v3, %s11806_s24  ;;  %5273 = vrot.lane.b32.xlu1 %v350_v5, %s11806_s24 }
  0x5c   : > { %5275 = vrot.lane.b32.xlu0 %v351_v6, %s11806_s24  ;;  %5277 = vrot.lane.b32.xlu1 %v352_v7, %s11806_s24 }
  0x60   : > { %6143 = vrot.lane.b32.xlu0 %v349_v3, %s11807_s25  ;;  %6145 = vrot.lane.b32.xlu1 %v350_v5, %s11807_s25 }
  0x64   : > { %6147 = vrot.lane.b32.xlu0 %v351_v6, %s11807_s25  ;;  %6149 = vrot.lane.b32.xlu1 %v352_v7, %s11807_s25  ;;  %s14407_s25 = scalar_lea.hbm %s14457_s7, %s10992_s10 }
  0x68   : > { %6983 = vrot.lane.b32.xlu0 %v349_v3, %s11808_s17  ;;  %6985 = vrot.lane.b32.xlu1 %v350_v5, %s11808_s17 }
  0x6c   : > { %6987 = vrot.lane.b32.xlu0 %v351_v6, %s11808_s17  ;;  %6989 = vrot.lane.b32.xlu1 %v352_v7, %s11808_s17  ;;  %s10389_s17 = scalar_lea.sflag [#allocation5], %s11968_s30 }
  0x70   : > { %7855 = vrot.lane.b32.xlu0 %v349_v3, %s11809_s18  ;;  %7857 = vrot.lane.b32.xlu1 %v350_v5, %s11809_s18 }
  0x74   : > { %7859 = vrot.lane.b32.xlu0 %v351_v6, %s11809_s18  ;;  %7861 = vrot.lane.b32.xlu1 %v352_v7, %s11809_s18  ;;  %s11733_s18 = scalar_lea.vmem %s14409_s21, 256 }
  0x75   : > { %p11734_p6 = scmp.ne.s32.totalorder %s14409_s21, %s11733_s18 }
  0x77   : > { %p11735_p11 = pnand %p11734_p6, %p14781_p10 }
  0x78   : > { %8695 = vrot.lane.b32.xlu0 %v349_v3, %s11810_s16  ;;  %8697 = vrot.lane.b32.xlu1 %v350_v5, %s11810_s16 }
  0x79   : > { %p11736_p12 = pneg %p11735_p11 }
  0x7c   : > { %8699 = vrot.lane.b32.xlu0 %v351_v6, %s11810_s16  ;;  %8701 = vrot.lane.b32.xlu1 %v352_v7, %s11810_s16  ;;  %s11737_s16 = sshll.u32 %s11820_s6, 4  ;;  %s11738_s16 = int_to_ptr.vmem [resolvable:$false] %s11737_s16 }
  0x7d   : > { %s11739_s13 = scalar_lea.vmem %s11738_s16, 512  ;;  %p11740_p4 = scmp.lt.s32.totalorder %s14409_s21, %s11738_s16 }
  0x7e   : > { %p11741_p9 = scmp.lt.s32.totalorder %s11739_s13, %s11733_s18 }
  0x80   : > { %9541 = vperm.xlu0 %11665, %v9535_v8   ;;  %p11742_p1 = por %p11741_p9, %p11740_p4 }
  0x82   : > { %p11743_p3 = pnand %p11742_p1, %p11736_p12 }
  0x84   : > { %9551 = vperm.xlu0 %11665, %v9537_v9   ;;  %v14467_v9 = vmov 683565275  }
  0x88   : > { %9691 = vperm.xlu0 %11665, %v9688_v10  }
  0xbb   : > { %v311_v18 = vpop.permute.xlu0 %310 }
  0xbc   : > { %v318_v21 = vrot.slane %v311_v18, %v317_v17 }
  0xbe   : > { %v322_v28 = vmul.f32 %v318_v21, %v301_v20  ;;  %v323_v30 = vmul.f32 %v318_v21, %v302_v22  ;;  %v324_v31 = vmul.f32 %v318_v21, %v303_v23  ;;  %v325_v32 = vmul.f32 %v318_v21, %v304_v24 }
  0xbf   : > { %v332_v29 = vpop.permute.xlu0 %331  ;;  %v320_v34 = vmul.f32 %v318_v21, %v299_v19  ;;  %v321_v35 = vmul.f32 %v318_v21, %v300_v25  ;;  %v326_v36 = vmul.f32 %v318_v21, %v305_v26  ;;  %v327_v37 = vmul.f32 %v318_v21, %v306_v27 }
  0xc0   : > { %v339_v33 = vrot.slane %v332_v29, %v317_v17  ;;  %v14465_v17 = vmov 2131351028   ;;  %v11816_v19 = vmov 2102212464   ;;  %v14476_v21 = vmov 920167782  }
  0xc2   : > { %v12015_v38 = vadd.f32 %v339_v33, %v322_v28  ;;  %v12017_v39 = vadd.f32 %v339_v33, %v323_v30  ;;  %v12019_v40 = vadd.f32 %v339_v33, %v324_v31  ;;  %v12021_v41 = vadd.f32 %v339_v33, %v325_v32 }
  0xc3   : > { %v12023_v42 = vadd.f32 %v339_v33, %v326_v36  ;;  %v12025_v43 = vadd.f32 %v339_v33, %v327_v37  ;;  %v12027_v44 = vadd.f32 %v339_v33, %v320_v34  ;;  %v12029_v45 = vadd.f32 %v339_v33, %v321_v35 }
  0xc4   : > { %v564_v46 = vand.u32 2139095040, %v12015_v38  ;;  %v561_v6 = vand.u32 2147483647, %v12015_v38  ;;  %v14475_v28 = vmov 1326507024  }
  0xc5   : > { %v353_v47 = vand.u32 2147483647, %v12027_v44  ;;  %v356_v48 = vand.u32 2139095040, %v12027_v44  ;;  %v457_v49 = vand.u32 2147483647, %v12029_v45  ;;  %v460_v50 = vand.u32 2139095040, %v12029_v45 }
  0xc6   : > { %v565_v52 = vshrl.u32 %v564_v46, 23  ;;  %vm355_vm13 = vcmp.lt.s32.totalorder %v12027_v44, 0  ;;  %vm459_vm14 = vcmp.lt.s32.totalorder %v12029_v45, 0 }
  0xc7   : > { %v357_v51 = vshrl.u32 %v356_v48, 23  ;;  %v360_v53 = vand.u32 8388607, %v353_v47  ;;  %v461_v54 = vshrl.u32 %v460_v50, 23  ;;  %v464_v55 = vand.u32 8388607, %v457_v49 }
  0xc8   : > { %v10490_v57 = vadd.s32 4294967169, %v565_v52 }
  0xc9   : > { %v10482_v56 = vadd.s32 4294967169, %v357_v51  ;;  %v10486_v58 = vadd.s32 4294967169, %v461_v54  ;;  %v361_v61 = vor.u32 8388608, %v360_v53  ;;  %v465_v62 = vor.u32 8388608, %v464_v55 }
  0xca   : > { %v571_v60 = vadd.s32 1, %v10490_v57 }
  0xcb   : > { %v363_v59 = vadd.s32 1, %v10482_v56  ;;  %v467_v63 = vadd.s32 1, %v10486_v58  ;;  %v12040_v4 = vshll.u32 %v361_v61, 8  ;;  %v12042_v5 = vshll.u32 %v465_v62, 8 }
  0xcc   : > { %vm572_vm1 = vcmp.gt.s32.totalorder %v571_v60, 0 }
  0xcd   : > { %vm364_vm0 = vcmp.gt.s32.totalorder %v363_v59, 0  ;;  %vm468_vm2 = vcmp.gt.s32.totalorder %v467_v63, 0  ;;  %v12045_v7 = vsel %vm572_vm1, %v571_v60, 0 }
  0xce   : > { %v365_v0 = vsel %vm364_vm0, %v363_v59, 0  ;;  %v469_v3 = vsel %vm468_vm2, %v467_v63, 0 }
  0xcf   : > { %v366_v1 = vshrl.u32 %v365_v0, 5  ;;  %v367_v2 = vand.u32 31, %v365_v0  ;;  %v12048_v12 = vshrl.u32 %v469_v3, 5  ;;  %v471_v13 = vand.u32 31, %v469_v3 }
  0xd1   : > { %v368_v8 = vsub.s32 32, %v367_v2  ;;  %v370_v10 = vshll.u32 %v14467_v9, %v367_v2  ;;  %v373_v15 = vshll.u32 %v14469_v14, %v367_v2  ;;  %v376_v18 = vshll.u32 %v14465_v17, %v367_v2 }
  0xd2   : > { %v379_v20 = vshll.u32 %v11816_v19, %v367_v2  ;;  %v382_v22 = vshll.u32 %v14476_v21, %v367_v2  ;;  %vm385_vm3 = vcmp.lt.s32.totalorder %v366_v1, 1  ;;  %vm386_vm4 = vcmp.lt.s32.totalorder %v366_v1, 2 }
  0xd3   : > { %v371_v23 = vshrl.u32 %v14469_v14, %v368_v8  ;;  %v374_v24 = vshrl.u32 %v14465_v17, %v368_v8  ;;  %v377_v25 = vshrl.u32 %v11816_v19, %v368_v8  ;;  %v369_v26 = vshrl.u32 %v14467_v9, %v368_v8 }
  0xd4   : > { %v380_v27 = vshrl.u32 %v14476_v21, %v368_v8  ;;  %v383_v29 = vshrl.u32 %v14475_v28, %v368_v8  ;;  %v472_v33 = vsub.s32 32, %v471_v13  ;;  %vm387_vm5 = vcmp.lt.s32.totalorder %v366_v1, 3 }
  0xd5   : > { %v372_v30 = vor.u32 %v371_v23, %v370_v10  ;;  %v375_v31 = vor.u32 %v374_v24, %v373_v15  ;;  %v378_v32 = vor.u32 %v377_v25, %v376_v18  ;;  %vm388_vm6 = vcmp.lt.s32.totalorder %v366_v1, 4 }
  0xd6   : > { %v381_v34 = vor.u32 %v380_v27, %v379_v20  ;;  %v384_v35 = vor.u32 %v383_v29, %v382_v22  ;;  %v474_v53 = vshll.u32 %v14467_v9, %v471_v13  ;;  %v475_v56 = vshrl.u32 %v14469_v14, %v472_v33 }
  0xd7   : > { %v389_v36 = vsel %vm385_vm3, %v369_v26, %v372_v30  ;;  %v390_v37 = vsel %vm388_vm6, %v378_v32, 2102212464  ;;  %v393_v46 = vsel %vm385_vm3, %v372_v30, %v375_v31  ;;  %v397_v48 = vsel %vm385_vm3, %v375_v31, %v378_v32 }
  0xd8   : > { %v391_v50 = vsel %vm387_vm5, %v375_v31, %v390_v37  ;;  %v394_v51 = vsel %vm388_vm6, %v381_v34, 920167782  ;;  %v398_v52 = vsel %vm388_vm6, %v384_v35, 1326507024  ;;  %v477_v57 = vshll.u32 %v14469_v14, %v471_v13 }
  0xd9   : > { %v395_v54 = vsel %vm387_vm5, %v378_v32, %v394_v51  ;;  %v399_v55 = vsel %vm387_vm5, %v381_v34, %v398_v52  ;;  %v392_v58 = vsel %vm386_vm4, %v389_v36, %v391_v50  ;;  %v478_v61 = vshrl.u32 %v14465_v17, %v472_v33 }
  0xda   : > { %v396_v59 = vsel %vm386_vm4, %v393_v46, %v395_v54  ;;  %v400_v60 = vsel %vm386_vm4, %v397_v48, %v399_v55  ;;  %v476_v3 = vor.u32 %v475_v56, %v474_v53  ;;  %v480_v10 = vshll.u32 %v14465_v17, %v471_v13 }
  0xdb   : > { %v12071_v62 = vmul.u32.u64.low %v12040_v4, %v400_v60  ;;  %v12072_v63 = vmul.u32.u64.high %v12040_v4, %v400_v60, %v12071_v62  ;;  %v12075_v0 = vmul.u32.u64.low %v12040_v4, %v396_v59  ;;  %v12076_v2 = vmul.u32.u64.high %v12040_v4, %v396_v59, %v12075_v0 }
  0xdc   : > { %v479_v8 = vor.u32 %v478_v61, %v477_v57  ;;  %v481_v15 = vshrl.u32 %v11816_v19, %v472_v33  ;;  %v483_v1 = vshll.u32 %v11816_v19, %v471_v13  ;;  %v484_v18 = vshrl.u32 %v14476_v21, %v472_v33 }
  0xdd   : > { %v487_v20 = vshrl.u32 %v14475_v28, %v472_v33  ;;  %v575_v22 = vand.u32 31, %v12045_v7  ;;  %v408_v23 = vmul.u32 %v12040_v4, %v392_v58  ;;  %v473_v24 = vshrl.u32 %v14467_v9, %v472_v33 }
  0xde   : > { %v482_v25 = vor.u32 %v481_v15, %v480_v10  ;;  %v486_v26 = vshll.u32 %v14476_v21, %v471_v13  ;;  %vm410_vm7 = vc.u32 %v12072_v63, %v12075_v0  ;;  %v411_v27 = vadd.s32 1, %v12076_v2 }
  0xdf   : > { %v485_v29 = vor.u32 %v484_v18, %v483_v1  ;;  %vm489_vm8 = vcmp.lt.s32.totalorder %v12048_v12, 1  ;;  %vm491_vm9 = vcmp.lt.s32.totalorder %v12048_v12, 3  ;;  %vm492_vm10 = vcmp.lt.s32.totalorder %v12048_v12, 4 }
  0xe0   : > { %v488_v30 = vor.u32 %v487_v20, %v486_v26  ;;  %v497_v31 = vsel %vm489_vm8, %v476_v3, %v479_v8  ;;  %v412_v4 = vsel %vm410_vm7, %v411_v27, %v12076_v2  ;;  %v494_v32 = vsel %vm492_vm10, %v482_v25, 2102212464 }
  0xe1   : > { %v498_v33 = vsel %vm492_vm10, %v485_v29, 920167782  ;;  %v501_v34 = vsel %vm489_vm8, %v479_v8, %v482_v25  ;;  %v413_v13 = vadd.s32 %v412_v4, %v408_v23  ;;  %vm490_vm11 = vcmp.lt.s32.totalorder %v12048_v12, 2 }
  0xe2   : > { %v499_v35 = vsel %vm491_vm9, %v482_v25, %v498_v33  ;;  %v502_v36 = vsel %vm492_vm10, %v488_v30, 1326507024  ;;  %v493_v37 = vsel %vm489_vm8, %v473_v24, %v476_v3  ;;  %v495_v46 = vsel %vm491_vm9, %v479_v8, %v494_v32 }
  0xe3   : > { %v500_v48 = vsel %vm490_vm11, %v497_v31, %v499_v35  ;;  %v503_v50 = vsel %vm491_vm9, %v485_v29, %v502_v36  ;;  %v414_v51 = vadd.s32 536870912, %v413_v13  ;;  %v496_v12 = vsel %vm490_vm11, %v493_v37, %v495_v46 }
  0xe4   : > { %v504_v52 = vsel %vm490_vm11, %v501_v34, %v503_v50  ;;  %v12097_v53 = vmul.u32.u64.low %v12042_v5, %v500_v48  ;;  %v12098_v54 = vmul.u32.u64.high %v12042_v5, %v500_v48, %v12097_v53  ;;  %v576_v58 = vsub.s32 32, %v575_v22 }
  0xe5   : > { %v12102_v55 = vmul.u32.u64.low %v12042_v5, %v504_v52  ;;  %v12103_v56 = vmul.u32.u64.high %v12042_v5, %v504_v52, %v12102_v55  ;;  %v12105_v57 = vshrl.u32 %v414_v51, 30  ;;  %v568_v61 = vand.u32 8388607, %v561_v6 }
  0xe6   : > { %v515_v60 = vadd.s32 1, %v12098_v54  ;;  %v668_v62 = vand.u32 2139095040, %v12017_v39  ;;  %v512_v2 = vmul.u32 %v12042_v5, %v496_v12  ;;  %v588_v15 = vshrl.u32 %v14476_v21, %v576_v58 }
  0xe7   : > { %v416_v59 = vshll.u32 %v12105_v57, 30  ;;  %vm514_vm12 = vc.u32 %v12103_v56, %v12097_v53  ;;  %v569_v18 = vor.u32 8388608, %v568_v61  ;;  %v579_v20 = vshrl.u32 %v14469_v14, %v576_v58 }
  0xe8   : > { %v516_v8 = vsel %vm514_vm12, %v515_v60, %v12098_v54  ;;  %v669_v23 = vshrl.u32 %v668_v62, 23  ;;  %v582_v25 = vshrl.u32 %v14465_v17, %v576_v58  ;;  %v585_v5 = vshrl.u32 %v11816_v19, %v576_v58 }
  0xe9   : > { %v12115_v3 = vsub.s32 %v413_v13, %v416_v59  ;;  %v517_v10 = vadd.s32 %v516_v8, %v512_v2  ;;  %v587_v26 = vshll.u32 %v11816_v19, %v575_v22  ;;  %v574_v29 = vshrl.u32 %v12045_v7, 5 }
  0xea   : > { %v578_v30 = vshll.u32 %v14467_v9, %v575_v22  ;;  %v591_v31 = vshrl.u32 %v14475_v28, %v576_v58  ;;  %v581_v32 = vshll.u32 %v14469_v14, %v575_v22  ;;  %v584_v33 = vshll.u32 %v14465_v17, %v575_v22 }
  0xeb   : > { %v419_v1 = vsub.s32 0, %v12115_v3  ;;  %v518_v24 = vadd.s32 536870912, %v517_v10  ;;  %v589_v34 = vor.u32 %v588_v15, %v587_v26  ;;  %v590_v35 = vshll.u32 %v14476_v21, %v575_v22 }
  0xec   : > { %v12131_v36 = vshll.u32 %v569_v18, 8  ;;  %v665_v37 = vand.u32 2147483647, %v12017_v39  ;;  %v580_v46 = vor.u32 %v579_v20, %v578_v30  ;;  %v583_v48 = vor.u32 %v582_v25, %v581_v32 }
  0xed   : > { %v10483_v27 = vmin.u32 %v419_v1, %v12115_v3  ;;  %v519_v4 = vshrl.u32 %v518_v24, 30  ;;  %v586_v50 = vor.u32 %v585_v5, %v584_v33  ;;  %v592_v52 = vor.u32 %v591_v31, %v590_v35 }
  0xee   : > { %vm596_vm15 = vcmp.lt.s32.totalorder %v574_v29, 4  ;;  %v10494_v54 = vadd.s32 4294967169, %v669_v23  ;;  %v409_v55 = vadd.s32 %v12075_v0, %v12072_v63  ;;  %v577_v12 = vshrl.u32 %v14467_v9, %v576_v58 }
  0xef   : > { %v421_v13 = vclz %v10483_v27  ;;  %v520_v7 = vshll.u32 %v519_v4, 30  ;;  %v602_v59 = vsel %vm596_vm15, %v589_v34, 920167782  ;;  %v439_v60 = vsub.s32 4, %v12105_v57 }
  0xf0   : > { %vm593_vm1 = vcmp.lt.s32.totalorder %v574_v29, 1  ;;  %vm595_vm2 = vcmp.lt.s32.totalorder %v574_v29, 3  ;;  %vm12145_vm3 = vcmp.le.f32.partialorder %v353_v47, 0.7853982  ;;  %v598_v0 = vsel %vm596_vm15, %v586_v50, 2102212464 }
  0xf1   : > { %v10484_v51 = vadd.s32 4294967294, %v421_v13  ;;  %v12138_v22 = vsub.s32 %v517_v10, %v520_v7  ;;  %v601_v58 = vsel %vm593_vm1, %v580_v46, %v583_v48  ;;  %vm12154_vm4 = vcmp.le.f32.partialorder %v457_v49, 0.7853982 }
  0xf2   : > { %v603_v47 = vsel %vm595_vm2, %v586_v50, %v602_v59  ;;  %v606_v15 = vsel %vm596_vm15, %v592_v52, 1326507024  ;;  %v543_v18 = vsub.s32 4, %v519_v4  ;;  %vm594_vm5 = vcmp.lt.s32.totalorder %v574_v29, 2 }
  0xf3   : > { %vm10485_vm0 = vcmp.lt.s32.totalorder %v10484_v51, 0  ;;  %v523_v63 = vsub.s32 0, %v12138_v22  ;;  %v605_v20 = vsel %vm593_vm1, %v583_v48, %v586_v50  ;;  %v607_v5 = vsel %vm595_vm2, %v589_v34, %v606_v15 }
  0xf4   : > { %v424_v62 = vsel %vm10485_vm0, 0, %v10484_v51  ;;  %v597_v26 = vsel %vm593_vm1, %v577_v12, %v580_v46  ;;  %v599_v27 = vsel %vm595_vm2, %v583_v48, %v598_v0  ;;  %v604_v30 = vsel %vm594_vm5, %v601_v58, %v603_v47 }
  0xf5   : > { %v425_v2 = vsub.s32 32, %v424_v62  ;;  %v429_v8 = vsub.s32 4294967266, %v424_v62  ;;  %v10487_v1 = vmin.u32 %v523_v63, %v12138_v22  ;;  %v426_v23 = vshll.u32 %v12115_v3, %v424_v62 }
  0xf6   : > { %v440_v33 = vsel %vm355_vm13, %v439_v60, %v12105_v57  ;;  %v608_v13 = vsel %vm594_vm5, %v605_v20, %v607_v5  ;;  %v544_v35 = vsel %vm459_vm14, %v543_v18, %v519_v4  ;;  %v600_v48 = vsel %vm594_vm5, %v597_v26, %v599_v27 }
  0xf7   : > { %v427_v24 = vshrl.u32 %v409_v55, %v425_v2  ;;  %v430_v25 = vadd.s32 127, %v429_v8  ;;  %v525_v49 = vclz %v10487_v1  ;;  %v513_v57 = vadd.s32 %v12097_v53, %v12103_v56 }
  0xf8   : > { %v12174_v34 = vmul.u32.u64.low %v12131_v36, %v608_v13  ;;  %v12175_v7 = vmul.u32.u64.high %v12131_v36, %v608_v13, %v12174_v34  ;;  %v12179_v50 = vmul.u32.u64.low %v12131_v36, %v604_v30  ;;  %v12180_v51 = vmul.u32.u64.high %v12131_v36, %v604_v30, %v12179_v50 }
  0xf9   : > { %v428_v31 = vor.u32 %v427_v24, %v426_v23  ;;  %v431_v32 = vshll.u32 %v430_v25, 23  ;;  %v10488_v3 = vadd.s32 4294967294, %v525_v49  ;;  %v672_v52 = vand.u32 8388607, %v665_v37 }
  0xfa   : > { %v675_v55 = vadd.s32 1, %v10494_v54  ;;  %v442_v59 = vsel %vm12145_vm3, 0, %v440_v33  ;;  %v546_v63 = vsel %vm12154_vm4, 0, %v544_v35  ;;  %v616_v0 = vmul.u32 %v12131_v36, %v600_v48 }
  0xfb   : > { %v432_v46 = vor.u32 4788187, %v431_v32  ;;  %vm10489_vm6 = vcmp.lt.s32.totalorder %v10488_v3, 0  ;;  %v435_v12 = vcvt.s32.f32 %v428_v31  ;;  %vm618_vm7 = vc.u32 %v12175_v7, %v12179_v50 }
  0xfc   : > { %v528_v60 = vsel %vm10489_vm6, 0, %v10488_v3  ;;  %v619_v53 = vadd.s32 1, %v12180_v51  ;;  %vm676_vm8 = vcmp.gt.s32.totalorder %v675_v55, 0  ;;  %v446_v15 = vadd.s32 3, %v442_v59 }
  0xfd   : > { %v433_v4 = vand.u32 2147483647, %v432_v46  ;;  %v529_v29 = vsub.s32 32, %v528_v60  ;;  %v533_v62 = vsub.s32 4294967266, %v528_v60  ;;  %v530_v56 = vshll.u32 %v12138_v22, %v528_v60 }
  0xfe   : > { %v677_v8 = vsel %vm676_vm8, %v675_v55, 0  ;;  %v620_v1 = vsel %vm618_vm7, %v619_v53, %v12180_v51  ;;  %v550_v25 = vadd.s32 3, %v546_v63  ;;  %v673_v5 = vor.u32 8388608, %v672_v52 }
  0xff   : > { %v436_v58 = vmul.f32 %v435_v12, %v433_v4  ;;  %v531_v54 = vshrl.u32 %v513_v57, %v529_v29  ;;  %v534_v2 = vadd.s32 127, %v533_v62  ;;  %v679_v18 = vand.u32 31, %v677_v8 }
 0x100   : > { %v621_v24 = vadd.s32 %v620_v1, %v616_v0  ;;  %v12200_v30 = vand.u32 3, %v446_v15  ;;  %v12202_v31 = vand.u32 3, %v442_v59  ;;  %v12204_v32 = vand.u32 3, %v546_v63 }
 0x101   : > { %v437_v47 = vxor.u32 2147483648, %v436_v58  ;;  %v532_v20 = vor.u32 %v531_v54, %v530_v56  ;;  %v535_v23 = vshll.u32 %v534_v2, 23  ;;  %v680_v49 = vsub.s32 32, %v679_v18 }
 0x102   : > { %v622_v27 = vadd.s32 536870912, %v621_v24  ;;  %v12208_v35 = vand.u32 3, %v550_v25  ;;  %v12211_v34 = vadd.s32 %v12179_v50, %v12175_v7  ;;  %v12214_v46 = vshll.u32 %v673_v5, 8 }
 0x103   : > { %v438_v36 = vsel %vm355_vm13, %v437_v47, %v436_v58  ;;  %v536_v26 = vor.u32 4788187, %v535_v23  ;;  %v539_v13 = vcvt.s32.f32 %v532_v20  ;;  %v689_v61 = vshrl.u32 %v11816_v19, %v680_v49 }
 0x104   : > { %v441_v22 = vsel %vm12145_vm3, %v12027_v44, %v438_v36  ;;  %v12206_v3 = vshrl.u32 %v622_v27, 30  ;;  %v683_v57 = vshrl.u32 %v14469_v14, %v680_v49  ;;  %v688_v52 = vshll.u32 %v14465_v17, %v679_v18 }
 0x105   : > { %11667 = vcosq.f32 %v441_v22  ;;  %v537_v33 = vand.u32 2147483647, %v536_v26  ;;  %vm452_vm9 = vcmp.eq.s32.totalorder %v12200_v30, 2  ;;  %vm1283_vm10 = vcmp.eq.s32.totalorder %v12202_v31, 2 }
 0x106   : > { %11669 = vsinq.f32 %v441_v22  ;;  %v624_v51 = vshll.u32 %v12206_v3, 30  ;;  %v12221_v55 = vshrl.u32 %v677_v8, 5  ;;  %v682_v7 = vshll.u32 %v14467_v9, %v679_v18 }
 0x107   : > { %v540_v48 = vmul.f32 %v539_v13, %v537_v33  ;;  %v686_v50 = vshrl.u32 %v14465_v17, %v680_v49  ;;  %v692_v4 = vshrl.u32 %v14476_v21, %v680_v49  ;;  %vm449_vm11 = vcmp.eq.s32.totalorder %v12200_v30, 0 }
 0x108   : > { %vm1280_vm12 = vcmp.eq.s32.totalorder %v12202_v31, 0  ;;  %v12228_v59 = vsub.s32 %v621_v24, %v624_v51  ;;  %v690_v60 = vor.u32 %v689_v61, %v688_v52  ;;  %v691_v29 = vshll.u32 %v11816_v19, %v679_v18 }
 0x109   : > { %v541_v12 = vxor.u32 2147483648, %v540_v48  ;;  %vm448_vm13 = vcmp.lt.s32.totalorder %v12200_v30, 2  ;;  %vm1279_vm15 = vcmp.lt.s32.totalorder %v12202_v31, 2  ;;  %v681_v62 = vshrl.u32 %v14467_v9, %v680_v49  ;;  %v12296_v30 = vpop.permute.xlu1 %2013 }
 0x10a   : > { %v685_v63 = vshll.u32 %v14469_v14, %v679_v18  ;;  %v695_v0 = vshrl.u32 %v14475_v28, %v680_v49  ;;  %v772_v58 = vand.u32 2139095040, %v12019_v40  ;;  %vm445_vm0 = vweird.f32 %v12027_v44 }
 0x10b   : > { %v542_v53 = vsel %vm459_vm14, %v541_v12, %v540_v48  ;;  %v627_v56 = vsub.s32 0, %v12228_v59  ;;  %v684_v54 = vor.u32 %v683_v57, %v682_v7  ;;  %v693_v2 = vor.u32 %v692_v4, %v691_v29 }
 0x10c   : > { %vm2046_vm1 = vcmask 1042432   ;;  %v545_v8 = vsel %vm12154_vm4, %v12029_v45, %v542_v53  ;;  %v687_v47 = vor.u32 %v686_v50, %v685_v63  ;;  %v694_v15 = vshll.u32 %v14476_v21, %v679_v18 }
 0x10d   : > { %vm700_vm2 = vcmp.lt.s32.totalorder %v12221_v55, 4  ;;  %11671 = vcosq.f32 %v545_v8  ;;  %vm563_vm3 = vcmp.lt.s32.totalorder %v12015_v38, 0  ;;  %v10491_v1 = vmin.u32 %v627_v56, %v12228_v59 }
 0x10e   : > { %v647_v20 = vsub.s32 4, %v12206_v3  ;;  %v702_v23 = vsel %vm700_vm2, %v690_v60, 2102212464  ;;  %11673 = vsinq.f32 %v545_v8  ;;  %v696_v10 = vor.u32 %v695_v0, %v694_v15 }
 0x10f   : > { %v11668_v24 = vpop.eup %11667  ;;  %vm697_vm4 = vcmp.lt.s32.totalorder %v12221_v55, 1  ;;  %vm698_vm5 = vcmp.lt.s32.totalorder %v12221_v55, 2  ;;  %v629_v25 = vclz %v10491_v1  ;;  %vm699_vm6 = vcmp.lt.s32.totalorder %v12221_v55, 3 }
 0x110   : > { %v11670_v18 = vpop.eup %11669  ;;  %v453_v36 = vxor.u32 2147483648, %v11668_v24  ;;  %v706_v5 = vsel %vm700_vm2, %v693_v2, 920167782  ;;  %v701_v22 = vsel %vm697_vm4, %v681_v62, %v684_v54  ;;  %v703_v26 = vsel %vm699_vm6, %v687_v47, %v702_v23 }
 0x111   : > { %v450_v49 = vxor.u32 2147483648, %v11670_v18  ;;  %v705_v27 = vsel %vm697_vm4, %v684_v54, %v687_v47  ;;  %vm1386_vm7 = vcmp.eq.s32.totalorder %v12204_v32, 2  ;;  %v10492_v61 = vadd.s32 4294967294, %v629_v25 }
 0x112   : > { %v454_v33 = vsel %vm452_vm9, %v453_v36, %v11670_v18  ;;  %v1285_v13 = vsel %vm1283_vm10, %v453_v36, %v11670_v18  ;;  %v709_v48 = vsel %vm697_vm4, %v687_v47, %v690_v60  ;;  %vm553_vm8 = vcmp.eq.s32.totalorder %v12208_v35, 0 }
 0x113   : > { %v451_v51 = vsel %vm449_vm11, %v11668_v24, %v450_v49  ;;  %v1282_v57 = vsel %vm1280_vm12, %v11668_v24, %v450_v49  ;;  %vm1383_vm14 = vcmp.eq.s32.totalorder %v12204_v32, 0  ;;  %vm12271_vm9 = vcmp.le.f32.partialorder %v561_v6, 0.7853982 }
 0x114   : > { %v707_v7 = vsel %vm699_vm6, %v690_v60, %v706_v5  ;;  %v710_v50 = vsel %vm700_vm2, %v696_v10, 1326507024  ;;  %v455_v4 = vsel %vm448_vm13, %v451_v51, %v454_v33  ;;  %v1286_v12 = vsel %vm1279_vm15, %v1282_v57, %v1285_v13 }
 0x115   : > { %vm552_vm10 = vcmp.lt.s32.totalorder %v12208_v35, 2  ;;  %vm1382_vm11 = vcmp.lt.s32.totalorder %v12204_v32, 2  ;;  %vm10493_vm12 = vcmp.lt.s32.totalorder %v10492_v61, 0  ;;  %v711_v6 = vsel %vm699_vm6, %v693_v2, %v710_v50 }
 0x116   : > { %v12289_v60 = vsel %vm445_vm0, nan, %v455_v4  ;;  %v12293_v29 = vsel %vm445_vm0, nan, %v1286_v12  ;;  %vm549_vm13 = vweird.f32 %v12029_v45  ;;  %v632_v31 = vsel %vm10493_vm12, 0, %v10492_v61 }
 0x117   : > { %v712_v62 = vsel %vm698_vm5, %v709_v48, %v711_v6  ;;  %v2029_v63 = vcombine.high %v12289_v60, %v12289_v60  ;;  %v12303_v0 = vmul.f32 2.0, %v12289_v60  ;;  %v633_v53 = vsub.s32 32, %v632_v31  ;;  %v11672_v15 = vpop.eup %11671 }
 0x118   : > { %v708_v56 = vsel %vm698_vm5, %v705_v27, %v707_v7  ;;  %v637_v54 = vsub.s32 4294967266, %v632_v31  ;;  %v648_v2 = vsel %vm563_vm3, %v647_v20, %v12206_v3  ;;  %v634_v23 = vshll.u32 %v12228_v59, %v632_v31  ;;  %v11674_v18 = vpop.eup %11673  ;;  %v12337_v27 = vpop.permute.xlu1 %2015 }
 0x119   : > { %v12311_v8 = vmul.u32.u64.low %v12214_v46, %v712_v62  ;;  %v12312_v47 = vmul.u32.u64.high %v12214_v46, %v712_v62, %v12311_v8  ;;  %10546 = vmatprep.subr.msk.mxu0 %vm2046_vm1, %v2029_v63  ;;  %v12317_v1 = vmul.f32 %v12303_v0, %v12293_v29  ;;  %v635_v24 = vshrl.u32 %v12211_v34, %v633_v53  ;;  %v12374_v53 = vpop.permute.xlu0 %2017 }
 0x11a   : > { %v704_v10 = vsel %vm698_vm5, %v701_v22, %v703_v26  ;;  %v557_v3 = vxor.u32 2147483648, %v11672_v15  ;;  %10547 = vmatpush1.msk.msra.mxu0 %vm2046_vm1, %v12289_v60  ;;  %v638_v20 = vadd.s32 127, %v637_v54  ;;  %v554_v5 = vxor.u32 2147483648, %v11674_v18 }
 0x11b   : > { %v12326_v36 = vmul.u32.u64.low %v12214_v46, %v708_v56  ;;  %v12327_v25 = vmul.u32.u64.high %v12214_v46, %v708_v56, %v12326_v36  ;;  %vm556_vm15 = vcmp.eq.s32.totalorder %v12208_v35, 2  ;;  %vm14491_vm0 = vcmask 23552  }
 0x11c   : > { %10548 = vmatmul.mubr.msk.f32.vlgmr.msra.gmra.mrb[0].mxu0 %vm14491_vm0, %v12296_v30  ;;  %v769_v34 = vand.u32 2147483647, %v12019_v40  ;;  %v773_v55 = vshrl.u32 %v772_v58, 23  ;;  %v558_v59 = vsel %vm556_vm15, %v557_v3, %v11674_v18  ;;  %v1388_v49 = vsel %vm1386_vm7, %v557_v3, %v11674_v18  ;;  %vm14493_vm5 = vmmov %vm14491_vm0 }
 0x11d   : > { %v636_v22 = vor.u32 %v635_v24, %v634_v23  ;;  %v639_v26 = vshll.u32 %v638_v20, 23  ;;  %2149 = vmatprep.mubr.f32.mxu0 %v14473_v11  ;;  %v555_v33 = vsel %vm553_vm8, %v11672_v15, %v554_v5  ;;  %v1385_v13 = vsel %vm1383_vm14, %v11672_v15, %v554_v5  ;;  %vm14492_vm14 = vmmov %vm14491_vm0  ;;  %v12388_v24 = vpop.permute.xlu1 %2019 }
 0x11e   : > { %v12346_v61 = vsel %vm12271_vm9, 0, %v648_v2  ;;  %v720_v58 = vmul.u32 %v12214_v46, %v704_v10  ;;  %v559_v48 = vsel %vm552_vm10, %v555_v33, %v558_v59  ;;  %v1389_v51 = vsel %vm1382_vm11, %v1385_v13, %v1388_v49  ;;  %vm14494_vm6 = vmmov %vm14491_vm0 }
 0x11f   : > { %v640_v57 = vor.u32 4788187, %v639_v26  ;;  %vm722_vm2 = vc.u32 %v12312_v47, %v12326_v36  ;;  %v12356_v7 = vsel %vm549_vm13, nan, %v559_v48  ;;  %v12360_v50 = vsel %vm549_vm13, nan, %v1389_v51  ;;  %vm14497_vm10 = vmmov %vm14491_vm0 }
 0x120   : > { %v723_v4 = vadd.s32 1, %v12327_v25  ;;  %v10498_v46 = vadd.s32 4294967169, %v773_v55  ;;  %10549 = vmatmul.mubr.msk.f32.gmra.mrb[2].mxu0 %vm14492_vm14, %v12337_v27  ;;  %v2030_v32 = vcombine.high %v12356_v7, %v12356_v7  ;;  %v12368_v35 = vmul.f32 2.0, %v12356_v7  ;;  %vm14499_vm11 = vmmov %vm14491_vm0 }
 0x121   : > { %v641_v12 = vand.u32 2147483647, %v640_v57  ;;  %v643_v6 = vcvt.s32.f32 %v636_v22  ;;  %2155 = vmatprep.mubr.f32.mxu0 %v14473_v11  ;;  %v776_v62 = vand.u32 8388607, %v769_v34  ;;  %v654_v8 = vadd.s32 3, %v12346_v61 }
 0x122   : > { %v724_v31 = vsel %vm722_vm2, %v723_v4, %v12327_v25  ;;  %v779_v63 = vadd.s32 1, %v10498_v46  ;;  %10552 = vmatprep.subr.msk.mxu1 %vm2046_vm1, %v2030_v32  ;;  %v12379_v56 = vmul.f32 %v12368_v35, %v12360_v50  ;;  %vm667_vm7 = vcmp.lt.s32.totalorder %v12017_v39, 0 }
 0x123   : > { %v644_v54 = vmul.f32 %v643_v6, %v641_v12  ;;  %v725_v2 = vadd.s32 %v724_v31, %v720_v58  ;;  %10553 = vmatpush1.msk.msra.mxu1 %vm2046_vm1, %v12356_v7  ;;  %v777_v10 = vor.u32 8388608, %v776_v62  ;;  %v12398_v5 = vand.u32 3, %v654_v8 }
 0x124   : > { %vm780_vm4 = vcmp.gt.s32.totalorder %v779_v63, 0  ;;  %10550 = vmatmul.mubr.msk.f32.gmra.mrb[4].mxu0 %vm14493_vm5, %v12374_v53  ;;  %10554 = vmatmul.mubr.msk.f32.vlgmr.msra.gmra.mrb[0].mxu1 %vm14494_vm6, %v12296_v30  ;;  %vm12402_vm8 = vcmp.le.f32.partialorder %v665_v37, 0.7853982  ;;  %v12409_v49 = vadd.s32 %v12326_v36, %v12312_v47  ;;  %v14461_v52 = vand.u32 2147483647, %v12021_v41 }
 0x125   : > { %v645_v15 = vxor.u32 2147483648, %v644_v54  ;;  %v726_v23 = vadd.s32 536870912, %v725_v2  ;;  %2161 = vmatprep.mubr.f32.mxu0 %v14473_v11  ;;  %v781_v18 = vsel %vm780_vm4, %v779_v63, 0  ;;  %2238 = vmatprep.mubr.f32.mxu1 %v14473_v11  ;;  %v12415_v33 = vshll.u32 %v777_v10, 8 }
 0x126   : > { %v783_v59 = vand.u32 31, %v781_v18  ;;  %v782_v58 = vshrl.u32 %v781_v18, 5  ;;  %v876_v36 = vand.u32 2139095040, %v12021_v41  ;;  %vm657_vm12 = vcmp.eq.s32.totalorder %v12398_v5, 0 }
 0x127   : > { %v646_v3 = vsel %vm563_vm3, %v645_v15, %v644_v54  ;;  %v727_v20 = vshrl.u32 %v726_v23, 30  ;;  %vm14498_vm3 = vmmov %vm14491_vm0  ;;  %vm656_vm13 = vcmp.lt.s32.totalorder %v12398_v5, 2  ;;  %vm653_vm15 = vweird.f32 %v12015_v38 }
 0x128   : > { %v649_v25 = vsel %vm12271_vm9, %v12015_v38, %v646_v3  ;;  %10551 = vmatmul.mubr.msk.f32.gmra.mrb[6].mxu0 %vm14497_vm10, %v12388_v24  ;;  %10555 = vmatmul.mubr.msk.f32.gmra.mrb[2].mxu1 %vm14498_vm3, %v12337_v27  ;;  %v784_v26 = vsub.s32 32, %v783_v59  ;;  %v786_v47 = vshll.u32 %v14467_v9, %v783_v59  ;;  %v789_v51 = vshll.u32 %v14469_v14, %v783_v59  ;;  %vm14500_vm14 = vmmov %vm14498_vm3 }
 0x129   : > { %11675 = vcosq.f32 %v649_v25  ;;  %v728_v22 = vshll.u32 %v727_v20, 30  ;;  %2321 = vmatprep.mubr.f32.mxu0 %v14473_v11  ;;  %v751_v37 = vsub.s32 4, %v727_v20  ;;  %2244 = vmatprep.mubr.f32.mxu1 %v14473_v11  ;;  %v792_v4 = vshll.u32 %v14465_v17, %v783_v59 }
 0x12a   : > { %11677 = vsinq.f32 %v649_v25  ;;  %v787_v48 = vshrl.u32 %v14469_v14, %v784_v26  ;;  %v790_v57 = vshrl.u32 %v14465_v17, %v784_v26  ;;  %vm660_vm9 = vcmp.eq.s32.totalorder %v12398_v5, 2 }
 0x12b   : > { %v12418_v13 = vsub.s32 %v725_v2, %v728_v22  ;;  %v793_v32 = vshrl.u32 %v11816_v19, %v784_v26  ;;  %v795_v12 = vshll.u32 %v11816_v19, %v783_v59  ;;  %v796_v6 = vshrl.u32 %v14476_v21, %v784_v26 }
 0x12c   : > { %10556 = vmatmul.mubr.msk.f32.gmra.mrb[4].mxu1 %vm14499_vm11, %v12374_v53  ;;  %v752_v31 = vsel %vm667_vm7, %v751_v37, %v727_v20  ;;  %v788_v62 = vor.u32 %v787_v48, %v786_v47  ;;  %v798_v63 = vshll.u32 %v14476_v21, %v783_v59  ;;  %v799_v54 = vshrl.u32 %v14475_v28, %v784_v26 }
 0x12d   : > { %v731_v46 = vsub.s32 0, %v12418_v13  ;;  %2250 = vmatprep.mubr.f32.mxu1 %v14473_v11  ;;  %v791_v8 = vor.u32 %v790_v57, %v789_v51  ;;  %v794_v15 = vor.u32 %v793_v32, %v792_v4  ;;  %v797_v23 = vor.u32 %v796_v6, %v795_v12 }
 0x12e   : > { %v785_v10 = vshrl.u32 %v14467_v9, %v784_v26  ;;  %v800_v18 = vor.u32 %v799_v54, %v798_v63  ;;  %v877_v3 = vshrl.u32 %v876_v36, 23  ;;  %v12445_v20 = vand.u32 8388607, %v14461_v52 }
 0x12f   : > { %v10495_v2 = vmin.u32 %v731_v46, %v12418_v13  ;;  %v12449_v59 = vsel %vm12402_vm8, 0, %v752_v31  ;;  %vm801_vm0 = vcmp.lt.s32.totalorder %v782_v58, 1  ;;  %vm804_vm2 = vcmp.lt.s32.totalorder %v782_v58, 4 }
 0x130   : > { %10557 = vmatmul.mubr.msk.f32.gmra.mrb[6].mxu1 %vm14500_vm14, %v12388_v24  ;;  %vm803_vm4 = vcmp.lt.s32.totalorder %v782_v58, 3  ;;  %v805_v22 = vsel %vm801_vm0, %v785_v10, %v788_v62  ;;  %v806_v37 = vsel %vm804_vm2, %v794_v15, 2102212464  ;;  %v810_v26 = vsel %vm804_vm2, %v797_v23, 920167782 }
 0x131   : > { %v733_v25 = vclz %v10495_v2  ;;  %2410 = vmatprep.mubr.f32.mxu1 %v14473_v11  ;;  %vm802_vm5 = vcmp.lt.s32.totalorder %v782_v58, 2  ;;  %v807_v48 = vsel %vm803_vm4, %v791_v8, %v806_v37  ;;  %v813_v51 = vsel %vm801_vm0, %v791_v8, %v794_v15 }
 0x132   : > { %v809_v46 = vsel %vm801_vm0, %v788_v62, %v791_v8  ;;  %v811_v32 = vsel %vm803_vm4, %v794_v15, %v810_v26  ;;  %v814_v12 = vsel %vm804_vm2, %v800_v18, 1326507024  ;;  %v808_v31 = vsel %vm802_vm5, %v805_v22, %v807_v48 }
 0x133   : > { %v12456_v47 = vpop.eup %11675  ;;  %v10496_v36 = vadd.s32 4294967294, %v733_v25  ;;  %v815_v63 = vsel %vm803_vm4, %v797_v23, %v814_v12  ;;  %v10502_v8 = vadd.s32 4294967169, %v877_v3  ;;  %v812_v23 = vsel %vm802_vm5, %v809_v46, %v811_v32 }
 0x134   : > { %v12459_v57 = vpop.eup %11677  ;;  %v14459_v4 = vxor.u32 2147483648, %v12456_v47  ;;  %v816_v62 = vsel %vm802_vm5, %v813_v51, %v815_v63  ;;  %v12494_v5 = vmul.u32.u64.low %v12415_v33, %v812_v23  ;;  %v12495_v46 = vmul.u32.u64.high %v12415_v33, %v812_v23, %v12494_v5 }
 0x135   : > { %v14460_v6 = vxor.u32 2147483648, %v12459_v57  ;;  %vm10497_vm6 = vcmp.lt.s32.totalorder %v10496_v36, 0  ;;  %v12482_v22 = vmul.u32.u64.low %v12415_v33, %v816_v62  ;;  %v12483_v37 = vmul.u32.u64.high %v12415_v33, %v816_v62, %v12482_v22 }
 0x136   : > { %v662_v54 = vsel %vm660_vm9, %v14459_v4, %v12459_v57  ;;  %v736_v2 = vsel %vm10497_vm6, 0, %v10496_v36  ;;  %v883_v26 = vadd.s32 1, %v10502_v8  ;;  %v824_v62 = vmul.u32 %v12415_v33, %v808_v31  ;;  %vm14501_vm9 = vmmov %vm14499_vm11 }
 0x137   : > { %v659_v15 = vsel %vm657_vm12, %v12456_v47, %v14460_v6  ;;  %v737_v10 = vsub.s32 32, %v736_v2  ;;  %v741_v18 = vsub.s32 4294967266, %v736_v2  ;;  %v738_v36 = vshll.u32 %v12418_v13, %v736_v2  ;;  %vm14502_vm11 = vmmov %vm14501_vm9 }
 0x138   : > { %v663_v25 = vsel %vm656_vm13, %v659_v15, %v662_v54  ;;  %vm884_vm10 = vcmp.gt.s32.totalorder %v883_v26, 0  ;;  %v881_v54 = vor.u32 8388608, %v12445_v20  ;;  %vm826_vm3 = vc.u32 %v12483_v37, %v12494_v5  ;;  %vm14503_vm14 = vmmov %vm14501_vm9 }
 0x139   : > { %v12487_v3 = vsel %vm653_vm15, nan, %v663_v25  ;;  %v739_v48 = vshrl.u32 %v12409_v49, %v737_v10  ;;  %v742_v51 = vadd.s32 127, %v741_v18  ;;  %v885_v63 = vsel %vm884_vm10, %v883_v26, 0 }
 0x13a   : > { %v2031_v58 = vcombine.high %v12487_v3, %v12487_v3  ;;  %v887_v13 = vand.u32 31, %v885_v63  ;;  %v758_v49 = vadd.s32 3, %v12449_v59  ;;  %v827_v15 = vadd.s32 1, %v12495_v46 }
 0x13b   : > { %v740_v32 = vor.u32 %v739_v48, %v738_v36  ;;  %v743_v12 = vshll.u32 %v742_v51, 23  ;;  %v12507_v10 = vshrl.u32 %v885_v63, 5  ;;  %vm757_vm4 = vweird.f32 %v12017_v39 }
 0x13c   : > { %10558 = vmatprep.subr.msk.mxu0 %vm2046_vm1, %v2031_v58  ;;  %v888_v18 = vsub.s32 32, %v887_v13  ;;  %v890_v23 = vshll.u32 %v14467_v9, %v887_v13  ;;  %v893_v25 = vshll.u32 %v14469_v14, %v887_v13  ;;  %v896_v22 = vshll.u32 %v14465_v17, %v887_v13 }
 0x13d   : > { %v744_v2 = vor.u32 4788187, %v743_v12  ;;  %10559 = vmatpush1.msk.msra.mxu0 %vm2046_vm1, %v12487_v3  ;;  %v747_v8 = vcvt.s32.f32 %v740_v32  ;;  %v828_v33 = vsel %vm826_vm3, %v827_v15, %v12495_v46  ;;  %v899_v36 = vshll.u32 %v11816_v19, %v887_v13 }
 0x13e   : > { %10560 = vmatmul.mubr.msk.f32.vlgmr.msra.gmra.mrb[8].mxu0 %vm14501_vm9, %v12296_v30  ;;  %v891_v31 = vshrl.u32 %v14469_v14, %v888_v18  ;;  %v894_v26 = vshrl.u32 %v14465_v17, %v888_v18  ;;  %v829_v51 = vadd.s32 %v828_v33, %v824_v62  ;;  %v897_v58 = vshrl.u32 %v11816_v19, %v888_v18 }
 0x13f   : > { %v745_v20 = vand.u32 2147483647, %v744_v2  ;;  %2327 = vmatprep.mubr.f32.mxu0 %v14473_v11  ;;  %v900_v32 = vshrl.u32 %v14476_v21, %v888_v18  ;;  %v902_v2 = vshll.u32 %v14476_v21, %v887_v13  ;;  %v903_v4 = vshrl.u32 %v14475_v28, %v888_v18 }
 0x140   : > { %v892_v12 = vor.u32 %v891_v31, %v890_v23  ;;  %v895_v63 = vor.u32 %v894_v26, %v893_v25  ;;  %v830_v15 = vadd.s32 536870912, %v829_v51  ;;  %v898_v6 = vor.u32 %v897_v58, %v896_v22 }
 0x141   : > { %v748_v48 = vmul.f32 %v747_v8, %v745_v20  ;;  %v901_v52 = vor.u32 %v900_v32, %v899_v36  ;;  %v889_v62 = vshrl.u32 %v14467_v9, %v888_v18  ;;  %v904_v8 = vor.u32 %v903_v4, %v902_v2 }
 0x142   : > { %10561 = vmatmul.mubr.msk.f32.gmra.mrb[10].mxu0 %vm14502_vm11, %v12337_v27  ;;  %vm905_vm12 = vcmp.lt.s32.totalorder %v12507_v10, 1  ;;  %v921_v20 = vshll.u32 %v881_v54, 8  ;;  %v831_v23 = vshrl.u32 %v830_v15, 30  ;;  %vm906_vm13 = vcmp.lt.s32.totalorder %v12507_v10, 2 }
 0x143   : > { %v749_v46 = vxor.u32 2147483648, %v748_v48  ;;  %2333 = vmatprep.mubr.f32.mxu0 %v14473_v11  ;;  %vm908_vm0 = vcmp.lt.s32.totalorder %v12507_v10, 4  ;;  %vm907_vm2 = vcmp.lt.s32.totalorder %v12507_v10, 3  ;;  %v913_v4 = vsel %vm905_vm12, %v892_v12, %v895_v63 }
 0x144   : > { %v914_v18 = vsel %vm908_vm0, %v901_v52, 920167782  ;;  %v832_v54 = vshll.u32 %v831_v23, 30  ;;  %v909_v22 = vsel %vm905_vm12, %v889_v62, %v892_v12  ;;  %v910_v33 = vsel %vm908_vm0, %v898_v6, 2102212464 }
 0x145   : > { %v750_v13 = vsel %vm667_vm7, %v749_v46, %v748_v48  ;;  %v915_v55 = vsel %vm907_vm2, %v898_v6, %v914_v18  ;;  %v917_v31 = vsel %vm905_vm12, %v895_v63, %v898_v6  ;;  %v918_v26 = vsel %vm908_vm0, %v904_v8, 1326507024  ;;  %vm14504_vm7 = vmmov %vm14501_vm9 }
 0x146   : > { %v753_v25 = vsel %vm12402_vm8, %v12017_v39, %v750_v13  ;;  %10562 = vmatmul.mubr.msk.f32.gmra.mrb[12].mxu0 %vm14503_vm14, %v12374_v53  ;;  %v12547_v36 = vsub.s32 %v829_v51, %v832_v54  ;;  %v855_v48 = vsub.s32 4, %v831_v23  ;;  %v916_v58 = vsel %vm906_vm13, %v913_v4, %v915_v55 }
 0x147   : > { %11679 = vcosq.f32 %v753_v25  ;;  %2339 = vmatprep.mubr.f32.mxu0 %v14473_v11  ;;  %v919_v32 = vsel %vm907_vm2, %v901_v52, %v918_v26  ;;  %v911_v12 = vsel %vm907_vm2, %v895_v63, %v910_v33  ;;  %v759_v6 = vand.u32 3, %v758_v49  ;;  %vm14508_vm2 = vmmov %vm14504_vm7 }
 0x148   : > { %11681 = vsinq.f32 %v753_v25  ;;  %v920_v2 = vsel %vm906_vm13, %v917_v31, %v919_v32  ;;  %v12557_v46 = vmul.u32.u64.low %v921_v20, %v916_v58  ;;  %v12558_v15 = vmul.u32.u64.high %v921_v20, %v916_v58, %v12557_v46 }
 0x149   : > { %v835_v51 = vsub.s32 0, %v12547_v36  ;;  %v12564_v62 = vmul.u32.u64.low %v921_v20, %v920_v2  ;;  %v12565_v8 = vmul.u32.u64.high %v921_v20, %v920_v2, %v12564_v62  ;;  %vm771_vm8 = vcmp.lt.s32.totalorder %v12019_v40, 0 }
 0x14a   : > { %10563 = vmatmul.mubr.msk.f32.gmra.mrb[14].mxu0 %vm14504_vm7, %v12388_v24  ;;  %v980_v52 = vand.u32 2139095040, %v12023_v42  ;;  %v856_v13 = vsel %vm771_vm8, %v855_v48, %v831_v23  ;;  %v912_v25 = vsel %vm906_vm13, %v909_v22, %v911_v12  ;;  %v14462_v49 = vand.u32 2147483647, %v12023_v42  ;;  %vm14507_vm13 = vmmov %vm14504_vm7 }
 0x14b   : > { %2499 = vmatprep.mubr.f32.mxu0 %v14473_v11  ;;  %v10499_v63 = vmin.u32 %v835_v51, %v12547_v36  ;;  %v931_v4 = vadd.s32 1, %v12558_v15  ;;  %vm760_vm5 = vcmp.lt.s32.totalorder %v759_v6, 2  ;;  %vm761_vm6 = vcmp.eq.s32.totalorder %v759_v6, 0 }
 0x14c   : > { %v981_v18 = vshrl.u32 %v980_v52, 23  ;;  %vm12580_vm10 = vcmp.le.f32.partialorder %v769_v34, 0.7853982  ;;  %v928_v23 = vmul.u32 %v921_v20, %v912_v25  ;;  %vm930_vm3 = vc.u32 %v12565_v8, %v12557_v46 }
 0x14d   : > { %v837_v33 = vclz %v10499_v63  ;;  %v12586_v10 = vsel %vm12580_vm10, 0, %v856_v13  ;;  %vm764_vm9 = vcmp.eq.s32.totalorder %v759_v6, 2  ;;  %v932_v26 = vsel %vm930_vm3, %v931_v4, %v12558_v15  ;;  %vm14510_vm3 = vmmov %vm14508_vm2 }
 0x14e   : > { %v10506_v22 = vadd.s32 4294967169, %v981_v18  ;;  %v984_v34 = vand.u32 8388607, %v14462_v49  ;;  %v933_v32 = vadd.s32 %v932_v26, %v928_v23  ;;  %v1084_v20 = vand.u32 2139095040, %v12025_v43 }
 0x14f   : > { %v10500_v31 = vadd.s32 4294967294, %v837_v33  ;;  %v825_v51 = vadd.s32 %v12494_v5, %v12483_v37  ;;  %v862_v62 = vadd.s32 3, %v12586_v10 }
 0x150   : > { %v987_v12 = vadd.s32 1, %v10506_v22  ;;  %v934_v63 = vadd.s32 536870912, %v933_v32  ;;  %v985_v18 = vor.u32 8388608, %v984_v34  ;;  %v1085_v23 = vshrl.u32 %v1084_v20, 23 }
 0x151   : > { %v12590_v55 = vpop.eup %11679  ;;  %vm10501_vm11 = vcmp.lt.s32.totalorder %v10500_v31, 0 }
 0x152   : > { %v12595_v48 = vpop.eup %11681  ;;  %v14463_v58 = vxor.u32 2147483648, %v12590_v55  ;;  %v840_v52 = vsel %vm10501_vm11, 0, %v10500_v31  ;;  %vm988_vm12 = vcmp.gt.s32.totalorder %v987_v12, 0  ;;  %v12611_v5 = vshrl.u32 %v934_v63, 30 }
 0x153   : > { %v14464_v2 = vxor.u32 2147483648, %v12595_v48  ;;  %v841_v25 = vsub.s32 32, %v840_v52  ;;  %v845_v4 = vsub.s32 4294967266, %v840_v52  ;;  %v989_v33 = vsel %vm988_vm12, %v987_v12, 0 }
 0x154   : > { %v766_v15 = vsel %vm764_vm9, %v14463_v58, %v12595_v48  ;;  %v842_v31 = vshll.u32 %v12547_v36, %v840_v52  ;;  %v991_v34 = vand.u32 31, %v989_v33  ;;  %v12622_v12 = vand.u32 3, %v862_v62 }
 0x155   : > { %v763_v13 = vsel %vm761_vm6, %v12590_v55, %v14464_v2  ;;  %v843_v26 = vshrl.u32 %v825_v51, %v841_v25  ;;  %v846_v49 = vadd.s32 127, %v845_v4  ;;  %v936_v2 = vshll.u32 %v12611_v5, 30 }
 0x156   : > { %v767_v37 = vsel %vm760_vm5, %v763_v13, %v766_v15  ;;  %v992_v63 = vsub.s32 32, %v991_v34  ;;  %v929_v51 = vadd.s32 %v12557_v46, %v12565_v8  ;;  %v12630_v52 = vshll.u32 %v985_v18, 8 }
 0x157   : > { %v12615_v22 = vsel %vm757_vm4, nan, %v767_v37  ;;  %v844_v6 = vor.u32 %v843_v26, %v842_v31  ;;  %v847_v15 = vshll.u32 %v846_v49, 23  ;;  %v12624_v20 = vsub.s32 %v933_v32, %v936_v2 }
 0x158   : > { %v2032_v58 = vcombine.high %v12615_v22, %v12615_v22  ;;  %v10510_v13 = vadd.s32 4294967169, %v1085_v23  ;;  %v995_v32 = vshrl.u32 %v14469_v14, %v992_v63  ;;  %v998_v62 = vshrl.u32 %v14465_v17, %v992_v63 }
 0x159   : > { %v848_v36 = vor.u32 4788187, %v847_v15  ;;  %v851_v25 = vcvt.s32.f32 %v844_v6  ;;  %v939_v49 = vsub.s32 0, %v12624_v20  ;;  %v1000_v4 = vshll.u32 %v14465_v17, %v991_v34 }
 0x15a   : > { %10564 = vmatprep.subr.msk.mxu1 %vm2046_vm1, %v2032_v58  ;;  %v12635_v58 = vshrl.u32 %v989_v33, 5  ;;  %v1001_v46 = vshrl.u32 %v11816_v19, %v992_v63  ;;  %v994_v37 = vshll.u32 %v14467_v9, %v991_v34  ;;  %v997_v33 = vshll.u32 %v14469_v14, %v991_v34 }
 0x15b   : > { %10565 = vmatpush1.msk.msra.mxu1 %vm2046_vm1, %v12615_v22  ;;  %v849_v2 = vand.u32 2147483647, %v848_v36  ;;  %v10503_v8 = vmin.u32 %v939_v49, %v12624_v20  ;;  %v1003_v26 = vshll.u32 %v11816_v19, %v991_v34  ;;  %v1004_v6 = vshrl.u32 %v14476_v21, %v992_v63 }
 0x15c   : > { %10566 = vmatmul.mubr.msk.f32.vlgmr.msra.gmra.mrb[8].mxu1 %vm14507_vm13, %v12296_v30  ;;  %v1002_v31 = vor.u32 %v1001_v46, %v1000_v4  ;;  %v996_v36 = vor.u32 %v995_v32, %v994_v37  ;;  %v999_v17 = vor.u32 %v998_v62, %v997_v33  ;;  %vm1009_vm0 = vcmp.lt.s32.totalorder %v12635_v58, 1 }
 0x15d   : > { %2416 = vmatprep.mubr.f32.mxu1 %v14473_v11  ;;  %v852_v23 = vmul.f32 %v851_v25, %v849_v2  ;;  %v941_v15 = vclz %v10503_v8  ;;  %v1005_v18 = vor.u32 %v1004_v6, %v1003_v26  ;;  %v1006_v9 = vshll.u32 %v14476_v21, %v991_v34 }
 0x15e   : > { %v1007_v14 = vshrl.u32 %v14475_v28, %v992_v63  ;;  %v14509_v2 = vmov 683565275   ;;  %vm1010_vm14 = vcmp.lt.s32.totalorder %v12635_v58, 2  ;;  %vm1012_vm7 = vcmp.lt.s32.totalorder %v12635_v58, 4 }
 0x15f   : > { %v853_v49 = vxor.u32 2147483648, %v852_v23  ;;  %v10504_v25 = vadd.s32 4294967294, %v941_v15  ;;  %v993_v4 = vshrl.u32 %v14509_v2, %v992_v63  ;;  %vm1011_vm5 = vcmp.lt.s32.totalorder %v12635_v58, 3 }
 0x160   : > { %10567 = vmatmul.mubr.msk.f32.gmra.mrb[10].mxu1 %vm14508_vm2, %v12337_v27  ;;  %v1008_v62 = vor.u32 %v1007_v14, %v1006_v9  ;;  %v1014_v34 = vsel %vm1012_vm7, %v1002_v31, 2102212464  ;;  %v1017_v63 = vsel %vm1009_vm0, %v996_v36, %v999_v17  ;;  %v1018_v8 = vsel %vm1012_vm7, %v1005_v18, 920167782 }
 0x161   : > { %2422 = vmatprep.mubr.f32.mxu1 %v14473_v11  ;;  %v854_v32 = vsel %vm771_vm8, %v853_v49, %v852_v23  ;;  %vm10505_vm6 = vcmp.lt.s32.totalorder %v10504_v25, 0  ;;  %v1013_v14 = vsel %vm1009_vm0, %v993_v4, %v996_v36  ;;  %v1019_v37 = vsel %vm1011_vm5, %v1002_v31, %v1018_v8  ;;  %vm14511_vm8 = vmmov %vm14508_vm2 }
 0x162   : > { %v857_v46 = vsel %vm12580_vm10, %v12019_v40, %v854_v32  ;;  %v944_v9 = vsel %vm10505_vm6, 0, %v10504_v25  ;;  %v1015_v23 = vsel %vm1011_vm5, %v999_v17, %v1014_v34  ;;  %v1020_v6 = vsel %vm1010_vm14, %v1017_v63, %v1019_v37 }
 0x163   : > { %11683 = vcosq.f32 %v857_v46  ;;  %v945_v54 = vsub.s32 32, %v944_v9  ;;  %v949_v33 = vsub.s32 4294967266, %v944_v9  ;;  %v946_v26 = vshll.u32 %v12624_v20, %v944_v9 }
 0x164   : > { %10568 = vmatmul.mubr.msk.f32.gmra.mrb[12].mxu1 %vm14510_vm3, %v12374_v53  ;;  %11685 = vsinq.f32 %v857_v46  ;;  %v1021_v15 = vsel %vm1009_vm0, %v999_v17, %v1002_v31  ;;  %v1022_v36 = vsel %vm1012_vm7, %v1008_v62, 1326507024  ;;  %v1091_v32 = vadd.s32 1, %v10510_v13 }
 0x165   : > { %2428 = vmatprep.mubr.f32.mxu1 %v14473_v11  ;;  %v947_v49 = vshrl.u32 %v929_v51, %v945_v54  ;;  %v950_v25 = vadd.s32 127, %v949_v33  ;;  %v1023_v4 = vsel %vm1011_vm5, %v1005_v18, %v1022_v36  ;;  %v14512_v20 = vand.u32 2147483647, %v12021_v41 }
 0x166   : > { %v1024_v17 = vsel %vm1010_vm14, %v1021_v15, %v1023_v4  ;;  %v12698_v31 = vmul.u32.u64.low %v12630_v52, %v1020_v6  ;;  %v12699_v51 = vmul.u32.u64.high %v12630_v52, %v1020_v6, %v12698_v31  ;;  %vm875_vm9 = vcmp.lt.s32.totalorder %v12021_v41, 0 }
 0x167   : > { %vm12691_vm10 = vcmp.le.f32.partialorder %v14512_v20, 0.7853982  ;;  %v948_v13 = vor.u32 %v947_v49, %v946_v26  ;;  %v951_v18 = vshll.u32 %v950_v25, 23  ;;  %v1016_v63 = vsel %vm1010_vm14, %v1013_v14, %v1015_v23 }
 0x168   : > { %10569 = vmatmul.mubr.msk.f32.gmra.mrb[14].mxu1 %vm14511_vm8, %v12388_v24  ;;  %v12704_v62 = vmul.u32.u64.low %v12630_v52, %v1024_v17  ;;  %v12705_v46 = vmul.u32.u64.high %v12630_v52, %v1024_v17, %v12704_v62  ;;  %v14471_v8 = vand.u32 2147483647, %v12025_v43  ;;  %vm1092_vm11 = vcmp.gt.s32.totalorder %v1091_v32, 0 }
 0x169   : > { %2588 = vmatprep.mubr.f32.mxu1 %v14473_v11  ;;  %vm861_vm12 = vweird.f32 %v12019_v40  ;;  %vm864_vm13 = vcmp.lt.s32.totalorder %v12622_v12, 2  ;;  %v952_v9 = vor.u32 4788187, %v951_v18  ;;  %v14515_v37 = vsub.s32 4, %v12611_v5 }
 0x16a   : > { %v1093_v33 = vsel %vm1092_vm11, %v1091_v32, 0  ;;  %vm865_vm0 = vcmp.eq.s32.totalorder %v12622_v12, 0  ;;  %vm868_vm2 = vcmp.eq.s32.totalorder %v12622_v12, 2  ;;  %v1035_v58 = vadd.s32 1, %v12699_v51 }
 0x16b   : > { %v960_v54 = vsel %vm875_vm9, %v14515_v37, %v12611_v5  ;;  %v1095_v14 = vand.u32 31, %v1093_v33  ;;  %v953_v23 = vand.u32 2147483647, %v952_v9  ;;  %v955_v26 = vcvt.s32.f32 %v948_v13 }
 0x16c   : > { %v1032_v6 = vmul.u32 %v12630_v52, %v1016_v63  ;;  %vm1034_vm14 = vc.u32 %v12705_v46, %v12698_v31  ;;  %v12728_v5 = vsel %vm12691_vm10, 0, %v960_v54  ;;  %v1088_v49 = vand.u32 8388607, %v14471_v8 }
 0x16d   : > { %v12724_v15 = vpop.eup %11683  ;;  %v1036_v36 = vsel %vm1034_vm14, %v1035_v58, %v12699_v51  ;;  %v1096_v25 = vsub.s32 32, %v1095_v14  ;;  %v956_v52 = vmul.f32 %v955_v26, %v953_v23  ;;  %v1098_v17 = vshll.u32 %v14509_v2, %v1095_v14  ;;  %vm14522_vm14 = vmmov %vm14510_vm3 }
 0x16e   : > { %v12733_v4 = vpop.eup %11685  ;;  %v14472_v32 = vxor.u32 2147483648, %v12724_v15  ;;  %v1037_v20 = vadd.s32 %v1036_v36, %v1032_v6  ;;  %v14516_v18 = vmov 2475754826   ;;  %v14517_v9 = vmov 2131351028  }
 0x16f   : > { %v866_v13 = vxor.u32 2147483648, %v12733_v4  ;;  %v1099_v62 = vshrl.u32 %v14516_v18, %v1096_v25  ;;  %v1101_v63 = vshll.u32 %v14516_v18, %v1095_v14  ;;  %v1102_v51 = vshrl.u32 %v14517_v9, %v1096_v25 }
 0x170   : > { %v870_v37 = vsel %vm868_vm2, %v14472_v32, %v12733_v4  ;;  %v957_v54 = vxor.u32 2147483648, %v956_v52  ;;  %v1038_v58 = vadd.s32 536870912, %v1037_v20  ;;  %v1105_v23 = vshrl.u32 %v11816_v19, %v1096_v25 }
 0x171   : > { %v867_v26 = vsel %vm865_vm0, %v12724_v15, %v866_v13  ;;  %v1094_v6 = vshrl.u32 %v1093_v33, 5  ;;  %v1100_v36 = vor.u32 %v1099_v62, %v1098_v17  ;;  %v1104_v18 = vshll.u32 %v14517_v9, %v1095_v14 }
 0x172   : > { %v871_v8 = vsel %vm864_vm13, %v867_v26, %v870_v37  ;;  %v958_v32 = vsel %vm875_vm9, %v957_v54, %v956_v52  ;;  %v12757_v11 = vshrl.u32 %v1038_v58, 30  ;;  %v1103_v28 = vor.u32 %v1102_v51, %v1101_v63 }
 0x173   : > { %v12761_v21 = vsel %vm861_vm12, nan, %v871_v8  ;;  %v961_v33 = vsel %vm12691_vm10, %v12021_v41, %v958_v32  ;;  %v1107_v17 = vshll.u32 %v11816_v19, %v1095_v14  ;;  %v14518_v62 = vmov 920167782   ;;  %vm14521_vm10 = vmmov %vm14510_vm3 }
 0x174   : > { %v1108_v9 = vshrl.u32 %v14518_v62, %v1096_v25  ;;  %v2033_v12 = vcombine.high %v12761_v21, %v12761_v21  ;;  %11687 = vcosq.f32 %v961_v33  ;;  %v1040_v52 = vshll.u32 %v12757_v11, 30 }
 0x175   : > { %v1106_v37 = vor.u32 %v1105_v23, %v1104_v18  ;;  %11689 = vsinq.f32 %v961_v33  ;;  %v1110_v8 = vshll.u32 %v14518_v62, %v1095_v14  ;;  %v14519_v51 = vmov 1326507024  }
 0x176   : > { %v1109_v63 = vor.u32 %v1108_v9, %v1107_v17  ;;  %v1111_v54 = vshrl.u32 %v14519_v51, %v1096_v25  ;;  %10570 = vmatprep.subr.msk.mxu0 %vm2046_vm1, %v2033_v12  ;;  %v12774_v34 = vsub.s32 %v1037_v20, %v1040_v52  ;;  %v966_v19 = vadd.s32 3, %v12728_v5 }
 0x177   : > { %10571 = vmatpush1.msk.msra.mxu0 %vm2046_vm1, %v12761_v21  ;;  %v1089_v32 = vor.u32 8388608, %v1088_v49  ;;  %vm1113_vm7 = vcmp.lt.s32.totalorder %v1094_v6, 1  ;;  %vm1115_vm5 = vcmp.lt.s32.totalorder %v1094_v6, 3  ;;  %vm1116_vm6 = vcmp.lt.s32.totalorder %v1094_v6, 4 }
 0x178   : > { %v1112_v58 = vor.u32 %v1111_v54, %v1110_v8  ;;  %v1043_v23 = vsub.s32 0, %v12774_v34  ;;  %v1121_v14 = vsel %vm1113_vm7, %v1100_v36, %v1103_v28  ;;  %10572 = vmatmul.mubr.msk.f32.vlgmr.msra.gmra.mrb[16].mxu0 %vm14510_vm3, %v12296_v30  ;;  %v1097_v20 = vshrl.u32 %v14509_v2, %v1096_v25 }
 0x179   : > { %v1118_v26 = vsel %vm1116_vm6, %v1106_v37, 2102212464  ;;  %v1122_v18 = vsel %vm1116_vm6, %v1109_v63, 920167782  ;;  %v14520_v17 = vmov 0.0   ;;  %vm1114_vm8 = vcmp.lt.s32.totalorder %v1094_v6, 2 }
 0x17a   : > { %v1126_v33 = vsel %vm1116_vm6, %v1112_v58, 1326507024  ;;  %2505 = vmatprep.mubr.f32.mxu0 %v14520_v17  ;;  %v10507_v49 = vmin.u32 %v1043_v23, %v12774_v34  ;;  %v1123_v62 = vsel %vm1115_vm5, %v1106_v37, %v1122_v18  ;;  %v1125_v9 = vsel %vm1113_vm7, %v1103_v28, %v1106_v37 }
 0x17b   : > { %v967_v12 = vand.u32 3, %v966_v19  ;;  %v1124_v52 = vsel %vm1114_vm8, %v1121_v14, %v1123_v62  ;;  %v1127_v8 = vsel %vm1115_vm5, %v1109_v63, %v1126_v33  ;;  %v1129_v51 = vshll.u32 %v1089_v32, 8 }
 0x17c   : > { %v1045_v54 = vclz %v10507_v49  ;;  %v1117_v2 = vsel %vm1113_vm7, %v1097_v20, %v1100_v36  ;;  %v1119_v25 = vsel %vm1115_vm5, %v1103_v28, %v1118_v26  ;;  %10573 = vmatmul.mubr.msk.f32.gmra.mrb[18].mxu0 %vm14521_vm10, %v12337_v27  ;;  %v1128_v58 = vsel %vm1114_vm8, %v1125_v9, %v1127_v8  ;;  %vm14523_vm5 = vmmov %vm14510_vm3 }
 0x17d   : > { %v12795_v23 = vmul.u32.u64.low %v1129_v51, %v1124_v52  ;;  %v12796_v18 = vmul.u32.u64.high %v1129_v51, %v1124_v52, %v12795_v23  ;;  %2511 = vmatprep.mubr.f32.mxu0 %v14520_v17  ;;  %v12802_v19 = vmul.u32.u64.low %v1129_v51, %v1128_v58  ;;  %v12803_v32 = vmul.u32.u64.high %v1129_v51, %v1128_v58, %v12802_v19 }
 0x17e   : > { %v12800_v37 = vpop.eup %11687  ;;  %v10508_v63 = vadd.s32 4294967294, %v1045_v54  ;;  %vm965_vm9 = vweird.f32 %v12021_v41  ;;  %vm968_vm11 = vcmp.lt.s32.totalorder %v967_v12, 2  ;;  %v1120_v14 = vsel %vm1114_vm8, %v1117_v2, %v1119_v25  ;;  %vm14525_vm8 = vmmov %vm14523_vm5 }
 0x17f   : > { %v12805_v36 = vpop.eup %11689  ;;  %v973_v28 = vxor.u32 2147483648, %v12800_v37  ;;  %vm969_vm13 = vcmp.eq.s32.totalorder %v967_v12, 0  ;;  %vm972_vm0 = vcmp.eq.s32.totalorder %v967_v12, 2  ;;  %v1033_v33 = vadd.s32 %v12698_v31, %v12705_v46 }
 0x180   : > { %v970_v20 = vxor.u32 2147483648, %v12805_v36  ;;  %vm10509_vm2 = vcmp.lt.s32.totalorder %v10508_v63, 0  ;;  %10574 = vmatmul.mubr.msk.f32.gmra.mrb[20].mxu0 %vm14522_vm14, %v12374_v53  ;;  %v1139_v62 = vadd.s32 1, %v12796_v18  ;;  %v1136_v8 = vmul.u32 %v1129_v51, %v1120_v14 }
 0x181   : > { %v974_v26 = vsel %vm972_vm0, %v973_v28, %v12805_v36  ;;  %v1048_v49 = vsel %vm10509_vm2, 0, %v10508_v63  ;;  %2517 = vmatprep.mubr.f32.mxu0 %v14520_v17  ;;  %vm1138_vm7 = vc.u32 %v12803_v32, %v12795_v23  ;;  %v1587_v31 = vand.u32 3, %v12449_v59 }
 0x182   : > { %v971_v6 = vsel %vm969_vm13, %v12800_v37, %v970_v20  ;;  %v1049_v9 = vsub.s32 32, %v1048_v49  ;;  %v1053_v52 = vsub.s32 4294967266, %v1048_v49  ;;  %v1050_v2 = vshll.u32 %v12774_v34, %v1048_v49 }
 0x183   : > { %v975_v54 = vsel %vm968_vm11, %v971_v6, %v974_v26  ;;  %v1140_v63 = vsel %vm1138_vm7, %v1139_v62, %v12796_v18  ;;  %vm1589_vm6 = vcmp.eq.s32.totalorder %v1587_v31, 0  ;;  %v14524_v18 = vxor.u32 2147483648, %v12595_v48  ;;  %vm14527_vm11 = vmmov %vm14523_vm5 }
 0x184   : > { %v12830_v46 = vsel %vm965_vm9, nan, %v975_v54  ;;  %v1051_v25 = vshrl.u32 %v1033_v33, %v1049_v9  ;;  %v1054_v58 = vadd.s32 127, %v1053_v52  ;;  %10575 = vmatmul.mubr.msk.f32.gmra.mrb[22].mxu0 %vm14523_vm5, %v12388_v24  ;;  %v1141_v34 = vadd.s32 %v1140_v63, %v1136_v8  ;;  %vm14530_vm7 = vmmov %vm14523_vm5 }
 0x185   : > { %v2034_v12 = vcombine.high %v12830_v46, %v12830_v46  ;;  %2677 = vmatprep.mubr.f32.mxu0 %v14520_v17  ;;  %v1591_v26 = vsel %vm1589_vm6, %v12590_v55, %v14524_v18  ;;  %vm1592_vm3 = vcmp.eq.s32.totalorder %v1587_v31, 2  ;;  %vm1588_vm10 = vcmp.lt.s32.totalorder %v1587_v31, 2 }
 0x186   : > { %v1052_v51 = vor.u32 %v1051_v25, %v1050_v2  ;;  %v1055_v19 = vshll.u32 %v1054_v58, 23  ;;  %v1142_v59 = vadd.s32 536870912, %v1141_v34  ;;  %v14526_v49 = vxor.u32 2147483648, %v12590_v55 }
 0x187   : > { %10576 = vmatprep.subr.msk.mxu1 %vm2046_vm1, %v2034_v12  ;;  %v1690_v8 = vand.u32 3, %v12586_v10  ;;  %v1063_v31 = vsub.s32 4, %v12757_v11  ;;  %v12860_v58 = vmul.f32 2.0, %v12761_v21  ;;  %v1793_v10 = vand.u32 3, %v12728_v5 }
 0x188   : > { %10577 = vmatpush1.msk.msra.mxu1 %vm2046_vm1, %v12830_v46  ;;  %v1056_v14 = vor.u32 4788187, %v1055_v19  ;;  %v12844_v33 = vshrl.u32 %v1142_v59, 30  ;;  %v1594_v62 = vsel %vm1592_vm3, %v14526_v49, %v12595_v48  ;;  %v1059_v9 = vcvt.s32.f32 %v1052_v51  ;;  %vm14531_vm3 = vmmov %vm14530_vm7 }
 0x189   : > { %10578 = vmatmul.mubr.msk.f32.vlgmr.msra.gmra.mrb[16].mxu1 %vm14525_vm8, %v12296_v30  ;;  %v1595_v52 = vsel %vm1588_vm10, %v1591_v26, %v1594_v62  ;;  %vm1692_vm13 = vcmp.eq.s32.totalorder %v1690_v8, 0  ;;  %vm1695_vm0 = vcmp.eq.s32.totalorder %v1690_v8, 2  ;;  %vm1691_vm2 = vcmp.lt.s32.totalorder %v1690_v8, 2 }
 0x18a   : > { %v1057_v6 = vand.u32 2147483647, %v1056_v14  ;;  %2594 = vmatprep.mubr.f32.mxu1 %v14520_v17  ;;  %v1144_v54 = vshll.u32 %v12844_v33, 30  ;;  %v12856_v2 = vsel %vm757_vm4, nan, %v1595_v52  ;;  %v1694_v63 = vsel %vm1692_vm13, %v12724_v15, %v866_v13 }
 0x18b   : > { %v14528_v12 = vxor.u32 2147483648, %v12724_v15  ;;  %vm979_vm4 = vcmp.lt.s32.totalorder %v12023_v42, 0  ;;  %v14529_v59 = vand.u32 2147483647, %v12023_v42  ;;  %vm1795_vm5 = vcmp.eq.s32.totalorder %v1793_v10, 0 }
 0x18c   : > { %v1060_v25 = vmul.f32 %v1059_v9, %v1057_v6  ;;  %v1145_v55 = vsub.s32 %v1141_v34, %v1144_v54  ;;  %v1064_v14 = vsel %vm979_vm4, %v1063_v31, %v12757_v11  ;;  %vm1798_vm6 = vcmp.eq.s32.totalorder %v1793_v10, 2 }
 0x18d   : > { %10579 = vmatmul.mubr.msk.f32.gmra.mrb[18].mxu1 %vm14527_vm11, %v12337_v27  ;;  %v1697_v51 = vsel %vm1695_vm0, %v14528_v12, %v12733_v4  ;;  %vm978_vm14 = vcmp.le.f32.partialorder %v14529_v59, 0.7853982  ;;  %v1797_v11 = vsel %vm1795_vm5, %v12800_v37, %v970_v20  ;;  %v1800_v4 = vsel %vm1798_vm6, %v973_v28, %v12805_v36  ;;  %vm14533_vm5 = vmmov %vm14531_vm3 }
 0x18e   : > { %v1061_v48 = vxor.u32 2147483648, %v1060_v25  ;;  %2600 = vmatprep.mubr.f32.mxu1 %v14520_v17  ;;  %v1147_v34 = vsub.s32 0, %v1145_v55  ;;  %v1698_v19 = vsel %vm1691_vm2, %v1694_v63, %v1697_v51  ;;  %v1066_v49 = vsel %vm978_vm14, 0, %v1064_v14  ;;  %vm14534_vm6 = vmmov %vm14531_vm3 }
 0x18f   : > { %v12878_v18 = vsel %vm861_vm12, nan, %v1698_v19  ;;  %vm1794_vm12 = vcmp.lt.s32.totalorder %v1793_v10, 2  ;;  %v12895_v9 = vmul.f32 2.0, %v12830_v46  ;;  %v1070_v20 = vadd.s32 3, %v1066_v49 }
 0x190   : > { %v1062_v5 = vsel %vm979_vm4, %v1061_v48, %v1060_v25  ;;  %v10511_v26 = vmin.u32 %v1147_v34, %v1145_v55  ;;  %v12886_v15 = vmul.f32 %v12860_v58, %v12878_v18  ;;  %v1801_v6 = vsel %vm1794_vm12, %v1797_v11, %v1800_v4  ;;  %vm14535_vm12 = vmmov %vm14531_vm3 }
 0x191   : > { %v1065_v13 = vsel %vm978_vm14, %v12023_v42, %v1062_v5  ;;  %10580 = vmatmul.mubr.msk.f32.gmra.mrb[20].mxu1 %vm14530_vm7, %v12374_v53  ;;  %v12901_v8 = vsel %vm965_vm9, nan, %v1801_v6  ;;  %v1137_v28 = vadd.s32 %v12795_v23, %v12803_v32  ;;  %v1071_v31 = vand.u32 3, %v1070_v20 }
 0x192   : > { %11691 = vcosq.f32 %v1065_v13  ;;  %2606 = vmatprep.mubr.f32.mxu1 %v14520_v17  ;;  %v1149_v62 = vclz %v10511_v26  ;;  %v12906_v37 = vmul.f32 %v12895_v9, %v12901_v8  ;;  %v1896_v10 = vand.u32 3, %v1066_v49 }
 0x193   : > { %11693 = vsinq.f32 %v1065_v13  ;;  %vm1069_vm9 = vweird.f32 %v12023_v42  ;;  %vm1073_vm10 = vcmp.eq.s32.totalorder %v1071_v31, 0  ;;  %vm1076_vm11 = vcmp.eq.s32.totalorder %v1071_v31, 2 }
 0x194   : > { %v10512_v52 = vadd.s32 4294967294, %v1149_v62  ;;  %vm1901_vm13 = vcmp.eq.s32.totalorder %v1896_v10, 2  ;;  %vm1898_vm0 = vcmp.eq.s32.totalorder %v1896_v10, 0  ;;  %vm1072_vm2 = vcmp.lt.s32.totalorder %v1071_v31, 2 }
 0x195   : > { %10581 = vmatmul.mubr.msk.f32.gmra.mrb[22].mxu1 %vm14531_vm3, %v12388_v24  ;;  %vm1897_vm4 = vcmp.lt.s32.totalorder %v1896_v10, 2  ;;  %v2799_v31 = vcombine.high %v12027_v44, %v12027_v44  ;;  %vm1083_vm14 = vcmp.lt.s32.totalorder %v12025_v43, 0 }
 0x196   : > { %2766 = vmatprep.mubr.f32.mxu1 %v14520_v17  ;;  %vm10513_vm8 = vcmp.lt.s32.totalorder %v10512_v52, 0 }
 0x197   : > { %v1152_v36 = vsel %vm10513_vm8, 0, %v10512_v52 }
 0x198   : > { %v1153_v54 = vsub.s32 32, %v1152_v36  ;;  %v1157_v25 = vsub.s32 4294967266, %v1152_v36  ;;  %v1154_v48 = vshll.u32 %v1145_v55, %v1152_v36 }
 0x19a   : > { %v1155_v63 = vshrl.u32 %v1137_v28, %v1153_v54  ;;  %v1158_v12 = vadd.s32 127, %v1157_v25  ;;  %v1167_v28 = vsub.s32 4, %v12844_v33 }
 0x19c   : > { %v11692_v51 = vpop.eup %11691  ;;  %v1156_v59 = vor.u32 %v1155_v63, %v1154_v48  ;;  %v1159_v5 = vshll.u32 %v1158_v12, 23  ;;  %v14532_v48 = vand.u32 2147483647, %v12025_v43  ;;  %v1168_v12 = vsel %vm1083_vm14, %v1167_v28, %v12844_v33 }
 0x19d   : > { %v11694_v34 = vpop.eup %11693  ;;  %v1077_v19 = vxor.u32 2147483648, %v11692_v51 }
 0x19e   : > { %v1074_v14 = vxor.u32 2147483648, %v11694_v34  ;;  %v1160_v23 = vor.u32 4788187, %v1159_v5  ;;  %v1163_v49 = vcvt.s32.f32 %v1156_v59  ;;  %vm1082_vm7 = vcmp.le.f32.partialorder %v14532_v48, 0.7853982  ;;  %v12983_v48 = vld [vmem:[%s14453_s3 + $0x8] sm:$0xff] }
 0x19f   : > { %v1078_v13 = vsel %vm1076_vm11, %v1077_v19, %v11694_v34  ;;  %v1903_v32 = vsel %vm1901_vm13, %v1077_v19, %v11694_v34  ;;  %v1170_v19 = vsel %vm1082_vm7, 0, %v1168_v12 }
 0x1a0   : > { %v1075_v26 = vsel %vm1073_vm10, %v11692_v51, %v1074_v14  ;;  %v1900_v55 = vsel %vm1898_vm0, %v11692_v51, %v1074_v14  ;;  %v1161_v4 = vand.u32 2147483647, %v1160_v23  ;;  %v2801_v51 = vcombine.high %v12015_v38, %v12015_v38  ;;  %vm14536_vm0 = vmmov %vm14531_vm3 }
 0x1a1   : > { %v1079_v11 = vsel %vm1072_vm2, %v1075_v26, %v1078_v13  ;;  %v1904_v62 = vsel %vm1897_vm4, %v1900_v55, %v1903_v32  ;;  %v1174_v33 = vadd.s32 3, %v1170_v19  ;;  %v2803_v32 = vcombine.high %v12019_v40, %v12019_v40 }
 0x1a2   : > { %v12913_v6 = vsel %vm1069_vm9, nan, %v1079_v11  ;;  %v12917_v52 = vsel %vm1069_vm9, nan, %v1904_v62  ;;  %v1164_v36 = vmul.f32 %v1163_v49, %v1161_v4  ;;  %v12962_v4 = vld [vmem:[%s14453_s3] sm:$0xff]  ;;  %vm1173_vm4 = vweird.f32 %v12025_v43 }
 0x1a3   : > { %v2035_v20 = vcombine.high %v12913_v6, %v12913_v6  ;;  %v12923_v54 = vmul.f32 2.0, %v12913_v6  ;;  %v1175_v59 = vand.u32 3, %v1174_v33  ;;  %v13149_v33 = vpop.permute.xlu1 %3561 }
 0x1a4   : > { %v1165_v25 = vxor.u32 2147483648, %v1164_v36 }
 0x1a5   : > { %10582 = vmatprep.subr.msk.mxu0 %vm2046_vm1, %v2035_v20  ;;  %v12930_v10 = vmul.f32 %v12923_v54, %v12917_v52  ;;  %vm1180_vm8 = vcmp.eq.s32.totalorder %v1175_v59, 2  ;;  %vm1177_vm10 = vcmp.eq.s32.totalorder %v1175_v59, 0  ;;  %vm1176_vm13 = vcmp.lt.s32.totalorder %v1175_v59, 2 }
 0x1a6   : > { %10583 = vmatpush1.msk.msra.mxu0 %vm2046_vm1, %v12913_v6  ;;  %v1166_v63 = vsel %vm1083_vm14, %v1165_v25, %v1164_v36  ;;  %vm14537_vm14 = vmmov %vm14536_vm0  ;;  %v3578_v59 = vcombine.high %v12856_v2, %v12856_v2 }
 0x1a7   : > { %10594 = vmatprep.subr.msk.mxu0 %vm2046_vm1, %v2799_v31  ;;  %10584 = vmatmul.mubr.msk.f32.vlgmr.msra.gmra.mrb[24].mxu0 %vm14533_vm5, %v12296_v30  ;;  %v1169_v34 = vsel %vm1082_vm7, %v12025_v43, %v1166_v63  ;;  %v2800_v63 = vcombine.high %v12029_v45, %v12029_v45  ;;  %vm14538_vm7 = vmmov %vm14536_vm0 }
 0x1a8   : > { %10595 = vmatpush1.msk.msra.mxu0 %vm2046_vm1, %v12027_v44  ;;  %2683 = vmatprep.mubr.f32.mxu0 %v14520_v17  ;;  %11695 = vcosq.f32 %v1169_v34  ;;  %v1999_v44 = vand.u32 3, %v1170_v19  ;;  %vm14539_vm5 = vmmov %vm14536_vm0 }
 0x1a9   : > { %10606 = vmatprep.subr.msk.mxu0 %vm2046_vm1, %v2801_v51  ;;  %11697 = vsinq.f32 %v1169_v34  ;;  %v2802_v51 = vcombine.high %v12017_v39, %v12017_v39  ;;  %v13009_v34 = vld [vmem:[%s14453_s3 + $0x10] sm:$0xff] }
 0x1aa   : > { %vm2004_vm9 = vcmp.eq.s32.totalorder %v1999_v44, 2  ;;  %vm2001_vm11 = vcmp.eq.s32.totalorder %v1999_v44, 0  ;;  %vm2000_vm2 = vcmp.lt.s32.totalorder %v1999_v44, 2 }
 0x1ab   : > { %10585 = vmatmul.mubr.msk.f32.gmra.mrb[26].mxu0 %vm14534_vm6, %v12337_v27  ;;  %vm14540_vm6 = vmmov %vm14536_vm0 }
 0x1ac   : > { %2689 = vmatprep.mubr.f32.mxu0 %v14520_v17 }
 0x1af   : > { %10586 = vmatmul.mubr.msk.f32.gmra.mrb[28].mxu0 %vm14535_vm12, %v12374_v53  ;;  %vm14541_vm12 = vmmov %vm14536_vm0 }
 0x1b0   : > { %2695 = vmatprep.mubr.f32.mxu0 %v14520_v17 }
 0x1b2   : > { %v11696_v5 = vpop.eup %11695 }
 0x1b3   : > { %10587 = vmatmul.mubr.msk.f32.gmra.mrb[30].mxu0 %vm14531_vm3, %v12388_v24  ;;  %v11698_v14 = vpop.eup %11697  ;;  %v1181_v13 = vxor.u32 2147483648, %v11696_v5  ;;  %vm14542_vm3 = vmmov %vm14536_vm0 }
 0x1b4   : > { %2911 = vmatprep.mubr.f32.mxu0 %v14520_v17  ;;  %v1178_v23 = vxor.u32 2147483648, %v11698_v14 }
 0x1b5   : > { %v1182_v26 = vsel %vm1180_vm8, %v1181_v13, %v11698_v14  ;;  %v2006_v55 = vsel %vm2004_vm9, %v1181_v13, %v11698_v14  ;;  %vm14543_vm8 = vmmov %vm14536_vm0  ;;  %v4447_v14 = vcombine.high %v12317_v1, %v12317_v1  ;;  %v13239_v13 = vmul.f32 2.0, %v12487_v3 }
 0x1b6   : > { %v1179_v11 = vsel %vm1177_vm10, %v11696_v5, %v1178_v23  ;;  %v2003_v49 = vsel %vm2001_vm11, %v11696_v5, %v1178_v23  ;;  %vm14544_vm9 = vmmov %vm14536_vm0  ;;  %v13171_v5 = vpop.permute.xlu1 %3565 }
 0x1b7   : > { %10596 = vmatmul.mubr.msk.f32.vlgmr.msra.gmra.mrb[0].mxu0 %vm14536_vm0, %v12962_v4  ;;  %v1183_v62 = vsel %vm1176_vm13, %v1179_v11, %v1182_v26  ;;  %v2007_v20 = vsel %vm2000_vm2, %v2003_v49, %v2006_v55  ;;  %vm14545_vm10 = vmmov %vm14536_vm0  ;;  %v13290_v26 = vmul.f32 2.0, %v12615_v22  ;;  %v4451_v11 = vcombine.high %v12886_v15, %v12886_v15 }
 0x1b8   : > { %10607 = vmatpush1.msk.msra.mxu0 %vm2046_vm1, %v12015_v38  ;;  %2917 = vmatprep.mubr.f32.mxu0 %v14520_v17  ;;  %v12970_v36 = vsel %vm1173_vm4, nan, %v1183_v62  ;;  %v12973_v28 = vsel %vm1173_vm4, nan, %v2007_v20  ;;  %vm14546_vm11 = vmmov %vm14536_vm0  ;;  %v3576_v38 = vcombine.high %v12360_v50, %v12360_v50 }
 0x1b9   : > { %10618 = vmatprep.subr.msk.mxu0 %vm2046_vm1, %v2803_v32  ;;  %v2036_v25 = vcombine.high %v12970_v36, %v12970_v36  ;;  %v12978_v31 = vmul.f32 2.0, %v12970_v36  ;;  %vm14547_vm13 = vmmov %vm14536_vm0  ;;  %v4448_v32 = vcombine.high %v12379_v56, %v12379_v56  ;;  %v13308_v49 = vmul.f32 %v13290_v26, %v12856_v2 }
 0x1ba   : > { %vm14548_vm2 = vmmov %vm14536_vm0 }
 0x1bb   : > { %10597 = vmatmul.mubr.msk.f32.gmra.mrb[2].mxu0 %vm14537_vm14, %v12983_v48  ;;  %10588 = vmatprep.subr.msk.mxu1 %vm2046_vm1, %v2036_v25  ;;  %v12993_v12 = vmul.f32 %v12978_v31, %v12973_v28  ;;  %vm14549_vm4 = vmmov %vm14536_vm0  ;;  %v4450_v62 = vcombine.high %v13308_v49, %v13308_v49  ;;  %v4452_v25 = vcombine.high %v12906_v37, %v12906_v37 }
 0x1bc   : > { %2923 = vmatprep.mubr.f32.mxu0 %v14520_v17  ;;  %10589 = vmatpush1.msk.msra.mxu1 %vm2046_vm1, %v12970_v36  ;;  %vm14550_vm14 = vmmov %vm14536_vm0 }
 0x1bd   : > { %10600 = vmatprep.subr.msk.mxu1 %vm2046_vm1, %v2800_v63  ;;  %10590 = vmatmul.mubr.msk.f32.vlgmr.msra.gmra.mrb[24].mxu1 %vm14538_vm7, %v12296_v30  ;;  %v2805_v30 = vcombine.high %v12023_v42, %v12023_v42  ;;  %vm14551_vm7 = vmmov %vm14536_vm0 }
 0x1be   : > { %10601 = vmatpush1.msk.msra.mxu1 %vm2046_vm1, %v12029_v45  ;;  %2772 = vmatprep.mubr.f32.mxu1 %v14520_v17  ;;  %v13020_v45 = vld [vmem:[%s14453_s3 + $0x18] sm:$0xff] }
 0x1bf   : > { %10612 = vmatprep.subr.msk.mxu1 %vm2046_vm1, %v2802_v51  ;;  %10598 = vmatmul.mubr.msk.f32.gmra.mrb[4].mxu0 %vm14539_vm5, %v13009_v34  ;;  %vm14552_vm5 = vmmov %vm14536_vm0  ;;  %v4417_v51 = vmul.f32 %v13239_v13, %v12487_v3 }
 0x1c0   : > { %2929 = vmatprep.mubr.f32.mxu0 %v14520_v17 }
 0x1c1   : > { %10591 = vmatmul.mubr.msk.f32.gmra.mrb[26].mxu1 %vm14540_vm6, %v12337_v27  ;;  %v1484_v27 = vand.u32 3, %v12346_v61  ;;  %vm14553_vm6 = vmmov %vm14536_vm0  ;;  %v14554_v61 = vxor.u32 2147483648, %v12459_v57 }
 0x1c2   : > { %2778 = vmatprep.mubr.f32.mxu1 %v14520_v17 }
 0x1c3   : > { %10599 = vmatmul.mubr.msk.f32.gmra.mrb[6].mxu0 %vm14541_vm12, %v13020_v45  ;;  %vm1486_vm12 = vcmp.eq.s32.totalorder %v1484_v27, 0 }
 0x1c4   : > { %3089 = vmatprep.mubr.f32.mxu0 %v14520_v17 }
 0x1c5   : > { %10592 = vmatmul.mubr.msk.f32.gmra.mrb[28].mxu1 %vm14542_vm3, %v12374_v53  ;;  %vm1489_vm3 = vcmp.eq.s32.totalorder %v1484_v27, 2  ;;  %v1488_v53 = vsel %vm1486_vm12, %v12456_v47, %v14554_v61  ;;  %vm14567_vm12 = vmmov %vm14536_vm0 }
 0x1c6   : > { %2784 = vmatprep.mubr.f32.mxu1 %v14520_v17 }
 0x1c7   : > { %10608 = vmatmul.mubr.msk.f32.vlgmr.msra.gmra.mrb[8].mxu0 %vm14543_vm8, %v12962_v4  ;;  %vm14556_vm8 = vmmov %vm14536_vm0 }
 0x1c8   : > { %10619 = vmatpush1.msk.msra.mxu0 %vm2046_vm1, %v12019_v40  ;;  %3095 = vmatprep.mubr.f32.mxu0 %v14520_v17  ;;  %v2804_v40 = vcombine.high %v12021_v41, %v12021_v41 }
 0x1c9   : > { %10593 = vmatmul.mubr.msk.f32.gmra.mrb[30].mxu1 %vm14544_vm9, %v12388_v24  ;;  %10630 = vmatprep.subr.msk.mxu0 %vm2046_vm1, %v2805_v30  ;;  %v14555_v24 = vxor.u32 2147483648, %v12456_v47  ;;  %vm1485_vm9 = vcmp.lt.s32.totalorder %v1484_v27, 2 }
 0x1ca   : > { %3000 = vmatprep.mubr.f32.mxu1 %v14520_v17 }
 0x1cb   : > { %10609 = vmatmul.mubr.msk.f32.gmra.mrb[10].mxu0 %vm14545_vm10, %v12983_v48  ;;  %v1491_v19 = vsel %vm1489_vm3, %v14555_v24, %v12459_v57  ;;  %vm14557_vm10 = vmmov %vm14536_vm0 }
 0x1cc   : > { %3101 = vmatprep.mubr.f32.mxu0 %v14520_v17  ;;  %vm14568_vm3 = vmmov %vm14536_vm0 }
 0x1cd   : > { %10602 = vmatmul.mubr.msk.f32.vlgmr.msra.gmra.mrb[0].mxu1 %vm14546_vm11, %v12962_v4  ;;  %vm14558_vm11 = vmmov %vm14536_vm0 }
 0x1ce   : > { %10613 = vmatpush1.msk.msra.mxu1 %vm2046_vm1, %v12017_v39  ;;  %3006 = vmatprep.mubr.f32.mxu1 %v14520_v17  ;;  %v3575_v39 = vcombine.high %v12293_v29, %v12293_v29 }
 0x1cf   : > { %10624 = vmatprep.subr.msk.mxu1 %vm2046_vm1, %v2804_v40  ;;  %10610 = vmatmul.mubr.msk.f32.gmra.mrb[12].mxu0 %vm14547_vm13, %v13009_v34  ;;  %vm14559_vm13 = vmmov %vm14536_vm0 }
 0x1d0   : > { %3107 = vmatprep.mubr.f32.mxu0 %v14520_v17 }
 0x1d1   : > { %10603 = vmatmul.mubr.msk.f32.gmra.mrb[2].mxu1 %vm14536_vm0, %v12983_v48 }
 0x1d2   : > { %3012 = vmatprep.mubr.f32.mxu1 %v14520_v17 }
 0x1d3   : > { %10611 = vmatmul.mubr.msk.f32.gmra.mrb[14].mxu0 %vm14548_vm2, %v13020_v45  ;;  %vm14560_vm2 = vmmov %vm14536_vm0 }
 0x1d4   : > { %3267 = vmatprep.mubr.f32.mxu0 %v14520_v17 }
 0x1d5   : > { %10604 = vmatmul.mubr.msk.f32.gmra.mrb[4].mxu1 %vm14549_vm4, %v13009_v34  ;;  %vm14562_vm4 = vmmov %vm14536_vm0 }
 0x1d6   : > { %3018 = vmatprep.mubr.f32.mxu1 %v14520_v17 }
 0x1d7   : > { %10620 = vmatmul.mubr.msk.f32.vlgmr.msra.gmra.mrb[16].mxu0 %vm14550_vm14, %v12962_v4  ;;  %vm14563_vm14 = vmmov %vm14536_vm0 }
 0x1d8   : > { %10631 = vmatpush1.msk.msra.mxu0 %vm2046_vm1, %v12023_v42  ;;  %3273 = vmatprep.mubr.f32.mxu0 %v14520_v17  ;;  %v2806_v42 = vcombine.high %v12025_v43, %v12025_v43 }
 0x1d9   : > { %10605 = vmatmul.mubr.msk.f32.gmra.mrb[6].mxu1 %vm14551_vm7, %v13020_v45  ;;  %10642 = vmatprep.subr.msk.mxu0 %vm2046_vm1, %v3575_v39  ;;  %vm14564_vm7 = vmmov %vm14536_vm0 }
 0x1da   : > { %3178 = vmatprep.mubr.f32.mxu1 %v14520_v17 }
 0x1db   : > { %10621 = vmatmul.mubr.msk.f32.gmra.mrb[18].mxu0 %vm14552_vm5, %v12983_v48  ;;  %vm14565_vm5 = vmmov %vm14536_vm0 }
 0x1dc   : > { %3279 = vmatprep.mubr.f32.mxu0 %v14520_v17 }
 0x1dd   : > { %10614 = vmatmul.mubr.msk.f32.vlgmr.msra.gmra.mrb[8].mxu1 %vm14553_vm6, %v12962_v4  ;;  %vm14566_vm6 = vmmov %vm14536_vm0 }
 0x1de   : > { %10625 = vmatpush1.msk.msra.mxu1 %vm2046_vm1, %v12021_v41  ;;  %3184 = vmatprep.mubr.f32.mxu1 %v14520_v17  ;;  %v1492_v41 = vsel %vm1485_vm9, %v1488_v53, %v1491_v19  ;;  %vm14570_vm9 = vmmov %vm14536_vm0  ;;  %v4421_v53 = vmul.f32 %v12923_v54, %v12913_v6  ;;  %v4420_v6 = vmul.f32 %v12895_v9, %v12830_v46  ;;  %v13535_v9 = vmul.f32 2.0, %v12317_v1 }
 0x1df   : > { %10636 = vmatprep.subr.msk.mxu1 %vm2046_vm1, %v2806_v42  ;;  %10622 = vmatmul.mubr.msk.f32.gmra.mrb[20].mxu0 %vm14556_vm8, %v13009_v34  ;;  %v13102_v47 = vsel %vm653_vm15, nan, %v1492_v41  ;;  %vm14561_vm15 = vmmov %vm14536_vm0 }
 0x1e0   : > { %3285 = vmatprep.mubr.f32.mxu0 %v14520_v17  ;;  %v3577_v57 = vcombine.high %v13102_v47, %v13102_v47  ;;  %vm14569_vm8 = vmmov %vm14536_vm0  ;;  %v13503_v19 = vsub.f32 1.0, %v4421_v53  ;;  %v13520_v41 = vsub.f32 1.0, %v4420_v6 }
 0x1e1   : > { %10615 = vmatmul.mubr.msk.f32.gmra.mrb[10].mxu1 %vm14557_vm10, %v12983_v48  ;;  %vm14571_vm10 = vmmov %vm14536_vm0 }
 0x1e2   : > { %3190 = vmatprep.mubr.f32.mxu1 %v14520_v17  ;;  %v5293_v54 = vcombine.high %v13503_v19, %v13503_v19  ;;  %v5292_v46 = vcombine.high %v13520_v41, %v13520_v41 }
 0x1e3   : > { %10623 = vmatmul.mubr.msk.f32.gmra.mrb[22].mxu0 %vm14558_vm11, %v13020_v45  ;;  %vm14572_vm11 = vmmov %vm14536_vm0 }
 0x1e4   : > { %3445 = vmatprep.mubr.f32.mxu0 %v14520_v17 }
 0x1e5   : > { %10616 = vmatmul.mubr.msk.f32.gmra.mrb[12].mxu1 %vm14559_vm13, %v13009_v34  ;;  %vm14573_vm13 = vmmov %vm14536_vm0 }
 0x1e6   : > { %3196 = vmatprep.mubr.f32.mxu1 %v14520_v17 }
 0x1e7   : > { %10632 = vmatmul.mubr.msk.f32.vlgmr.msra.gmra.mrb[24].mxu0 %vm14536_vm0, %v12962_v4 }
 0x1e8   : > { %10643 = vmatpush1.msk.msra.mxu0 %vm2046_vm1, %v12293_v29  ;;  %3451 = vmatprep.mubr.f32.mxu0 %v14520_v17  ;;  %v3579_v29 = vcombine.high %v12878_v18, %v12878_v18 }
 0x1e9   : > { %10617 = vmatmul.mubr.msk.f32.gmra.mrb[14].mxu1 %vm14560_vm2, %v13020_v45  ;;  %10654 = vmatprep.subr.msk.mxu0 %vm2046_vm1, %v3577_v57  ;;  %vm14574_vm2 = vmmov %vm14536_vm0  ;;  %v4422_v57 = vmul.f32 %v12978_v31, %v12970_v36 }
 0x1ea   : > { %3356 = vmatprep.mubr.f32.mxu1 %v14520_v17 }
 0x1eb   : > { %10633 = vmatmul.mubr.msk.f32.gmra.mrb[26].mxu0 %vm14561_vm15, %v12983_v48  ;;  %vm14575_vm15 = vmmov %vm14536_vm0 }
 0x1ec   : > { %3457 = vmatprep.mubr.f32.mxu0 %v14520_v17 }
 0x1ed   : > { %10626 = vmatmul.mubr.msk.f32.vlgmr.msra.gmra.mrb[16].mxu1 %vm14562_vm4, %v12962_v4  ;;  %vm14576_vm4 = vmmov %vm14536_vm0 }
 0x1ee   : > { %10637 = vmatpush1.msk.msra.mxu1 %vm2046_vm1, %v12025_v43  ;;  %3362 = vmatprep.mubr.f32.mxu1 %v14520_v17  ;;  %v13140_v43 = vpop.permute.xlu0 %3559 }
 0x1ef   : > { %10648 = vmatprep.subr.msk.mxu1 %vm2046_vm1, %v3576_v38  ;;  %10634 = vmatmul.mubr.msk.f32.gmra.mrb[28].mxu0 %vm14563_vm14, %v13009_v34  ;;  %vm14577_vm14 = vmmov %vm14536_vm0 }
 0x1f0   : > { %3463 = vmatprep.mubr.f32.mxu0 %v14520_v17 }
 0x1f1   : > { %10627 = vmatmul.mubr.msk.f32.gmra.mrb[18].mxu1 %vm14564_vm7, %v12983_v48  ;;  %vm14578_vm7 = vmmov %vm14536_vm0 }
 0x1f2   : > { %3368 = vmatprep.mubr.f32.mxu1 %v14520_v17  ;;  %v13163_v44 = vpop.permute.xlu0 %3563 }
 0x1f3   : > { %10635 = vmatmul.mubr.msk.f32.gmra.mrb[30].mxu0 %vm14565_vm5, %v13020_v45  ;;  %vm14579_vm5 = vmmov %vm14536_vm0 }
 0x1f4   : > { %3687 = vmatprep.mubr.f32.mxu0 %v14520_v17 }
 0x1f5   : > { %10628 = vmatmul.mubr.msk.f32.gmra.mrb[20].mxu1 %vm14566_vm6, %v13009_v34  ;;  %vm14580_vm6 = vmmov %vm14536_vm0 }
 0x1f6   : > { %3374 = vmatprep.mubr.f32.mxu1 %v14520_v17  ;;  %v13294_v55 = vpop.permute.xlu0 %4431 }
 0x1f7   : > { %10644 = vmatmul.mubr.msk.f32.vlgmr.msra.gmra.mrb[0].mxu0 %vm14567_vm12, %v13140_v43  ;;  %vm14581_vm12 = vmmov %vm14536_vm0 }
 0x1f8   : > { %10655 = vmatpush1.msk.msra.mxu0 %vm2046_vm1, %v13102_v47  ;;  %3693 = vmatprep.mubr.f32.mxu0 %v14520_v17 }
 0x1f9   : > { %10629 = vmatmul.mubr.msk.f32.gmra.mrb[22].mxu1 %vm14568_vm3, %v13020_v45  ;;  %10666 = vmatprep.subr.msk.mxu0 %vm2046_vm1, %v3579_v29  ;;  %vm14582_vm3 = vmmov %vm14536_vm0 }
 0x1fa   : > { %3534 = vmatprep.mubr.f32.mxu1 %v14520_v17 }
 0x1fb   : > { %10645 = vmatmul.mubr.msk.f32.gmra.mrb[2].mxu0 %vm14569_vm8, %v13149_v33  ;;  %vm14583_vm8 = vmmov %vm14536_vm0 }
 0x1fc   : > { %3699 = vmatprep.mubr.f32.mxu0 %v14520_v17 }
 0x1fd   : > { %10638 = vmatmul.mubr.msk.f32.vlgmr.msra.gmra.mrb[24].mxu1 %vm14570_vm9, %v12962_v4  ;;  %vm14584_vm9 = vmmov %vm14536_vm0  ;;  %v13303_v4 = vpop.permute.xlu1 %4433 }
 0x1fe   : > { %10649 = vmatpush1.msk.msra.mxu1 %vm2046_vm1, %v12360_v50  ;;  %3540 = vmatprep.mubr.f32.mxu1 %v14520_v17  ;;  %v3581_v50 = vcombine.high %v12917_v52, %v12917_v52 }
 0x1ff   : > { %10660 = vmatprep.subr.msk.mxu1 %vm2046_vm1, %v3578_v59  ;;  %10646 = vmatmul.mubr.msk.f32.gmra.mrb[4].mxu0 %vm14571_vm10, %v13163_v44  ;;  %vm14585_vm10 = vmmov %vm14536_vm0 }
 0x200   : > { %3705 = vmatprep.mubr.f32.mxu0 %v14520_v17 }
 0x201   : > { %10639 = vmatmul.mubr.msk.f32.gmra.mrb[26].mxu1 %vm14572_vm11, %v12983_v48  ;;  %vm14586_vm11 = vmmov %vm14536_vm0  ;;  %v13329_v20 = vpop.permute.xlu1 %4437  ;;  %v4415_v48 = vmul.f32 %v12303_v0, %v12289_v60  ;;  %v4454_v0 = vcombine.high %v12993_v12, %v12993_v12 }
 0x202   : > { %3546 = vmatprep.mubr.f32.mxu1 %v14520_v17 }
 0x203   : > { %10647 = vmatmul.mubr.msk.f32.gmra.mrb[6].mxu0 %vm14573_vm13, %v13171_v5  ;;  %vm14587_vm13 = vmmov %vm14536_vm0  ;;  %v13371_v63 = vsub.f32 1.0, %v4415_v48  ;;  %v6127_v48 = vmul.f32 %v13535_v9, %v12317_v1 }
 0x204   : > { %3865 = vmatprep.mubr.f32.mxu0 %v14520_v17 }
 0x205   : > { %10640 = vmatmul.mubr.msk.f32.gmra.mrb[28].mxu1 %vm14536_vm0, %v13009_v34  ;;  %v5287_v60 = vcombine.high %v13371_v63, %v13371_v63  ;;  %v13411_v34 = vsub.f32 1.0, %v4417_v51  ;;  %v13469_v27 = vpop.permute.xlu1 %5273 }
 0x206   : > { %3552 = vmatprep.mubr.f32.mxu1 %v14520_v17 }
 0x207   : > { %10656 = vmatmul.mubr.msk.f32.vlgmr.msra.gmra.mrb[8].mxu0 %vm14574_vm2, %v13140_v43  ;;  %vm14588_vm2 = vmmov %vm14536_vm0  ;;  %v5289_v3 = vcombine.high %v13411_v34, %v13411_v34 }
 0x208   : > { %10667 = vmatpush1.msk.msra.mxu0 %vm2046_vm1, %v12878_v18  ;;  %3871 = vmatprep.mubr.f32.mxu0 %v14520_v17  ;;  %v3580_v18 = vcombine.high %v12901_v8, %v12901_v8 }
 0x209   : > { %10641 = vmatmul.mubr.msk.f32.gmra.mrb[30].mxu1 %vm14575_vm15, %v13020_v45  ;;  %10678 = vmatprep.subr.msk.mxu0 %vm2046_vm1, %v3581_v50  ;;  %vm14589_vm15 = vmmov %vm14536_vm0  ;;  %v4416_v45 = vmul.f32 %v12368_v35, %v12356_v7  ;;  %v4419_v35 = vmul.f32 %v12860_v58, %v12761_v21  ;;  %v4418_v21 = vmul.f32 %v13290_v26, %v12615_v22  ;;  %v13495_v24 = vpop.permute.xlu1 %5277  ;;  %v13631_v50 = vmul.f32 2.0, %v12886_v15 }
 0x20a   : > { %3776 = vmatprep.mubr.f32.mxu1 %v14520_v17 }
 0x20b   : > { %10657 = vmatmul.mubr.msk.f32.gmra.mrb[10].mxu0 %vm14576_vm4, %v13149_v33  ;;  %vm14590_vm4 = vmmov %vm14536_vm0  ;;  %v13426_v30 = vsub.f32 1.0, %v4416_v45  ;;  %v13453_v40 = vsub.f32 1.0, %v4419_v35  ;;  %v13474_v22 = vsub.f32 1.0, %v4418_v21 }
 0x20c   : > { %3877 = vmatprep.mubr.f32.mxu0 %v14520_v17 }
 0x20d   : > { %10650 = vmatmul.mubr.msk.f32.vlgmr.msra.gmra.mrb[0].mxu1 %vm14577_vm14, %v13140_v43  ;;  %vm14591_vm14 = vmmov %vm14536_vm0  ;;  %v5288_v7 = vcombine.high %v13426_v30, %v13426_v30  ;;  %v5291_v39 = vcombine.high %v13453_v40, %v13453_v40  ;;  %v5290_v42 = vcombine.high %v13474_v22, %v13474_v22 }
 0x20e   : > { %10661 = vmatpush1.msk.msra.mxu1 %vm2046_vm1, %v12856_v2  ;;  %3782 = vmatprep.mubr.f32.mxu1 %v14520_v17  ;;  %v13321_v2 = vpop.permute.xlu0 %4435 }
 0x20f   : > { %10672 = vmatprep.subr.msk.mxu1 %vm2046_vm1, %v3580_v18  ;;  %10658 = vmatmul.mubr.msk.f32.gmra.mrb[12].mxu0 %vm14578_vm7, %v13163_v44  ;;  %vm14592_vm7 = vmmov %vm14536_vm0  ;;  %v13641_v18 = vmul.f32 %v13631_v50, %v13453_v40 }
 0x210   : > { %3883 = vmatprep.mubr.f32.mxu0 %v14520_v17 }
 0x211   : > { %10651 = vmatmul.mubr.msk.f32.gmra.mrb[2].mxu1 %vm14579_vm5, %v13149_v33  ;;  %vm14593_vm5 = vmmov %vm14536_vm0 }
 0x212   : > { %3788 = vmatprep.mubr.f32.mxu1 %v14520_v17  ;;  %v13460_v58 = vpop.permute.xlu0 %5271 }
 0x213   : > { %10659 = vmatmul.mubr.msk.f32.gmra.mrb[14].mxu0 %vm14580_vm6, %v13171_v5  ;;  %vm14594_vm6 = vmmov %vm14536_vm0 }
 0x214   : > { %4043 = vmatprep.mubr.f32.mxu0 %v14520_v17 }
 0x215   : > { %10652 = vmatmul.mubr.msk.f32.gmra.mrb[4].mxu1 %vm14581_vm12, %v13163_v44  ;;  %vm14595_vm12 = vmmov %vm14536_vm0 }
 0x216   : > { %3794 = vmatprep.mubr.f32.mxu1 %v14520_v17  ;;  %v13485_v61 = vpop.permute.xlu0 %5275 }
 0x217   : > { %10668 = vmatmul.mubr.msk.f32.vlgmr.msra.gmra.mrb[16].mxu0 %vm14582_vm3, %v13140_v43  ;;  %vm14596_vm3 = vmmov %vm14536_vm0 }
 0x218   : > { %10679 = vmatpush1.msk.msra.mxu0 %vm2046_vm1, %v12917_v52  ;;  %4049 = vmatprep.mubr.f32.mxu0 %v14520_v17  ;;  %v3582_v52 = vcombine.high %v12973_v28, %v12973_v28 }
 0x219   : > { %10653 = vmatmul.mubr.msk.f32.gmra.mrb[6].mxu1 %vm14583_vm8, %v13171_v5  ;;  %10690 = vmatprep.subr.msk.mxu0 %vm2046_vm1, %v4447_v14  ;;  %vm14597_vm8 = vmmov %vm14536_vm0  ;;  %v13647_v14 = vmul.f32 2.0, %v13308_v49 }
 0x21a   : > { %3954 = vmatprep.mubr.f32.mxu1 %v14520_v17 }
 0x21b   : > { %10669 = vmatmul.mubr.msk.f32.gmra.mrb[18].mxu0 %vm14584_vm9, %v13149_v33  ;;  %vm14598_vm9 = vmmov %vm14536_vm0 }
 0x21c   : > { %4055 = vmatprep.mubr.f32.mxu0 %v14520_v17 }
 0x21d   : > { %10662 = vmatmul.mubr.msk.f32.vlgmr.msra.gmra.mrb[8].mxu1 %vm14585_vm10, %v13140_v43  ;;  %vm14599_vm10 = vmmov %vm14536_vm0 }
 0x21e   : > { %10673 = vmatpush1.msk.msra.mxu1 %vm2046_vm1, %v12901_v8  ;;  %3960 = vmatprep.mubr.f32.mxu1 %v14520_v17  ;;  %v13250_v8 = vmul.f32 %v13239_v13, %v13102_v47  ;;  %v13546_v47 = vmul.f32 %v13535_v9, %v13371_v63  ;;  %v6163_v13 = vcombine.high %v13641_v18, %v13641_v18 }
 0x21f   : > { %10684 = vmatprep.subr.msk.mxu1 %vm2046_vm1, %v3582_v52  ;;  %10670 = vmatmul.mubr.msk.f32.gmra.mrb[20].mxu0 %vm14586_vm11, %v13163_v44  ;;  %vm14600_vm11 = vmmov %vm14536_vm0  ;;  %v13649_v52 = vpop.permute.xlu0 %6143 }
 0x220   : > { %4061 = vmatprep.mubr.f32.mxu0 %v14520_v17  ;;  %v4449_v23 = vcombine.high %v13250_v8, %v13250_v8  ;;  %v6159_v38 = vcombine.high %v13546_v47, %v13546_v47  ;;  %v13583_v31 = vmul.f32 2.0, %v13250_v8 }
 0x221   : > { %10663 = vmatmul.mubr.msk.f32.gmra.mrb[10].mxu1 %vm14587_vm13, %v13149_v33  ;;  %vm14601_vm13 = vmmov %vm14536_vm0 }
 0x222   : > { %3966 = vmatprep.mubr.f32.mxu1 %v14520_v17  ;;  %v13593_v29 = vmul.f32 %v13583_v31, %v13411_v34 }
 0x223   : > { %10671 = vmatmul.mubr.msk.f32.gmra.mrb[22].mxu0 %vm14536_vm0, %v13171_v5 }
 0x224   : > { %4221 = vmatprep.mubr.f32.mxu0 %v14520_v17  ;;  %v6161_v59 = vcombine.high %v13593_v29, %v13593_v29  ;;  %v13955_v9 = vmul.f32 2.0, %v13593_v29 }
 0x225   : > { %10664 = vmatmul.mubr.msk.f32.gmra.mrb[12].mxu1 %vm14588_vm2, %v13163_v44  ;;  %vm14602_vm2 = vmmov %vm14536_vm0 }
 0x226   : > { %3972 = vmatprep.mubr.f32.mxu1 %v14520_v17 }
 0x227   : > { %10680 = vmatmul.mubr.msk.f32.vlgmr.msra.gmra.mrb[24].mxu0 %vm14589_vm15, %v13140_v43  ;;  %vm14603_vm15 = vmmov %vm14536_vm0 }
 0x228   : > { %10691 = vmatpush1.msk.msra.mxu0 %vm2046_vm1, %v12317_v1  ;;  %4227 = vmatprep.mubr.f32.mxu0 %v14520_v17 }
 0x229   : > { %10665 = vmatmul.mubr.msk.f32.gmra.mrb[14].mxu1 %vm14590_vm4, %v13171_v5  ;;  %10702 = vmatprep.subr.msk.mxu0 %vm2046_vm1, %v4449_v23  ;;  %vm14604_vm4 = vmmov %vm14536_vm0  ;;  %v13658_v23 = vpop.permute.xlu1 %6145 }
 0x22a   : > { %4132 = vmatprep.mubr.f32.mxu1 %v14520_v17 }
 0x22b   : > { %10681 = vmatmul.mubr.msk.f32.gmra.mrb[26].mxu0 %vm14591_vm14, %v13149_v33  ;;  %vm14605_vm14 = vmmov %vm14536_vm0 }
 0x22c   : > { %4233 = vmatprep.mubr.f32.mxu0 %v14520_v17 }
 0x22d   : > { %10674 = vmatmul.mubr.msk.f32.vlgmr.msra.gmra.mrb[16].mxu1 %vm14592_vm7, %v13140_v43  ;;  %vm14606_vm7 = vmmov %vm14536_vm0 }
 0x22e   : > { %10685 = vmatpush1.msk.msra.mxu1 %vm2046_vm1, %v12973_v28  ;;  %4138 = vmatprep.mubr.f32.mxu1 %v14520_v17  ;;  %v4453_v28 = vcombine.high %v12930_v10, %v12930_v10 }
 0x22f   : > { %10696 = vmatprep.subr.msk.mxu1 %vm2046_vm1, %v4448_v32  ;;  %10682 = vmatmul.mubr.msk.f32.gmra.mrb[28].mxu0 %vm14593_vm5, %v13163_v44  ;;  %vm14607_vm5 = vmmov %vm14536_vm0  ;;  %v13665_v32 = vmul.f32 %v13647_v14, %v13474_v22 }
 0x230   : > { %4239 = vmatprep.mubr.f32.mxu0 %v14520_v17 }
 0x231   : > { %10675 = vmatmul.mubr.msk.f32.gmra.mrb[18].mxu1 %vm14594_vm6, %v13149_v33  ;;  %vm14608_vm6 = vmmov %vm14536_vm0  ;;  %v6162_v26 = vcombine.high %v13665_v32, %v13665_v32 }
 0x232   : > { %4144 = vmatprep.mubr.f32.mxu1 %v14520_v17 }
 0x233   : > { %10683 = vmatmul.mubr.msk.f32.gmra.mrb[30].mxu0 %vm14595_vm12, %v13171_v5  ;;  %vm14609_vm12 = vmmov %vm14536_vm0 }
 0x234   : > { %4559 = vmatprep.mubr.f32.mxu0 %v14520_v17 }
 0x235   : > { %10676 = vmatmul.mubr.msk.f32.gmra.mrb[20].mxu1 %vm14596_vm3, %v13163_v44  ;;  %vm14610_vm3 = vmmov %vm14536_vm0 }
 0x236   : > { %4150 = vmatprep.mubr.f32.mxu1 %v14520_v17 }
 0x237   : > { %10692 = vmatmul.mubr.msk.f32.vlgmr.msra.gmra.mrb[0].mxu0 %vm14597_vm8, %v13294_v55  ;;  %vm14611_vm8 = vmmov %vm14536_vm0 }
 0x238   : > { %10703 = vmatpush1.msk.msra.mxu0 %vm2046_vm1, %v13250_v8  ;;  %4565 = vmatprep.mubr.f32.mxu0 %v14520_v17 }
 0x239   : > { %10677 = vmatmul.mubr.msk.f32.gmra.mrb[22].mxu1 %vm14598_vm9, %v13171_v5  ;;  %10714 = vmatprep.subr.msk.mxu0 %vm2046_vm1, %v4451_v11  ;;  %vm14612_vm9 = vmmov %vm14536_vm0  ;;  %v13685_v11 = vmul.f32 2.0, %v12930_v10 }
 0x23a   : > { %4310 = vmatprep.mubr.f32.mxu1 %v14520_v17 }
 0x23b   : > { %10693 = vmatmul.mubr.msk.f32.gmra.mrb[2].mxu0 %vm14599_vm10, %v13303_v4  ;;  %vm14613_vm10 = vmmov %vm14536_vm0 }
 0x23c   : > { %4571 = vmatprep.mubr.f32.mxu0 %v14520_v17 }
 0x23d   : > { %10686 = vmatmul.mubr.msk.f32.vlgmr.msra.gmra.mrb[24].mxu1 %vm14600_vm11, %v13140_v43  ;;  %vm14614_vm11 = vmmov %vm14536_vm0  ;;  %v13565_v43 = vsub.f32 1.0, %v4422_v57 }
 0x23e   : > { %10697 = vmatpush1.msk.msra.mxu1 %vm2046_vm1, %v12379_v56  ;;  %4316 = vmatprep.mubr.f32.mxu1 %v14520_v17 }
 0x23f   : > { %10708 = vmatprep.subr.msk.mxu1 %vm2046_vm1, %v4450_v62  ;;  %10694 = vmatmul.mubr.msk.f32.gmra.mrb[4].mxu0 %vm14601_vm13, %v13321_v2  ;;  %vm14615_vm13 = vmmov %vm14536_vm0  ;;  %v5294_v36 = vcombine.high %v13565_v43, %v13565_v43  ;;  %v13697_v62 = vmul.f32 %v13685_v11, %v13503_v19 }
 0x240   : > { %4577 = vmatprep.mubr.f32.mxu0 %v14520_v17 }
 0x241   : > { %10687 = vmatmul.mubr.msk.f32.gmra.mrb[26].mxu1 %vm14536_vm0, %v13149_v33  ;;  %v13597_v33 = vmul.f32 2.0, %v12379_v56 }
 0x242   : > { %4322 = vmatprep.mubr.f32.mxu1 %v14520_v17 }
 0x243   : > { %10695 = vmatmul.mubr.msk.f32.gmra.mrb[6].mxu0 %vm14602_vm2, %v13329_v20  ;;  %vm14616_vm2 = vmmov %vm14536_vm0 }
 0x244   : > { %4737 = vmatprep.mubr.f32.mxu0 %v14520_v17 }
 0x245   : > { %10688 = vmatmul.mubr.msk.f32.gmra.mrb[28].mxu1 %vm14603_vm15, %v13163_v44  ;;  %vm14617_vm15 = vmmov %vm14536_vm0  ;;  %v13611_v44 = vmul.f32 %v13597_v33, %v13426_v30 }
 0x246   : > { %4328 = vmatprep.mubr.f32.mxu1 %v14520_v17 }
 0x247   : > { %10704 = vmatmul.mubr.msk.f32.vlgmr.msra.gmra.mrb[8].mxu0 %vm14604_vm4, %v13294_v55  ;;  %vm14618_vm4 = vmmov %vm14536_vm0 }
 0x248   : > { %10715 = vmatpush1.msk.msra.mxu0 %vm2046_vm1, %v12886_v15  ;;  %4743 = vmatprep.mubr.f32.mxu0 %v14520_v17 }
 0x249   : > { %10689 = vmatmul.mubr.msk.f32.gmra.mrb[30].mxu1 %vm14605_vm14, %v13171_v5  ;;  %10726 = vmatprep.subr.msk.mxu0 %vm2046_vm1, %v4453_v28  ;;  %vm14619_vm14 = vmmov %vm14536_vm0  ;;  %v6160_v5 = vcombine.high %v13611_v44, %v13611_v44 }
 0x24a   : > { %4648 = vmatprep.mubr.f32.mxu1 %v14520_v17 }
 0x24b   : > { %10705 = vmatmul.mubr.msk.f32.gmra.mrb[10].mxu0 %vm14606_vm7, %v13303_v4  ;;  %vm14620_vm7 = vmmov %vm14536_vm0 }
 0x24c   : > { %4749 = vmatprep.mubr.f32.mxu0 %v14520_v17 }
 0x24d   : > { %10698 = vmatmul.mubr.msk.f32.vlgmr.msra.gmra.mrb[0].mxu1 %vm14607_vm5, %v13294_v55  ;;  %vm14621_vm5 = vmmov %vm14536_vm0 }
 0x24e   : > { %10709 = vmatpush1.msk.msra.mxu1 %vm2046_vm1, %v13308_v49  ;;  %4654 = vmatprep.mubr.f32.mxu1 %v14520_v17 }
 0x24f   : > { %10720 = vmatprep.subr.msk.mxu1 %vm2046_vm1, %v4452_v25  ;;  %10706 = vmatmul.mubr.msk.f32.gmra.mrb[12].mxu0 %vm14608_vm6, %v13321_v2  ;;  %vm14622_vm6 = vmmov %vm14536_vm0 }
 0x250   : > { %4755 = vmatprep.mubr.f32.mxu0 %v14520_v17 }
 0x251   : > { %10699 = vmatmul.mubr.msk.f32.gmra.mrb[2].mxu1 %vm14609_vm12, %v13303_v4  ;;  %vm14623_vm12 = vmmov %vm14536_vm0 }
 0x252   : > { %4660 = vmatprep.mubr.f32.mxu1 %v14520_v17 }
 0x253   : > { %10707 = vmatmul.mubr.msk.f32.gmra.mrb[14].mxu0 %vm14610_vm3, %v13329_v20  ;;  %vm14624_vm3 = vmmov %vm14536_vm0 }
 0x254   : > { %4915 = vmatprep.mubr.f32.mxu0 %v14520_v17 }
 0x255   : > { %10700 = vmatmul.mubr.msk.f32.gmra.mrb[4].mxu1 %vm14611_vm8, %v13321_v2  ;;  %vm14625_vm8 = vmmov %vm14536_vm0 }
 0x256   : > { %4666 = vmatprep.mubr.f32.mxu1 %v14520_v17 }
 0x257   : > { %10716 = vmatmul.mubr.msk.f32.vlgmr.msra.gmra.mrb[16].mxu0 %vm14612_vm9, %v13294_v55  ;;  %vm14626_vm9 = vmmov %vm14536_vm0 }
 0x258   : > { %10727 = vmatpush1.msk.msra.mxu0 %vm2046_vm1, %v12930_v10  ;;  %4921 = vmatprep.mubr.f32.mxu0 %v14520_v17 }
 0x259   : > { %10701 = vmatmul.mubr.msk.f32.gmra.mrb[6].mxu1 %vm14613_vm10, %v13329_v20  ;;  %10738 = vmatprep.subr.msk.mxu0 %vm2046_vm1, %v5287_v60  ;;  %vm14627_vm10 = vmmov %vm14536_vm0  ;;  %v13748_v60 = vmul.f32 2.0, %v12993_v12 }
 0x25a   : > { %4826 = vmatprep.mubr.f32.mxu1 %v14520_v17 }
 0x25b   : > { %10717 = vmatmul.mubr.msk.f32.gmra.mrb[18].mxu0 %vm14614_vm11, %v13303_v4  ;;  %vm14628_vm11 = vmmov %vm14536_vm0 }
 0x25c   : > { %4927 = vmatprep.mubr.f32.mxu0 %v14520_v17 }
 0x25d   : > { %10710 = vmatmul.mubr.msk.f32.vlgmr.msra.gmra.mrb[8].mxu1 %vm14615_vm13, %v13294_v55  ;;  %vm14629_vm13 = vmmov %vm14536_vm0 }
 0x25e   : > { %10721 = vmatpush1.msk.msra.mxu1 %vm2046_vm1, %v12906_v37  ;;  %4832 = vmatprep.mubr.f32.mxu1 %v14520_v17 }
 0x25f   : > { %10732 = vmatprep.subr.msk.mxu1 %vm2046_vm1, %v4454_v0  ;;  %10718 = vmatmul.mubr.msk.f32.gmra.mrb[20].mxu0 %vm14536_vm0, %v13321_v2  ;;  %v13762_v0 = vmul.f32 %v13748_v60, %v13565_v43 }
 0x260   : > { %4933 = vmatprep.mubr.f32.mxu0 %v14520_v17 }
 0x261   : > { %10711 = vmatmul.mubr.msk.f32.gmra.mrb[10].mxu1 %vm14616_vm2, %v13303_v4  ;;  %vm14630_vm2 = vmmov %vm14536_vm0  ;;  %v6166_v51 = vcombine.high %v13762_v0, %v13762_v0 }
 0x262   : > { %4838 = vmatprep.mubr.f32.mxu1 %v14520_v17 }
 0x263   : > { %10719 = vmatmul.mubr.msk.f32.gmra.mrb[22].mxu0 %vm14617_vm15, %v13329_v20  ;;  %vm14631_vm15 = vmmov %vm14536_vm0 }
 0x264   : > { %5093 = vmatprep.mubr.f32.mxu0 %v14520_v17 }
 0x265   : > { %10712 = vmatmul.mubr.msk.f32.gmra.mrb[12].mxu1 %vm14618_vm4, %v13321_v2  ;;  %vm14632_vm4 = vmmov %vm14536_vm0 }
 0x266   : > { %4844 = vmatprep.mubr.f32.mxu1 %v14520_v17 }
 0x267   : > { %10728 = vmatmul.mubr.msk.f32.vlgmr.msra.gmra.mrb[24].mxu0 %vm14619_vm14, %v13294_v55  ;;  %vm14633_vm14 = vmmov %vm14536_vm0 }
 0x268   : > { %10739 = vmatpush1.msk.msra.mxu0 %vm2046_vm1, %v13371_v63  ;;  %5099 = vmatprep.mubr.f32.mxu0 %v14520_v17  ;;  %v13742_v63 = vsub.f32 1.0, %v6127_v48  ;;  %v9536_v48 = vld [vmem:[%s14454_s4 + $0x8] sm:$0xff] }
 0x269   : > { %10713 = vmatmul.mubr.msk.f32.gmra.mrb[14].mxu1 %vm14620_vm7, %v13329_v20  ;;  %10750 = vmatprep.subr.msk.mxu0 %vm2046_vm1, %v5289_v3  ;;  %vm14634_vm7 = vmmov %vm14536_vm0 }
 0x26a   : > { %5004 = vmatprep.mubr.f32.mxu1 %v14520_v17  ;;  %v6999_v1 = vcombine.high %v13742_v63, %v13742_v63  ;;  %9546 = vperm.xlu1 %11666, %v9536_v48  }
 0x26b   : > { %10729 = vmatmul.mubr.msk.f32.gmra.mrb[26].mxu0 %vm14621_vm5, %v13303_v4  ;;  %vm14635_vm5 = vmmov %vm14536_vm0 }
 0x26c   : > { %5105 = vmatprep.mubr.f32.mxu0 %v14520_v17 }
 0x26d   : > { %10722 = vmatmul.mubr.msk.f32.vlgmr.msra.gmra.mrb[16].mxu1 %vm14622_vm6, %v13294_v55  ;;  %vm14636_vm6 = vmmov %vm14536_vm0 }
 0x26e   : > { %10733 = vmatpush1.msk.msra.mxu1 %vm2046_vm1, %v12993_v12  ;;  %5010 = vmatprep.mubr.f32.mxu1 %v14520_v17 }
 0x26f   : > { %10744 = vmatprep.subr.msk.mxu1 %vm2046_vm1, %v5288_v7  ;;  %10730 = vmatmul.mubr.msk.f32.gmra.mrb[28].mxu0 %vm14623_vm12, %v13321_v2  ;;  %vm14637_vm12 = vmmov %vm14536_vm0  ;;  %v6131_v7 = vmul.f32 %v13631_v50, %v12886_v15  ;;  %v6130_v15 = vmul.f32 %v13647_v14, %v13308_v49 }
 0x270   : > { %5111 = vmatprep.mubr.f32.mxu0 %v14520_v17 }
 0x271   : > { %10723 = vmatmul.mubr.msk.f32.gmra.mrb[18].mxu1 %vm14624_vm3, %v13303_v4  ;;  %vm14638_vm3 = vmmov %vm14536_vm0  ;;  %v13829_v35 = vsub.f32 1.0, %v6131_v7  ;;  %v13850_v49 = vsub.f32 1.0, %v6130_v15 }
 0x272   : > { %5016 = vmatprep.mubr.f32.mxu1 %v14520_v17 }
 0x273   : > { %10731 = vmatmul.mubr.msk.f32.gmra.mrb[30].mxu0 %vm14625_vm8, %v13329_v20  ;;  %vm14639_vm8 = vmmov %vm14536_vm0  ;;  %v7003_v21 = vcombine.high %v13829_v35, %v13829_v35 }
 0x274   : > { %5399 = vmatprep.mubr.f32.mxu0 %v14520_v17 }
 0x275   : > { %10724 = vmatmul.mubr.msk.f32.gmra.mrb[20].mxu1 %vm14626_vm9, %v13321_v2  ;;  %vm14640_vm9 = vmmov %vm14536_vm0 }
 0x276   : > { %5022 = vmatprep.mubr.f32.mxu1 %v14520_v17 }
 0x277   : > { %10740 = vmatmul.mubr.msk.f32.vlgmr.msra.gmra.mrb[0].mxu0 %vm14627_vm10, %v13460_v58  ;;  %vm14641_vm10 = vmmov %vm14536_vm0 }
 0x278   : > { %10751 = vmatpush1.msk.msra.mxu0 %vm2046_vm1, %v13411_v34  ;;  %5405 = vmatprep.mubr.f32.mxu0 %v14520_v17  ;;  %v6129_v34 = vmul.f32 %v13583_v31, %v13250_v8  ;;  %v6128_v8 = vmul.f32 %v13597_v33, %v12379_v56  ;;  %v13994_v33 = vmul.f32 2.0, %v13641_v18 }
 0x279   : > { %10725 = vmatmul.mubr.msk.f32.gmra.mrb[22].mxu1 %vm14628_vm11, %v13329_v20  ;;  %10762 = vmatprep.subr.msk.mxu0 %vm2046_vm1, %v5291_v39  ;;  %vm14642_vm11 = vmmov %vm14536_vm0  ;;  %v7002_v39 = vcombine.high %v13850_v49, %v13850_v49 }
 0x27a   : > { %5182 = vmatprep.mubr.f32.mxu1 %v14520_v17  ;;  %v13787_v45 = vsub.f32 1.0, %v6129_v34  ;;  %v14095_v34 = vmul.f32 2.0, %v13762_v0 }
 0x27b   : > { %10741 = vmatmul.mubr.msk.f32.gmra.mrb[2].mxu0 %vm14629_vm13, %v13469_v27  ;;  %vm14643_vm13 = vmmov %vm14536_vm0 }
 0x27c   : > { %5411 = vmatprep.mubr.f32.mxu0 %v14520_v17  ;;  %v7001_v3 = vcombine.high %v13787_v45, %v13787_v45  ;;  %v7833_v57 = vmul.f32 %v13955_v9, %v13787_v45 }
 0x27d   : > { %10734 = vmatmul.mubr.msk.f32.vlgmr.msra.gmra.mrb[24].mxu1 %vm14536_vm0, %v13294_v55  ;;  %v13676_v55 = vpop.permute.xlu0 %6147 }
 0x27e   : > { %10745 = vmatpush1.msk.msra.mxu1 %vm2046_vm1, %v13426_v30  ;;  %5188 = vmatprep.mubr.f32.mxu1 %v14520_v17  ;;  %v13804_v30 = vsub.f32 1.0, %v6128_v8 }
 0x27f   : > { %10756 = vmatprep.subr.msk.mxu1 %vm2046_vm1, %v5290_v42  ;;  %10742 = vmatmul.mubr.msk.f32.gmra.mrb[4].mxu0 %vm14630_vm2, %v13485_v61  ;;  %vm14644_vm2 = vmmov %vm14536_vm0 }
 0x280   : > { %5417 = vmatprep.mubr.f32.mxu0 %v14520_v17  ;;  %v7000_v56 = vcombine.high %v13804_v30, %v13804_v30 }
 0x281   : > { %10735 = vmatmul.mubr.msk.f32.gmra.mrb[26].mxu1 %vm14631_vm15, %v13303_v4  ;;  %vm14645_vm15 = vmmov %vm14536_vm0  ;;  %v13687_v4 = vpop.permute.xlu1 %6149 }
 0x282   : > { %5194 = vmatprep.mubr.f32.mxu1 %v14520_v17 }
 0x283   : > { %10743 = vmatmul.mubr.msk.f32.gmra.mrb[6].mxu0 %vm14632_vm4, %v13495_v24  ;;  %vm14646_vm4 = vmmov %vm14536_vm0 }
 0x284   : > { %5577 = vmatprep.mubr.f32.mxu0 %v14520_v17 }
 0x285   : > { %10736 = vmatmul.mubr.msk.f32.gmra.mrb[28].mxu1 %vm14633_vm14, %v13321_v2  ;;  %vm14647_vm14 = vmmov %vm14536_vm0  ;;  %v13703_v2 = vmul.f32 2.0, %v12906_v37 }
 0x286   : > { %5200 = vmatprep.mubr.f32.mxu1 %v14520_v17 }
 0x287   : > { %10752 = vmatmul.mubr.msk.f32.vlgmr.msra.gmra.mrb[8].mxu0 %vm14634_vm7, %v13460_v58  ;;  %vm14648_vm7 = vmmov %vm14536_vm0  ;;  %v13717_v28 = vmul.f32 %v13703_v2, %v13520_v41 }
 0x288   : > { %10763 = vmatpush1.msk.msra.mxu0 %vm2046_vm1, %v13453_v40  ;;  %5583 = vmatprep.mubr.f32.mxu0 %v14520_v17  ;;  %v13836_v40 = vpop.permute.xlu0 %6983 }
 0x289   : > { %10737 = vmatmul.mubr.msk.f32.gmra.mrb[30].mxu1 %vm14635_vm5, %v13329_v20  ;;  %10774 = vmatprep.subr.msk.mxu0 %vm2046_vm1, %v5293_v54  ;;  %vm14649_vm5 = vmmov %vm14536_vm0  ;;  %v6165_v20 = vcombine.high %v13697_v62, %v13697_v62  ;;  %v6164_v25 = vcombine.high %v13717_v28, %v13717_v28  ;;  %v6134_v54 = vmul.f32 %v13748_v60, %v12993_v12  ;;  %v9538_v60 = vld [vmem:[%s14454_s4 + $0x18] sm:$0xff] }
 0x28a   : > { %5488 = vmatprep.mubr.f32.mxu1 %v14520_v17  ;;  %9556 = vperm.xlu1 %11666, %v9538_v60  }
 0x28b   : > { %10753 = vmatmul.mubr.msk.f32.gmra.mrb[10].mxu0 %vm14636_vm6, %v13469_v27  ;;  %vm14650_vm6 = vmmov %vm14536_vm0 }
 0x28c   : > { %5589 = vmatprep.mubr.f32.mxu0 %v14520_v17 }
 0x28d   : > { %10746 = vmatmul.mubr.msk.f32.vlgmr.msra.gmra.mrb[0].mxu1 %vm14637_vm12, %v13460_v58  ;;  %vm14651_vm12 = vmmov %vm14536_vm0 }
 0x28e   : > { %10757 = vmatpush1.msk.msra.mxu1 %vm2046_vm1, %v13474_v22  ;;  %5494 = vmatprep.mubr.f32.mxu1 %v14520_v17  ;;  %v6133_v22 = vmul.f32 %v13685_v11, %v12930_v10  ;;  %v6132_v10 = vmul.f32 %v13703_v2, %v12906_v37  ;;  %v14054_v2 = vmul.f32 2.0, %v13717_v28 }
 0x28f   : > { %10768 = vmatprep.subr.msk.mxu1 %vm2046_vm1, %v5292_v46  ;;  %10754 = vmatmul.mubr.msk.f32.gmra.mrb[12].mxu0 %vm14638_vm3, %v13485_v61  ;;  %vm14652_vm3 = vmmov %vm14536_vm0  ;;  %v13937_v46 = vsub.f32 1.0, %v6134_v54 }
 0x290   : > { %5595 = vmatprep.mubr.f32.mxu0 %v14520_v17 }
 0x291   : > { %10747 = vmatmul.mubr.msk.f32.gmra.mrb[2].mxu1 %vm14639_vm8, %v13469_v27  ;;  %vm14653_vm8 = vmmov %vm14536_vm0  ;;  %v7006_v12 = vcombine.high %v13937_v46, %v13937_v46 }
 0x292   : > { %5500 = vmatprep.mubr.f32.mxu1 %v14520_v17 }
 0x293   : > { %10755 = vmatmul.mubr.msk.f32.gmra.mrb[14].mxu0 %vm14640_vm9, %v13495_v24  ;;  %vm14654_vm9 = vmmov %vm14536_vm0 }
 0x294   : > { %5755 = vmatprep.mubr.f32.mxu0 %v14520_v17 }
 0x295   : > { %10748 = vmatmul.mubr.msk.f32.gmra.mrb[4].mxu1 %vm14641_vm10, %v13485_v61  ;;  %vm14655_vm10 = vmmov %vm14536_vm0 }
 0x296   : > { %5506 = vmatprep.mubr.f32.mxu1 %v14520_v17 }
 0x297   : > { %10764 = vmatmul.mubr.msk.f32.vlgmr.msra.gmra.mrb[16].mxu0 %vm14642_vm11, %v13460_v58  ;;  %vm14656_vm11 = vmmov %vm14536_vm0 }
 0x298   : > { %10775 = vmatpush1.msk.msra.mxu0 %vm2046_vm1, %v13503_v19  ;;  %5761 = vmatprep.mubr.f32.mxu0 %v14520_v17  ;;  %v13914_v19 = vmul.f32 2.0, %v13546_v47 }
 0x299   : > { %10749 = vmatmul.mubr.msk.f32.gmra.mrb[6].mxu1 %vm14643_vm13, %v13495_v24  ;;  %10786 = vmatprep.subr.msk.mxu0 %vm2046_vm1, %v6159_v38  ;;  %vm14657_vm13 = vmmov %vm14536_vm0  ;;  %v13969_v38 = vmul.f32 2.0, %v13611_v44 }
 0x29a   : > { %5666 = vmatprep.mubr.f32.mxu1 %v14520_v17  ;;  %v7831_v6 = vmul.f32 %v13914_v19, %v13742_v63 }
 0x29b   : > { %10765 = vmatmul.mubr.msk.f32.gmra.mrb[18].mxu0 %vm14536_vm0, %v13469_v27 }
 0x29c   : > { %5767 = vmatprep.mubr.f32.mxu0 %v14520_v17 }
 0x29d   : > { %10758 = vmatmul.mubr.msk.f32.vlgmr.msra.gmra.mrb[8].mxu1 %vm14644_vm2, %v13460_v58  ;;  %vm14658_vm2 = vmmov %vm14536_vm0 }
 0x29e   : > { %10769 = vmatpush1.msk.msra.mxu1 %vm2046_vm1, %v13520_v41  ;;  %5672 = vmatprep.mubr.f32.mxu1 %v14520_v17  ;;  %v7871_v41 = vcombine.high %v7831_v6, %v7831_v6 }
 0x29f   : > { %10780 = vmatprep.subr.msk.mxu1 %vm2046_vm1, %v5294_v36  ;;  %10766 = vmatmul.mubr.msk.f32.gmra.mrb[20].mxu0 %vm14645_vm15, %v13485_v61  ;;  %vm14659_vm15 = vmmov %vm14536_vm0  ;;  %v7832_v36 = vmul.f32 %v13969_v38, %v13804_v30 }
 0x2a0   : > { %5773 = vmatprep.mubr.f32.mxu0 %v14520_v17 }
 0x2a1   : > { %10759 = vmatmul.mubr.msk.f32.gmra.mrb[10].mxu1 %vm14646_vm4, %v13469_v27  ;;  %vm14660_vm4 = vmmov %vm14536_vm0  ;;  %v7872_v31 = vcombine.high %v7832_v36, %v7832_v36 }
 0x2a2   : > { %5678 = vmatprep.mubr.f32.mxu1 %v14520_v17 }
 0x2a3   : > { %10767 = vmatmul.mubr.msk.f32.gmra.mrb[22].mxu0 %vm14647_vm14, %v13495_v24  ;;  %vm14661_vm14 = vmmov %vm14536_vm0 }
 0x2a4   : > { %5933 = vmatprep.mubr.f32.mxu0 %v14520_v17 }
 0x2a5   : > { %10760 = vmatmul.mubr.msk.f32.gmra.mrb[12].mxu1 %vm14648_vm7, %v13485_v61  ;;  %vm14662_vm7 = vmmov %vm14536_vm0 }
 0x2a6   : > { %5684 = vmatprep.mubr.f32.mxu1 %v14520_v17 }
 0x2a7   : > { %10776 = vmatmul.mubr.msk.f32.vlgmr.msra.gmra.mrb[24].mxu0 %vm14649_vm5, %v13460_v58  ;;  %vm14663_vm5 = vmmov %vm14536_vm0 }
 0x2a8   : > { %10787 = vmatpush1.msk.msra.mxu0 %vm2046_vm1, %v13546_v47  ;;  %5939 = vmatprep.mubr.f32.mxu0 %v14520_v17 }
 0x2a9   : > { %10761 = vmatmul.mubr.msk.f32.gmra.mrb[14].mxu1 %vm14650_vm6, %v13495_v24  ;;  %10798 = vmatprep.subr.msk.mxu0 %vm2046_vm1, %v6161_v59  ;;  %vm14664_vm6 = vmmov %vm14536_vm0  ;;  %v7835_v59 = vmul.f32 %v13994_v33, %v13829_v35 }
 0x2aa   : > { %5844 = vmatprep.mubr.f32.mxu1 %v14520_v17 }
 0x2ab   : > { %10777 = vmatmul.mubr.msk.f32.gmra.mrb[26].mxu0 %vm14651_vm12, %v13469_v27  ;;  %vm14665_vm12 = vmmov %vm14536_vm0  ;;  %v7875_v14 = vcombine.high %v7835_v59, %v7835_v59 }
 0x2ac   : > { %5945 = vmatprep.mubr.f32.mxu0 %v14520_v17 }
 0x2ad   : > { %10770 = vmatmul.mubr.msk.f32.vlgmr.msra.gmra.mrb[16].mxu1 %vm14652_vm3, %v13460_v58  ;;  %vm14666_vm3 = vmmov %vm14536_vm0 }
 0x2ae   : > { %10781 = vmatpush1.msk.msra.mxu1 %vm2046_vm1, %v13565_v43  ;;  %5850 = vmatprep.mubr.f32.mxu1 %v14520_v17  ;;  %v7873_v43 = vcombine.high %v7833_v57, %v7833_v57 }
 0x2af   : > { %10792 = vmatprep.subr.msk.mxu1 %vm2046_vm1, %v6160_v5  ;;  %10778 = vmatmul.mubr.msk.f32.gmra.mrb[28].mxu0 %vm14653_vm8, %v13485_v61  ;;  %vm14667_vm8 = vmmov %vm14536_vm0  ;;  %v14008_v5 = vmul.f32 2.0, %v13665_v32 }
 0x2b0   : > { %5951 = vmatprep.mubr.f32.mxu0 %v14520_v17 }
 0x2b1   : > { %10771 = vmatmul.mubr.msk.f32.gmra.mrb[18].mxu1 %vm14654_vm9, %v13469_v27  ;;  %vm14668_vm9 = vmmov %vm14536_vm0 }
 0x2b2   : > { %5856 = vmatprep.mubr.f32.mxu1 %v14520_v17 }
 0x2b3   : > { %10779 = vmatmul.mubr.msk.f32.gmra.mrb[30].mxu0 %vm14655_vm10, %v13495_v24  ;;  %vm14669_vm10 = vmmov %vm14536_vm0 }
 0x2b4   : > { %6271 = vmatprep.mubr.f32.mxu0 %v14520_v17 }
 0x2b5   : > { %10772 = vmatmul.mubr.msk.f32.gmra.mrb[20].mxu1 %vm14656_vm11, %v13485_v61  ;;  %vm14670_vm11 = vmmov %vm14536_vm0 }
 0x2b6   : > { %5862 = vmatprep.mubr.f32.mxu1 %v14520_v17 }
 0x2b7   : > { %10788 = vmatmul.mubr.msk.f32.vlgmr.msra.gmra.mrb[0].mxu0 %vm14657_vm13, %v13649_v52  ;;  %vm14671_vm13 = vmmov %vm14536_vm0 }
 0x2b8   : > { %10799 = vmatpush1.msk.msra.mxu0 %vm2046_vm1, %v13593_v29  ;;  %6277 = vmatprep.mubr.f32.mxu0 %v14520_v17 }
 0x2b9   : > { %10773 = vmatmul.mubr.msk.f32.gmra.mrb[22].mxu1 %vm14536_vm0, %v13495_v24  ;;  %10810 = vmatprep.subr.msk.mxu0 %vm2046_vm1, %v6163_v13  ;;  %v7834_v13 = vmul.f32 %v14008_v5, %v13850_v49 }
 0x2ba   : > { %6022 = vmatprep.mubr.f32.mxu1 %v14520_v17 }
 0x2bb   : > { %10789 = vmatmul.mubr.msk.f32.gmra.mrb[2].mxu0 %vm14658_vm2, %v13658_v23  ;;  %vm14672_vm2 = vmmov %vm14536_vm0 }
 0x2bc   : > { %6283 = vmatprep.mubr.f32.mxu0 %v14520_v17 }
 0x2bd   : > { %10782 = vmatmul.mubr.msk.f32.vlgmr.msra.gmra.mrb[24].mxu1 %vm14659_vm15, %v13460_v58  ;;  %vm14673_vm15 = vmmov %vm14536_vm0  ;;  %v13845_v58 = vpop.permute.xlu1 %6985 }
 0x2be   : > { %10793 = vmatpush1.msk.msra.mxu1 %vm2046_vm1, %v13611_v44  ;;  %6028 = vmatprep.mubr.f32.mxu1 %v14520_v17 }
 0x2bf   : > { %10804 = vmatprep.subr.msk.mxu1 %vm2046_vm1, %v6162_v26  ;;  %10790 = vmatmul.mubr.msk.f32.gmra.mrb[4].mxu0 %vm14660_vm4, %v13676_v55  ;;  %vm14674_vm4 = vmmov %vm14536_vm0 }
 0x2c0   : > { %6289 = vmatprep.mubr.f32.mxu0 %v14520_v17 }
 0x2c1   : > { %10783 = vmatmul.mubr.msk.f32.gmra.mrb[26].mxu1 %vm14661_vm14, %v13469_v27  ;;  %vm14675_vm14 = vmmov %vm14536_vm0  ;;  %v13861_v27 = vpop.permute.xlu0 %6987  ;;  %v13871_v42 = vpop.permute.xlu1 %6989 }
 0x2c2   : > { %6034 = vmatprep.mubr.f32.mxu1 %v14520_v17 }
 0x2c3   : > { %10791 = vmatmul.mubr.msk.f32.gmra.mrb[6].mxu0 %vm14662_vm7, %v13687_v4  ;;  %vm14676_vm7 = vmmov %vm14536_vm0 }
 0x2c4   : > { %6449 = vmatprep.mubr.f32.mxu0 %v14520_v17 }
 0x2c5   : > { %10784 = vmatmul.mubr.msk.f32.gmra.mrb[28].mxu1 %vm14663_vm5, %v13485_v61  ;;  %vm14677_vm5 = vmmov %vm14536_vm0  ;;  %v13879_v61 = vsub.f32 1.0, %v6133_v22  ;;  %v14010_v50 = vpop.permute.xlu0 %7855 }
 0x2c6   : > { %6040 = vmatprep.mubr.f32.mxu1 %v14520_v17 }
 0x2c7   : > { %10800 = vmatmul.mubr.msk.f32.vlgmr.msra.gmra.mrb[8].mxu0 %vm14664_vm6, %v13649_v52  ;;  %vm14678_vm6 = vmmov %vm14536_vm0  ;;  %v7005_v53 = vcombine.high %v13879_v61, %v13879_v61 }
 0x2c8   : > { %10811 = vmatpush1.msk.msra.mxu0 %vm2046_vm1, %v13641_v18  ;;  %6455 = vmatprep.mubr.f32.mxu0 %v14520_v17 }
 0x2c9   : > { %10785 = vmatmul.mubr.msk.f32.gmra.mrb[30].mxu1 %vm14665_vm12, %v13495_v24  ;;  %10822 = vmatprep.subr.msk.mxu0 %vm2046_vm1, %v6165_v20  ;;  %vm14679_vm12 = vmmov %vm14536_vm0  ;;  %v13896_v24 = vsub.f32 1.0, %v6132_v10  ;;  %v14030_v26 = vpop.permute.xlu0 %7859 }
 0x2ca   : > { %6360 = vmatprep.mubr.f32.mxu1 %v14520_v17 }
 0x2cb   : > { %10801 = vmatmul.mubr.msk.f32.gmra.mrb[10].mxu0 %vm14666_vm3, %v13658_v23  ;;  %vm14680_vm3 = vmmov %vm14536_vm0  ;;  %v7004_v37 = vcombine.high %v13896_v24, %v13896_v24 }
 0x2cc   : > { %6461 = vmatprep.mubr.f32.mxu0 %v14520_v17 }
 0x2cd   : > { %10794 = vmatmul.mubr.msk.f32.vlgmr.msra.gmra.mrb[0].mxu1 %vm14667_vm8, %v13649_v52  ;;  %vm14681_vm8 = vmmov %vm14536_vm0 }
 0x2ce   : > { %10805 = vmatpush1.msk.msra.mxu1 %vm2046_vm1, %v13665_v32  ;;  %6366 = vmatprep.mubr.f32.mxu1 %v14520_v17 }
 0x2cf   : > { %10816 = vmatprep.subr.msk.mxu1 %vm2046_vm1, %v6164_v25  ;;  %10802 = vmatmul.mubr.msk.f32.gmra.mrb[12].mxu0 %vm14668_vm9, %v13676_v55  ;;  %vm14682_vm9 = vmmov %vm14536_vm0  ;;  %v7836_v25 = vmul.f32 %v14054_v2, %v13896_v24 }
 0x2d0   : > { %6467 = vmatprep.mubr.f32.mxu0 %v14520_v17 }
 0x2d1   : > { %10795 = vmatmul.mubr.msk.f32.gmra.mrb[2].mxu1 %vm14669_vm10, %v13658_v23  ;;  %vm14683_vm10 = vmmov %vm14536_vm0 }
 0x2d2   : > { %6372 = vmatprep.mubr.f32.mxu1 %v14520_v17 }
 0x2d3   : > { %10803 = vmatmul.mubr.msk.f32.gmra.mrb[14].mxu0 %vm14670_vm11, %v13687_v4  ;;  %vm14684_vm11 = vmmov %vm14536_vm0 }
 0x2d4   : > { %6627 = vmatprep.mubr.f32.mxu0 %v14520_v17 }
 0x2d5   : > { %10796 = vmatmul.mubr.msk.f32.gmra.mrb[4].mxu1 %vm14671_vm13, %v13676_v55  ;;  %vm14685_vm13 = vmmov %vm14536_vm0 }
 0x2d6   : > { %6378 = vmatprep.mubr.f32.mxu1 %v14520_v17 }
 0x2d7   : > { %10812 = vmatmul.mubr.msk.f32.vlgmr.msra.gmra.mrb[16].mxu0 %vm14536_vm0, %v13649_v52 }
 0x2d8   : > { %10823 = vmatpush1.msk.msra.mxu0 %vm2046_vm1, %v13697_v62  ;;  %6633 = vmatprep.mubr.f32.mxu0 %v14520_v17 }
 0x2d9   : > { %10797 = vmatmul.mubr.msk.f32.gmra.mrb[6].mxu1 %vm14672_vm2, %v13687_v4  ;;  %10834 = vmatprep.subr.msk.mxu0 %vm2046_vm1, %v6999_v1  ;;  %vm14686_vm2 = vmmov %vm14536_vm0  ;;  %v7839_v1 = vmul.f32 %v13914_v19, %v13546_v47 }
 0x2da   : > { %6538 = vmatprep.mubr.f32.mxu1 %v14520_v17 }
 0x2db   : > { %10813 = vmatmul.mubr.msk.f32.gmra.mrb[18].mxu0 %vm14673_vm15, %v13658_v23  ;;  %vm14687_vm15 = vmmov %vm14536_vm0 }
 0x2dc   : > { %6639 = vmatprep.mubr.f32.mxu0 %v14520_v17 }
 0x2dd   : > { %10806 = vmatmul.mubr.msk.f32.vlgmr.msra.gmra.mrb[8].mxu1 %vm14674_vm4, %v13649_v52  ;;  %vm14688_vm4 = vmmov %vm14536_vm0 }
 0x2de   : > { %10817 = vmatpush1.msk.msra.mxu1 %vm2046_vm1, %v13717_v28  ;;  %6544 = vmatprep.mubr.f32.mxu1 %v14520_v17 }
 0x2df   : > { %10828 = vmatprep.subr.msk.mxu1 %vm2046_vm1, %v6166_v51  ;;  %10814 = vmatmul.mubr.msk.f32.gmra.mrb[20].mxu0 %vm14675_vm14, %v13676_v55  ;;  %vm14689_vm14 = vmmov %vm14536_vm0  ;;  %v7847_v51 = vsub.f32 1.0, %v7839_v1 }
 0x2e0   : > { %6645 = vmatprep.mubr.f32.mxu0 %v14520_v17 }
 0x2e1   : > { %10807 = vmatmul.mubr.msk.f32.gmra.mrb[10].mxu1 %vm14676_vm7, %v13658_v23  ;;  %vm14690_vm7 = vmmov %vm14536_vm0  ;;  %v8711_v47 = vcombine.high %v7847_v51, %v7847_v51 }
 0x2e2   : > { %6550 = vmatprep.mubr.f32.mxu1 %v14520_v17 }
 0x2e3   : > { %10815 = vmatmul.mubr.msk.f32.gmra.mrb[22].mxu0 %vm14677_vm5, %v13687_v4  ;;  %vm14691_vm5 = vmmov %vm14536_vm0 }
 0x2e4   : > { %6805 = vmatprep.mubr.f32.mxu0 %v14520_v17 }
 0x2e5   : > { %10808 = vmatmul.mubr.msk.f32.gmra.mrb[12].mxu1 %vm14678_vm6, %v13676_v55  ;;  %vm14692_vm6 = vmmov %vm14536_vm0 }
 0x2e6   : > { %6556 = vmatprep.mubr.f32.mxu1 %v14520_v17 }
 0x2e7   : > { %10824 = vmatmul.mubr.msk.f32.vlgmr.msra.gmra.mrb[24].mxu0 %vm14679_vm12, %v13649_v52  ;;  %vm14693_vm12 = vmmov %vm14536_vm0 }
 0x2e8   : > { %10835 = vmatpush1.msk.msra.mxu0 %vm2046_vm1, %v13742_v63  ;;  %6811 = vmatprep.mubr.f32.mxu0 %v14520_v17  ;;  %v7876_v63 = vcombine.high %v7836_v25, %v7836_v25 }
 0x2e9   : > { %10809 = vmatmul.mubr.msk.f32.gmra.mrb[14].mxu1 %vm14680_vm3, %v13687_v4  ;;  %10846 = vmatprep.subr.msk.mxu0 %vm2046_vm1, %v7001_v3  ;;  %vm14694_vm3 = vmmov %vm14536_vm0  ;;  %v7841_v3 = vmul.f32 %v13955_v9, %v13593_v29 }
 0x2ea   : > { %6716 = vmatprep.mubr.f32.mxu1 %v14520_v17 }
 0x2eb   : > { %10825 = vmatmul.mubr.msk.f32.gmra.mrb[26].mxu0 %vm14681_vm8, %v13658_v23  ;;  %vm14695_vm8 = vmmov %vm14536_vm0 }
 0x2ec   : > { %6817 = vmatprep.mubr.f32.mxu0 %v14520_v17 }
 0x2ed   : > { %10818 = vmatmul.mubr.msk.f32.vlgmr.msra.gmra.mrb[16].mxu1 %vm14682_vm9, %v13649_v52  ;;  %vm14696_vm9 = vmmov %vm14536_vm0 }
 0x2ee   : > { %10829 = vmatpush1.msk.msra.mxu1 %vm2046_vm1, %v13762_v0  ;;  %6722 = vmatprep.mubr.f32.mxu1 %v14520_v17 }
 0x2ef   : > { %10840 = vmatprep.subr.msk.mxu1 %vm2046_vm1, %v7000_v56  ;;  %10826 = vmatmul.mubr.msk.f32.gmra.mrb[28].mxu0 %vm14683_vm10, %v13676_v55  ;;  %vm14697_vm10 = vmmov %vm14536_vm0  ;;  %v7840_v56 = vmul.f32 %v13969_v38, %v13611_v44 }
 0x2f0   : > { %6823 = vmatprep.mubr.f32.mxu0 %v14520_v17 }
 0x2f1   : > { %10819 = vmatmul.mubr.msk.f32.gmra.mrb[18].mxu1 %vm14684_vm11, %v13658_v23  ;;  %vm14698_vm11 = vmmov %vm14536_vm0  ;;  %v7848_v7 = vsub.f32 1.0, %v7840_v56  ;;  %v14323_v56 = vld [vmem:[%s14455_s5] sm:$0x1] }
 0x2f2   : > { %6728 = vmatprep.mubr.f32.mxu1 %v14520_v17 }
 0x2f3   : > { %10827 = vmatmul.mubr.msk.f32.gmra.mrb[30].mxu0 %vm14685_vm13, %v13687_v4  ;;  %vm14699_vm13 = vmmov %vm14536_vm0  ;;  %v8712_v44 = vcombine.high %v7848_v7, %v7848_v7 }
 0x2f4   : > { %7111 = vmatprep.mubr.f32.mxu0 %v14520_v17 }
 0x2f5   : > { %10820 = vmatmul.mubr.msk.f32.gmra.mrb[20].mxu1 %vm14536_vm0, %v13676_v55 }
 0x2f6   : > { %6734 = vmatprep.mubr.f32.mxu1 %v14520_v17 }
 0x2f7   : > { %10836 = vmatmul.mubr.msk.f32.vlgmr.msra.gmra.mrb[0].mxu0 %vm14686_vm2, %v13836_v40  ;;  %vm14700_vm2 = vmmov %vm14536_vm0 }
 0x2f8   : > { %10847 = vmatpush1.msk.msra.mxu0 %vm2046_vm1, %v13787_v45  ;;  %7117 = vmatprep.mubr.f32.mxu0 %v14520_v17  ;;  %v7838_v45 = vmul.f32 %v14095_v34, %v13937_v46 }
 0x2f9   : > { %10821 = vmatmul.mubr.msk.f32.gmra.mrb[22].mxu1 %vm14687_vm15, %v13687_v4  ;;  %10858 = vmatprep.subr.msk.mxu0 %vm2046_vm1, %v7003_v21  ;;  %vm14701_vm15 = vmmov %vm14536_vm0 }
 0x2fa   : > { %6894 = vmatprep.mubr.f32.mxu1 %v14520_v17  ;;  %v7878_v8 = vcombine.high %v7838_v45, %v7838_v45 }
 0x2fb   : > { %10837 = vmatmul.mubr.msk.f32.gmra.mrb[2].mxu0 %vm14688_vm4, %v13845_v58  ;;  %vm14702_vm4 = vmmov %vm14536_vm0 }
 0x2fc   : > { %7123 = vmatprep.mubr.f32.mxu0 %v14520_v17 }
 0x2fd   : > { %10830 = vmatmul.mubr.msk.f32.vlgmr.msra.gmra.mrb[24].mxu1 %vm14689_vm14, %v13649_v52  ;;  %vm14703_vm14 = vmmov %vm14536_vm0  ;;  %v14016_v52 = vpop.permute.xlu1 %7857 }
 0x2fe   : > { %10841 = vmatpush1.msk.msra.mxu1 %vm2046_vm1, %v13804_v30  ;;  %6900 = vmatprep.mubr.f32.mxu1 %v14520_v17  ;;  %v7849_v30 = vsub.f32 1.0, %v7841_v3 }
 0x2ff   : > { %10852 = vmatprep.subr.msk.mxu1 %vm2046_vm1, %v7002_v39  ;;  %10838 = vmatmul.mubr.msk.f32.gmra.mrb[4].mxu0 %vm14690_vm7, %v13861_v27  ;;  %vm14704_vm7 = vmmov %vm14536_vm0 }
 0x300   : > { %7129 = vmatprep.mubr.f32.mxu0 %v14520_v17  ;;  %v8713_v29 = vcombine.high %v7849_v30, %v7849_v30 }
 0x301   : > { %10831 = vmatmul.mubr.msk.f32.gmra.mrb[26].mxu1 %vm14691_vm5, %v13658_v23  ;;  %vm14705_vm5 = vmmov %vm14536_vm0  ;;  %v7874_v23 = vcombine.high %v7834_v13, %v7834_v13  ;;  %v14040_v11 = vpop.permute.xlu1 %7861 }
 0x302   : > { %6906 = vmatprep.mubr.f32.mxu1 %v14520_v17 }
 0x303   : > { %10839 = vmatmul.mubr.msk.f32.gmra.mrb[6].mxu0 %vm14692_vm6, %v13871_v42  ;;  %vm14706_vm6 = vmmov %vm14536_vm0 }
 0x304   : > { %7289 = vmatprep.mubr.f32.mxu0 %v14520_v17 }
 0x305   : > { %10832 = vmatmul.mubr.msk.f32.gmra.mrb[28].mxu1 %vm14693_vm12, %v13676_v55  ;;  %vm14707_vm12 = vmmov %vm14536_vm0  ;;  %v14038_v55 = vmul.f32 2.0, %v13697_v62 }
 0x306   : > { %6912 = vmatprep.mubr.f32.mxu1 %v14520_v17 }
 0x307   : > { %10848 = vmatmul.mubr.msk.f32.vlgmr.msra.gmra.mrb[8].mxu0 %vm14694_vm3, %v13836_v40  ;;  %vm14708_vm3 = vmmov %vm14536_vm0 }
 0x308   : > { %10859 = vmatpush1.msk.msra.mxu0 %vm2046_vm1, %v13829_v35  ;;  %7295 = vmatprep.mubr.f32.mxu0 %v14520_v17  ;;  %v7843_v35 = vmul.f32 %v13994_v33, %v13641_v18  ;;  %v14163_v18 = vpop.permute.xlu0 %8695 }
 0x309   : > { %10833 = vmatmul.mubr.msk.f32.gmra.mrb[30].mxu1 %vm14695_vm8, %v13687_v4  ;;  %10870 = vmatprep.subr.msk.mxu0 %vm2046_vm1, %v7005_v53  ;;  %vm14709_vm8 = vmmov %vm14536_vm0  ;;  %v7837_v4 = vmul.f32 %v14038_v55, %v13879_v61  ;;  %v7846_v53 = vmul.f32 %v14095_v34, %v13762_v0 }
 0x30a   : > { %7200 = vmatprep.mubr.f32.mxu1 %v14520_v17  ;;  %v7851_v15 = vsub.f32 1.0, %v7843_v35 }
 0x30b   : > { %10849 = vmatmul.mubr.msk.f32.gmra.mrb[10].mxu0 %vm14696_vm9, %v13845_v58  ;;  %vm14710_vm9 = vmmov %vm14536_vm0  ;;  %v7877_v20 = vcombine.high %v7837_v4, %v7837_v4 }
 0x30c   : > { %7301 = vmatprep.mubr.f32.mxu0 %v14520_v17  ;;  %v8715_v21 = vcombine.high %v7851_v15, %v7851_v15  ;;  %v14181_v39 = vpop.permute.xlu0 %8699 }
 0x30d   : > { %10842 = vmatmul.mubr.msk.f32.vlgmr.msra.gmra.mrb[0].mxu1 %vm14697_vm10, %v13836_v40  ;;  %vm14711_vm10 = vmmov %vm14536_vm0 }
 0x30e   : > { %10853 = vmatpush1.msk.msra.mxu1 %vm2046_vm1, %v13850_v49  ;;  %7206 = vmatprep.mubr.f32.mxu1 %v14520_v17 }
 0x30f   : > { %10864 = vmatprep.subr.msk.mxu1 %vm2046_vm1, %v7004_v37  ;;  %10850 = vmatmul.mubr.msk.f32.gmra.mrb[12].mxu0 %vm14698_vm11, %v13861_v27  ;;  %vm14712_vm11 = vmmov %vm14536_vm0 }
 0x310   : > { %7307 = vmatprep.mubr.f32.mxu0 %v14520_v17 }
 0x311   : > { %10843 = vmatmul.mubr.msk.f32.gmra.mrb[2].mxu1 %vm14699_vm13, %v13845_v58  ;;  %vm14713_vm13 = vmmov %vm14536_vm0 }
 0x312   : > { %7212 = vmatprep.mubr.f32.mxu1 %v14520_v17 }
 0x313   : > { %10851 = vmatmul.mubr.msk.f32.gmra.mrb[14].mxu0 %vm14536_vm0, %v13871_v42 }
 0x314   : > { %7467 = vmatprep.mubr.f32.mxu0 %v14520_v17 }
 0x315   : > { %10844 = vmatmul.mubr.msk.f32.gmra.mrb[4].mxu1 %vm14700_vm2, %v13861_v27  ;;  %vm14714_vm2 = vmmov %vm14536_vm0 }
 0x316   : > { %7218 = vmatprep.mubr.f32.mxu1 %v14520_v17 }
 0x317   : > { %10860 = vmatmul.mubr.msk.f32.vlgmr.msra.gmra.mrb[16].mxu0 %vm14701_vm15, %v13836_v40  ;;  %vm14715_vm15 = vmmov %vm14536_vm0 }
 0x318   : > { %10871 = vmatpush1.msk.msra.mxu0 %vm2046_vm1, %v13879_v61  ;;  %7473 = vmatprep.mubr.f32.mxu0 %v14520_v17 }
 0x319   : > { %10845 = vmatmul.mubr.msk.f32.gmra.mrb[6].mxu1 %vm14702_vm4, %v13871_v42  ;;  %10882 = vmatprep.subr.msk.mxu0 %vm2046_vm1, %v7871_v41  ;;  %vm14716_vm4 = vmmov %vm14536_vm0 }
 0x31a   : > { %7378 = vmatprep.mubr.f32.mxu1 %v14520_v17 }
 0x31b   : > { %10861 = vmatmul.mubr.msk.f32.gmra.mrb[18].mxu0 %vm14703_vm14, %v13845_v58  ;;  %vm14717_vm14 = vmmov %vm14536_vm0 }
 0x31c   : > { %7479 = vmatprep.mubr.f32.mxu0 %v14520_v17 }
 0x31d   : > { %10854 = vmatmul.mubr.msk.f32.vlgmr.msra.gmra.mrb[8].mxu1 %vm14704_vm7, %v13836_v40  ;;  %vm14718_vm7 = vmmov %vm14536_vm0 }
 0x31e   : > { %10865 = vmatpush1.msk.msra.mxu1 %vm2046_vm1, %v13896_v24  ;;  %7384 = vmatprep.mubr.f32.mxu1 %v14520_v17  ;;  %v7854_v24 = vsub.f32 1.0, %v7846_v53 }
 0x31f   : > { %10876 = vmatprep.subr.msk.mxu1 %vm2046_vm1, %v7006_v12  ;;  %10862 = vmatmul.mubr.msk.f32.gmra.mrb[20].mxu0 %vm14705_vm5, %v13861_v27  ;;  %vm14719_vm5 = vmmov %vm14536_vm0 }
 0x320   : > { %7485 = vmatprep.mubr.f32.mxu0 %v14520_v17  ;;  %v8718_v0 = vcombine.high %v7854_v24, %v7854_v24 }
 0x321   : > { %10855 = vmatmul.mubr.msk.f32.gmra.mrb[10].mxu1 %vm14706_vm6, %v13845_v58  ;;  %vm14720_vm6 = vmmov %vm14536_vm0 }
 0x322   : > { %7390 = vmatprep.mubr.f32.mxu1 %v14520_v17 }
 0x323   : > { %10863 = vmatmul.mubr.msk.f32.gmra.mrb[22].mxu0 %vm14707_vm12, %v13871_v42  ;;  %vm14721_vm12 = vmmov %vm14536_vm0 }
 0x324   : > { %7645 = vmatprep.mubr.f32.mxu0 %v14520_v17 }
 0x325   : > { %10856 = vmatmul.mubr.msk.f32.gmra.mrb[12].mxu1 %vm14708_vm3, %v13861_v27  ;;  %vm14722_vm3 = vmmov %vm14536_vm0 }
 0x326   : > { %7396 = vmatprep.mubr.f32.mxu1 %v14520_v17 }
 0x327   : > { %10872 = vmatmul.mubr.msk.f32.vlgmr.msra.gmra.mrb[24].mxu0 %vm14709_vm8, %v13836_v40  ;;  %vm14723_vm8 = vmmov %vm14536_vm0 }
 0x328   : > { %10883 = vmatpush1.msk.msra.mxu0 %vm2046_vm1, %v7831_v6  ;;  %7651 = vmatprep.mubr.f32.mxu0 %v14520_v17  ;;  %v14301_v6 = vpop.permute.xlu0 %9541 }
 0x329   : > { %10857 = vmatmul.mubr.msk.f32.gmra.mrb[14].mxu1 %vm14710_vm9, %v13871_v42  ;;  %10894 = vmatprep.subr.msk.mxu0 %vm2046_vm1, %v7873_v43  ;;  %vm14724_vm9 = vmmov %vm14536_vm0 }
 0x32a   : > { %7556 = vmatprep.mubr.f32.mxu1 %v14520_v17 }
 0x32b   : > { %10873 = vmatmul.mubr.msk.f32.gmra.mrb[26].mxu0 %vm14711_vm10, %v13845_v58  ;;  %vm14725_vm10 = vmmov %vm14536_vm0 }
 0x32c   : > { %7657 = vmatprep.mubr.f32.mxu0 %v14520_v17 }
 0x32d   : > { %10866 = vmatmul.mubr.msk.f32.vlgmr.msra.gmra.mrb[16].mxu1 %vm14712_vm11, %v13836_v40  ;;  %vm14726_vm11 = vmmov %vm14536_vm0 }
 0x32e   : > { %10877 = vmatpush1.msk.msra.mxu1 %vm2046_vm1, %v13937_v46  ;;  %7562 = vmatprep.mubr.f32.mxu1 %v14520_v17 }
 0x32f   : > { %10888 = vmatprep.subr.msk.mxu1 %vm2046_vm1, %v7872_v31  ;;  %10874 = vmatmul.mubr.msk.f32.gmra.mrb[28].mxu0 %vm14713_vm13, %v13861_v27  ;;  %vm14727_vm13 = vmmov %vm14536_vm0 }
 0x330   : > { %7663 = vmatprep.mubr.f32.mxu0 %v14520_v17 }
 0x331   : > { %10867 = vmatmul.mubr.msk.f32.gmra.mrb[18].mxu1 %vm14536_vm0, %v13845_v58 }
 0x332   : > { %7568 = vmatprep.mubr.f32.mxu1 %v14520_v17 }
 0x333   : > { %10875 = vmatmul.mubr.msk.f32.gmra.mrb[30].mxu0 %vm14714_vm2, %v13871_v42  ;;  %vm14728_vm2 = vmmov %vm14536_vm0 }
 0x334   : > { %7983 = vmatprep.mubr.f32.mxu0 %v14520_v17 }
 0x335   : > { %10868 = vmatmul.mubr.msk.f32.gmra.mrb[20].mxu1 %vm14715_vm15, %v13861_v27  ;;  %vm14729_vm15 = vmmov %vm14536_vm0 }
 0x336   : > { %7574 = vmatprep.mubr.f32.mxu1 %v14520_v17 }
 0x337   : > { %10884 = vmatmul.mubr.msk.f32.vlgmr.msra.gmra.mrb[0].mxu0 %vm14716_vm4, %v14010_v50  ;;  %vm14730_vm4 = vmmov %vm14536_vm0 }
 0x338   : > { %10895 = vmatpush1.msk.msra.mxu0 %vm2046_vm1, %v7833_v57  ;;  %7989 = vmatprep.mubr.f32.mxu0 %v14520_v17 }
 0x339   : > { %10869 = vmatmul.mubr.msk.f32.gmra.mrb[22].mxu1 %vm14717_vm14, %v13871_v42  ;;  %10906 = vmatprep.subr.msk.mxu0 %vm2046_vm1, %v7875_v14  ;;  %vm14731_vm14 = vmmov %vm14536_vm0  ;;  %v14309_v14 = vpop.permute.xlu0 %9551 }
 0x33a   : > { %7734 = vmatprep.mubr.f32.mxu1 %v14520_v17 }
 0x33b   : > { %10885 = vmatmul.mubr.msk.f32.gmra.mrb[2].mxu0 %vm14718_vm7, %v14016_v52  ;;  %vm14732_vm7 = vmmov %vm14536_vm0 }
 0x33c   : > { %7995 = vmatprep.mubr.f32.mxu0 %v14520_v17 }
 0x33d   : > { %10878 = vmatmul.mubr.msk.f32.vlgmr.msra.gmra.mrb[24].mxu1 %vm14719_vm5, %v13836_v40  ;;  %vm14733_vm5 = vmmov %vm14536_vm0  ;;  %v7842_v40 = vmul.f32 %v14008_v5, %v13665_v32 }
 0x33e   : > { %10889 = vmatpush1.msk.msra.mxu1 %vm2046_vm1, %v7832_v36  ;;  %7740 = vmatprep.mubr.f32.mxu1 %v14520_v17 }
 0x33f   : > { %10900 = vmatprep.subr.msk.mxu1 %vm2046_vm1, %v7874_v23  ;;  %10886 = vmatmul.mubr.msk.f32.gmra.mrb[4].mxu0 %vm14720_vm6, %v14030_v26  ;;  %vm14734_vm6 = vmmov %vm14536_vm0  ;;  %v7850_v49 = vsub.f32 1.0, %v7842_v40 }
 0x340   : > { %8001 = vmatprep.mubr.f32.mxu0 %v14520_v17 }
 0x341   : > { %10879 = vmatmul.mubr.msk.f32.gmra.mrb[26].mxu1 %vm14721_vm12, %v13845_v58  ;;  %vm14735_vm12 = vmmov %vm14536_vm0  ;;  %v14169_v58 = vpop.permute.xlu1 %8697  ;;  %v8714_v32 = vcombine.high %v7850_v49, %v7850_v49 }
 0x342   : > { %7746 = vmatprep.mubr.f32.mxu1 %v14520_v17 }
 0x343   : > { %10887 = vmatmul.mubr.msk.f32.gmra.mrb[6].mxu0 %vm14722_vm3, %v14040_v11  ;;  %vm14736_vm3 = vmmov %vm14536_vm0 }
 0x344   : > { %8161 = vmatprep.mubr.f32.mxu0 %v14520_v17 }
 0x345   : > { %10880 = vmatmul.mubr.msk.f32.gmra.mrb[28].mxu1 %vm14723_vm8, %v13861_v27  ;;  %vm14737_vm8 = vmmov %vm14536_vm0  ;;  %v7845_v27 = vmul.f32 %v14038_v55, %v13697_v62  ;;  %v14190_v22 = vpop.permute.xlu1 %8701  ;;  %v7844_v62 = vmul.f32 %v14054_v2, %v13717_v28 }
 0x346   : > { %7752 = vmatprep.mubr.f32.mxu1 %v14520_v17 }
 0x347   : > { %10896 = vmatmul.mubr.msk.f32.vlgmr.msra.gmra.mrb[8].mxu0 %vm14724_vm9, %v14010_v50  ;;  %vm14738_vm9 = vmmov %vm14536_vm0  ;;  %v7852_v10 = vsub.f32 1.0, %v7844_v62 }
 0x348   : > { %10907 = vmatpush1.msk.msra.mxu0 %vm2046_vm1, %v7835_v59  ;;  %8167 = vmatprep.mubr.f32.mxu0 %v14520_v17 }
 0x349   : > { %10881 = vmatmul.mubr.msk.f32.gmra.mrb[30].mxu1 %vm14725_vm10, %v13871_v42  ;;  %10918 = vmatprep.subr.msk.mxu0 %vm2046_vm1, %v7877_v20  ;;  %vm14739_vm10 = vmmov %vm14536_vm0  ;;  %v7853_v42 = vsub.f32 1.0, %v7845_v27  ;;  %v8716_v28 = vcombine.high %v7852_v10, %v7852_v10  ;;  %v14303_v54 = vpop.permute.xlu1 %9546 }
 0x34a   : > { %8072 = vmatprep.mubr.f32.mxu1 %v14520_v17 }
 0x34b   : > { %10897 = vmatmul.mubr.msk.f32.gmra.mrb[10].mxu0 %vm14726_vm11, %v14016_v52  ;;  %vm14740_vm11 = vmmov %vm14536_vm0  ;;  %v8717_v61 = vcombine.high %v7853_v42, %v7853_v42 }
 0x34c   : > { %8173 = vmatprep.mubr.f32.mxu0 %v14520_v17 }
 0x34d   : > { %10890 = vmatmul.mubr.msk.f32.vlgmr.msra.gmra.mrb[0].mxu1 %vm14727_vm13, %v14010_v50  ;;  %vm14741_vm13 = vmmov %vm14536_vm0 }
 0x34e   : > { %10901 = vmatpush1.msk.msra.mxu1 %vm2046_vm1, %v7834_v13  ;;  %8078 = vmatprep.mubr.f32.mxu1 %v14520_v17  ;;  %v14311_v13 = vpop.permute.xlu1 %9556 }
 0x34f   : > { %10912 = vmatprep.subr.msk.mxu1 %vm2046_vm1, %v7876_v63  ;;  %10898 = vmatmul.mubr.msk.f32.gmra.mrb[12].mxu0 %vm14536_vm0, %v14030_v26 }
 0x350   : > { %8179 = vmatprep.mubr.f32.mxu0 %v14520_v17 }
 0x351   : > { %10891 = vmatmul.mubr.msk.f32.gmra.mrb[2].mxu1 %vm14728_vm2, %v14016_v52  ;;  %vm14742_vm2 = vmmov %vm14536_vm0 }
 0x352   : > { %8084 = vmatprep.mubr.f32.mxu1 %v14520_v17 }
 0x353   : > { %10899 = vmatmul.mubr.msk.f32.gmra.mrb[14].mxu0 %vm14729_vm15, %v14040_v11  ;;  %vm14743_vm15 = vmmov %vm14536_vm0 }
 0x354   : > { %8339 = vmatprep.mubr.f32.mxu0 %v14520_v17 }
 0x355   : > { %10892 = vmatmul.mubr.msk.f32.gmra.mrb[4].mxu1 %vm14730_vm4, %v14030_v26  ;;  %vm14744_vm4 = vmmov %vm14536_vm0 }
 0x356   : > { %8090 = vmatprep.mubr.f32.mxu1 %v14520_v17 }
 0x357   : > { %10908 = vmatmul.mubr.msk.f32.vlgmr.msra.gmra.mrb[16].mxu0 %vm14731_vm14, %v14010_v50  ;;  %vm14745_vm14 = vmmov %vm14536_vm0 }
 0x358   : > { %10919 = vmatpush1.msk.msra.mxu0 %vm2046_vm1, %v7837_v4  ;;  %8345 = vmatprep.mubr.f32.mxu0 %v14520_v17 }
 0x359   : > { %10893 = vmatmul.mubr.msk.f32.gmra.mrb[6].mxu1 %vm14732_vm7, %v14040_v11  ;;  %10930 = vmatprep.subr.msk.mxu0 %vm2046_vm1, %v8711_v47  ;;  %vm14746_vm7 = vmmov %vm14536_vm0 }
 0x35a   : > { %8250 = vmatprep.mubr.f32.mxu1 %v14520_v17 }
 0x35b   : > { %10909 = vmatmul.mubr.msk.f32.gmra.mrb[18].mxu0 %vm14733_vm5, %v14016_v52  ;;  %vm14747_vm5 = vmmov %vm14536_vm0 }
 0x35c   : > { %8351 = vmatprep.mubr.f32.mxu0 %v14520_v17 }
 0x35d   : > { %10902 = vmatmul.mubr.msk.f32.vlgmr.msra.gmra.mrb[8].mxu1 %vm14734_vm6, %v14010_v50  ;;  %vm14748_vm6 = vmmov %vm14536_vm0 }
 0x35e   : > { %10913 = vmatpush1.msk.msra.mxu1 %vm2046_vm1, %v7836_v25  ;;  %8256 = vmatprep.mubr.f32.mxu1 %v14520_v17 }
 0x35f   : > { %10924 = vmatprep.subr.msk.mxu1 %vm2046_vm1, %v7878_v8  ;;  %10910 = vmatmul.mubr.msk.f32.gmra.mrb[20].mxu0 %vm14735_vm12, %v14030_v26  ;;  %vm14749_vm12 = vmmov %vm14536_vm0 }
 0x360   : > { %8357 = vmatprep.mubr.f32.mxu0 %v14520_v17 }
 0x361   : > { %10903 = vmatmul.mubr.msk.f32.gmra.mrb[10].mxu1 %vm14736_vm3, %v14016_v52  ;;  %vm14750_vm3 = vmmov %vm14536_vm0 }
 0x362   : > { %8262 = vmatprep.mubr.f32.mxu1 %v14520_v17 }
 0x363   : > { %10911 = vmatmul.mubr.msk.f32.gmra.mrb[22].mxu0 %vm14737_vm8, %v14040_v11  ;;  %vm14751_vm8 = vmmov %vm14536_vm0 }
 0x364   : > { %8517 = vmatprep.mubr.f32.mxu0 %v14520_v17 }
 0x365   : > { %10904 = vmatmul.mubr.msk.f32.gmra.mrb[12].mxu1 %vm14738_vm9, %v14030_v26  ;;  %vm14752_vm9 = vmmov %vm14536_vm0 }
 0x366   : > { %8268 = vmatprep.mubr.f32.mxu1 %v14520_v17 }
 0x367   : > { %10920 = vmatmul.mubr.msk.f32.vlgmr.msra.gmra.mrb[24].mxu0 %vm14739_vm10, %v14010_v50  ;;  %vm14753_vm10 = vmmov %vm14536_vm0 }
 0x368   : > { %10931 = vmatpush1.msk.msra.mxu0 %vm2046_vm1, %v7847_v51  ;;  %8523 = vmatprep.mubr.f32.mxu0 %v14520_v17 }
 0x369   : > { %10905 = vmatmul.mubr.msk.f32.gmra.mrb[14].mxu1 %vm14740_vm11, %v14040_v11  ;;  %10942 = vmatprep.subr.msk.mxu0 %vm2046_vm1, %v8713_v29  ;;  %vm14754_vm11 = vmmov %vm14536_vm0 }
 0x36a   : > { %8428 = vmatprep.mubr.f32.mxu1 %v14520_v17 }
 0x36b   : > { %10921 = vmatmul.mubr.msk.f32.gmra.mrb[26].mxu0 %vm14741_vm13, %v14016_v52  ;;  %vm14755_vm13 = vmmov %vm14536_vm0 }
 0x36c   : > { %8529 = vmatprep.mubr.f32.mxu0 %v14520_v17 }
 0x36d   : > { %10914 = vmatmul.mubr.msk.f32.vlgmr.msra.gmra.mrb[16].mxu1 %vm14536_vm0, %v14010_v50 }
 0x36e   : > { %10925 = vmatpush1.msk.msra.mxu1 %vm2046_vm1, %v7838_v45  ;;  %8434 = vmatprep.mubr.f32.mxu1 %v14520_v17 }
 0x36f   : > { %10936 = vmatprep.subr.msk.mxu1 %vm2046_vm1, %v8712_v44  ;;  %10922 = vmatmul.mubr.msk.f32.gmra.mrb[28].mxu0 %vm14742_vm2, %v14030_v26  ;;  %vm14756_vm2 = vmmov %vm14536_vm0 }
 0x370   : > { %8535 = vmatprep.mubr.f32.mxu0 %v14520_v17 }
 0x371   : > { %10915 = vmatmul.mubr.msk.f32.gmra.mrb[18].mxu1 %vm14743_vm15, %v14016_v52  ;;  %vm14757_vm15 = vmmov %vm14536_vm0 }
 0x372   : > { %8440 = vmatprep.mubr.f32.mxu1 %v14520_v17 }
 0x373   : > { %10923 = vmatmul.mubr.msk.f32.gmra.mrb[30].mxu0 %vm14744_vm4, %v14040_v11  ;;  %vm14758_vm4 = vmmov %vm14536_vm0 }
 0x374   : > { %8823 = vmatprep.mubr.f32.mxu0 %v14520_v17 }
 0x375   : > { %10916 = vmatmul.mubr.msk.f32.gmra.mrb[20].mxu1 %vm14745_vm14, %v14030_v26  ;;  %vm14759_vm14 = vmmov %vm14536_vm0 }
 0x376   : > { %8446 = vmatprep.mubr.f32.mxu1 %v14520_v17 }
 0x377   : > { %10932 = vmatmul.mubr.msk.f32.vlgmr.msra.gmra.mrb[0].mxu0 %vm14746_vm7, %v14163_v18  ;;  %vm14760_vm7 = vmmov %vm14536_vm0 }
 0x378   : > { %10943 = vmatpush1.msk.msra.mxu0 %vm2046_vm1, %v7849_v30  ;;  %8829 = vmatprep.mubr.f32.mxu0 %v14520_v17 }
 0x379   : > { %10917 = vmatmul.mubr.msk.f32.gmra.mrb[22].mxu1 %vm14747_vm5, %v14040_v11  ;;  %10954 = vmatprep.subr.msk.mxu0 %vm2046_vm1, %v8715_v21  ;;  %vm14761_vm5 = vmmov %vm14536_vm0 }
 0x37a   : > { %8606 = vmatprep.mubr.f32.mxu1 %v14520_v17 }
 0x37b   : > { %10933 = vmatmul.mubr.msk.f32.gmra.mrb[2].mxu0 %vm14748_vm6, %v14169_v58  ;;  %vm14762_vm6 = vmmov %vm14536_vm0 }
 0x37c   : > { %8835 = vmatprep.mubr.f32.mxu0 %v14520_v17 }
 0x37d   : > { %10926 = vmatmul.mubr.msk.f32.vlgmr.msra.gmra.mrb[24].mxu1 %vm14749_vm12, %v14010_v50  ;;  %vm14763_vm12 = vmmov %vm14536_vm0 }
 0x37e   : > { %10937 = vmatpush1.msk.msra.mxu1 %vm2046_vm1, %v7848_v7  ;;  %8612 = vmatprep.mubr.f32.mxu1 %v14520_v17 }
 0x37f   : > { %10948 = vmatprep.subr.msk.mxu1 %vm2046_vm1, %v8714_v32  ;;  %10934 = vmatmul.mubr.msk.f32.gmra.mrb[4].mxu0 %vm14750_vm3, %v14181_v39  ;;  %vm14764_vm3 = vmmov %vm14536_vm0 }
 0x380   : > { %8841 = vmatprep.mubr.f32.mxu0 %v14520_v17 }
 0x381   : > { %10927 = vmatmul.mubr.msk.f32.gmra.mrb[26].mxu1 %vm14751_vm8, %v14016_v52  ;;  %vm14765_vm8 = vmmov %vm14536_vm0 }
 0x382   : > { %8618 = vmatprep.mubr.f32.mxu1 %v14520_v17 }
 0x383   : > { %10935 = vmatmul.mubr.msk.f32.gmra.mrb[6].mxu0 %vm14752_vm9, %v14190_v22  ;;  %vm14766_vm9 = vmmov %vm14536_vm0 }
 0x384   : > { %9001 = vmatprep.mubr.f32.mxu0 %v14520_v17 }
 0x385   : > { %10928 = vmatmul.mubr.msk.f32.gmra.mrb[28].mxu1 %vm14753_vm10, %v14030_v26  ;;  %vm14767_vm10 = vmmov %vm14536_vm0 }
 0x386   : > { %8624 = vmatprep.mubr.f32.mxu1 %v14520_v17 }
 0x387   : > { %10944 = vmatmul.mubr.msk.f32.vlgmr.msra.gmra.mrb[8].mxu0 %vm14754_vm11, %v14163_v18  ;;  %vm14768_vm11 = vmmov %vm14536_vm0 }
 0x388   : > { %10955 = vmatpush1.msk.msra.mxu0 %vm2046_vm1, %v7851_v15  ;;  %9007 = vmatprep.mubr.f32.mxu0 %v14520_v17 }
 0x389   : > { %10929 = vmatmul.mubr.msk.f32.gmra.mrb[30].mxu1 %vm14755_vm13, %v14040_v11  ;;  %10966 = vmatprep.subr.msk.mxu0 %vm2046_vm1, %v8717_v61  ;;  %vm14769_vm13 = vmmov %vm14536_vm0 }
 0x38a   : > { %8912 = vmatprep.mubr.f32.mxu1 %v14520_v17 }
 0x38b   : > { %10945 = vmatmul.mubr.msk.f32.gmra.mrb[10].mxu0 %vm14536_vm0, %v14169_v58 }
 0x38c   : > { %9013 = vmatprep.mubr.f32.mxu0 %v14520_v17 }
 0x38d   : > { %10938 = vmatmul.mubr.msk.f32.vlgmr.msra.gmra.mrb[0].mxu1 %vm14756_vm2, %v14163_v18  ;;  %vm14770_vm2 = vmmov %vm14536_vm0 }
 0x38e   : > { %10949 = vmatpush1.msk.msra.mxu1 %vm2046_vm1, %v7850_v49  ;;  %8918 = vmatprep.mubr.f32.mxu1 %v14520_v17 }
 0x38f   : > { %10960 = vmatprep.subr.msk.mxu1 %vm2046_vm1, %v8716_v28  ;;  %10946 = vmatmul.mubr.msk.f32.gmra.mrb[12].mxu0 %vm14757_vm15, %v14181_v39  ;;  %vm14771_vm15 = vmmov %vm14536_vm0 }
 0x390   : > { %9019 = vmatprep.mubr.f32.mxu0 %v14520_v17 }
 0x391   : > { %10939 = vmatmul.mubr.msk.f32.gmra.mrb[2].mxu1 %vm14758_vm4, %v14169_v58  ;;  %vm14772_vm4 = vmmov %vm14536_vm0 }
 0x392   : > { %8924 = vmatprep.mubr.f32.mxu1 %v14520_v17 }
 0x393   : > { %10947 = vmatmul.mubr.msk.f32.gmra.mrb[14].mxu0 %vm14759_vm14, %v14190_v22  ;;  %vm14773_vm14 = vmmov %vm14536_vm0 }
 0x394   : > { %9179 = vmatprep.mubr.f32.mxu0 %v14520_v17 }
 0x395   : > { %10940 = vmatmul.mubr.msk.f32.gmra.mrb[4].mxu1 %vm14760_vm7, %v14181_v39  ;;  %vm14774_vm7 = vmmov %vm14536_vm0 }
 0x396   : > { %8930 = vmatprep.mubr.f32.mxu1 %v14520_v17 }
 0x397   : > { %10956 = vmatmul.mubr.msk.f32.vlgmr.msra.gmra.mrb[16].mxu0 %vm14761_vm5, %v14163_v18  ;;  %vm14775_vm5 = vmmov %vm14536_vm0 }
 0x398   : > { %10967 = vmatpush1.msk.msra.mxu0 %vm2046_vm1, %v7853_v42  ;;  %9185 = vmatprep.mubr.f32.mxu0 %v14520_v17 }
 0x399   : > { %10941 = vmatmul.mubr.msk.f32.gmra.mrb[6].mxu1 %vm14762_vm6, %v14190_v22  ;;  %vm14777_vm6 = vmmov %vm14536_vm0 }
 0x39a   : > { %9090 = vmatprep.mubr.f32.mxu1 %v14520_v17 }
 0x39b   : > { %10957 = vmatmul.mubr.msk.f32.gmra.mrb[18].mxu0 %vm14763_vm12, %v14169_v58  ;;  %vm14778_vm12 = vmmov %vm14536_vm0 }
 0x39c   : > { %9191 = vmatprep.mubr.f32.mxu0 %v14520_v17 }
 0x39d   : > { %10950 = vmatmul.mubr.msk.f32.vlgmr.msra.gmra.mrb[8].mxu1 %vm14764_vm3, %v14163_v18  ;;  %vm14779_vm3 = vmmov %vm14536_vm0 }
 0x39e   : > { %10961 = vmatpush1.msk.msra.mxu1 %vm2046_vm1, %v7852_v10  ;;  %9096 = vmatprep.mubr.f32.mxu1 %v14520_v17 }
 0x39f   : > { %10972 = vmatprep.subr.msk.mxu1 %vm2046_vm1, %v8718_v0  ;;  %10958 = vmatmul.mubr.msk.f32.gmra.mrb[20].mxu0 %vm14765_vm8, %v14181_v39  ;;  %vm14780_vm8 = vmmov %vm14536_vm0 }
 0x3a0   : > { %9197 = vmatprep.mubr.f32.mxu0 %v14520_v17 }
 0x3a1   : > { %10951 = vmatmul.mubr.msk.f32.gmra.mrb[10].mxu1 %vm14766_vm9, %v14169_v58  ;;  %vm9698_vm9 = vcmask 261120  }
 0x3a2   : > { %9102 = vmatprep.mubr.f32.mxu1 %v14520_v17 }
 0x3a3   : > { %10959 = vmatmul.mubr.msk.f32.gmra.mrb[22].mxu0 %vm14767_vm10, %v14190_v22 }
 0x3a4   : > { %9357 = vmatprep.mubr.f32.mxu0 %v14520_v17 }
 0x3a5   : > { %10952 = vmatmul.mubr.msk.f32.gmra.mrb[12].mxu1 %vm14768_vm11, %v14181_v39 }
 0x3a6   : > { %9108 = vmatprep.mubr.f32.mxu1 %v14520_v17 }
 0x3a7   : > { %10968 = vmatmul.mubr.msk.f32.vlgmr.msra.gmra.mrb[24].mxu0 %vm14769_vm13, %v14163_v18 }
 0x3a8   : > { %9363 = vmatprep.mubr.f32.mxu0 %v14520_v17 }
 0x3a9   : > { %10953 = vmatmul.mubr.msk.f32.gmra.mrb[14].mxu1 %vm14536_vm0, %v14190_v22 }
 0x3aa   : > { %9268 = vmatprep.mubr.f32.mxu1 %v14520_v17 }
 0x3ab   : > { %10969 = vmatmul.mubr.msk.f32.gmra.mrb[26].mxu0 %vm14770_vm2, %v14169_v58 }
 0x3ac   : > { %9369 = vmatprep.mubr.f32.mxu0 %v14520_v17 }
 0x3ad   : > { %10962 = vmatmul.mubr.msk.f32.vlgmr.msra.gmra.mrb[16].mxu1 %vm14771_vm15, %v14163_v18 }
 0x3ae   : > { %10973 = vmatpush1.msk.msra.mxu1 %vm2046_vm1, %v7854_v24  ;;  %9274 = vmatprep.mubr.f32.mxu1 %v14520_v17  ;;  %vm14776_vm1 = vmmov %vm14536_vm0 }
 0x3af   : > { %10970 = vmatmul.mubr.msk.f32.gmra.mrb[28].mxu0 %vm14772_vm4, %v14181_v39 }
 0x3b0   : > { %9375 = vmatprep.mubr.f32.mxu0 %v14520_v17 }
 0x3b1   : > { %10963 = vmatmul.mubr.msk.f32.gmra.mrb[18].mxu1 %vm14773_vm14, %v14169_v58 }
 0x3b2   : > { %9280 = vmatprep.mubr.f32.mxu1 %v14520_v17 }
 0x3b3   : > { %10971 = vmatmul.mubr.msk.f32.gmra.mrb[30].mxu0 %vm14774_vm7, %v14190_v22 }
 0x3b4   : > { %9766 = vmatprep.mubr.f32.mxu0 %v14520_v17 }
 0x3b5   : > { %10964 = vmatmul.mubr.msk.f32.gmra.mrb[20].mxu1 %vm14775_vm5, %v14181_v39 }
 0x3b6   : > { %9286 = vmatprep.mubr.f32.mxu1 %v14520_v17 }
 0x3b9   : > { %10965 = vmatmul.mubr.msk.f32.gmra.mrb[22].mxu1 %vm14776_vm1, %v14190_v22 }
 0x3ba   : > { %9446 = vmatprep.mubr.f32.mxu1 %v14520_v17 }
 0x3bd   : > { %10974 = vmatmul.mubr.msk.f32.vlgmr.msra.gmra.mrb[24].mxu1 %vm14777_vm6, %v14163_v18 }
 0x3be   : > { %9452 = vmatprep.mubr.f32.mxu1 %v14520_v17 }
 0x3c1   : > { %10975 = vmatmul.mubr.msk.f32.gmra.mrb[26].mxu1 %vm14778_vm12, %v14169_v58 }
 0x3c2   : > { %9458 = vmatprep.mubr.f32.mxu1 %v14520_v17 }
 0x3c5   : > { %10976 = vmatmul.mubr.msk.f32.gmra.mrb[28].mxu1 %vm14779_vm3, %v14181_v39 }
 0x3c6   : > { %9464 = vmatprep.mubr.f32.mxu1 %v14520_v17 }
 0x3c9   : > { %10977 = vmatmul.mubr.msk.f32.gmra.mrb[30].mxu1 %vm14780_vm8, %v14190_v22 }
 0x3ca   : > { %9837 = vmatprep.mubr.f32.mxu1 %v14520_v17 }
 0x44a   : > { %v8825_v37 = vpop.f32.mrb[0].mxu0 }
 0x44b   : > { %v8827_v19 = vpop.f32.mrb[1].mxu0  ;;  %v9559_v41 = vadd.f32 %v14301_v6, %v8825_v37 }
 0x44c   : > { %v9560_v46 = vadd.f32 %v14301_v6, %v8827_v19 }
 0x44d   : > { %v9623_v43 = vmax.f32 %v9559_v41, 0.0 }
 0x44e   : > { %v8831_v12 = vpop.f32.mrb[2].mxu0  ;;  %v9624_v31 = vmax.f32 %v9560_v46, 0.0 }
 0x44f   : > { %v9575_v9 = vadd.f32 %v14303_v54, %v8831_v12  ;;  %v8833_v57 = vpop.f32.mrb[3].mxu0 }
 0x450   : > { %v9576_v38 = vadd.f32 %v14303_v54, %v8833_v57 }
 0x451   : > { %v9639_v36 = vmax.f32 %v9575_v9, 0.0 }
 0x452   : > { %v9640_v33 = vmax.f32 %v9576_v38, 0.0  ;;  %v8837_v59 = vpop.f32.mrb[4].mxu0 }
 0x453   : > { %v10995_v5 = vpack.c.bf16 %v9639_v36, %v9623_v43  ;;  %v8839_v50 = vpop.f32.mrb[5].mxu0  ;;  %v9591_v23 = vadd.f32 %v14309_v14, %v8837_v59 }
 0x454   : > { %v10993_v52 = vpack.c.bf16 %v9640_v33, %v9624_v31  ;;  %v9592_v26 = vadd.f32 %v14309_v14, %v8839_v50 }
 0x455   : > { %v9655_v20 = vmax.f32 %v9591_v23, 0.0 }
 0x456   : > { %v8843_v55 = vpop.f32.mrb[6].mxu0  ;;  %10994 = vmatprep.subr.bf16.mxu0 %v10993_v52  ;;  %v9656_v48 = vmax.f32 %v9592_v26, 0.0 }
 0x457   : > { %v9607_v11 = vadd.f32 %v14311_v13, %v8843_v55  ;;  %v8845_v4 = vpop.f32.mrb[7].mxu0  ;;  %10996 = vmatpush1.bf16.msra.mxu0 %v10995_v5 }
 0x458   : > { %v9608_v2 = vadd.f32 %v14311_v13, %v8845_v4 }
 0x459   : > { %v9671_v25 = vmax.f32 %v9607_v11, 0.0 }
 0x45a   : > { %v9672_v63 = vmax.f32 %v9608_v2, 0.0  ;;  %v9003_v60 = vpop.f32.mrb[8].mxu0 }
 0x45b   : > { %v10999_v1 = vpack.c.bf16 %v9671_v25, %v9655_v20  ;;  %v9005_v51 = vpop.f32.mrb[9].mxu0  ;;  %v9563_v47 = vadd.f32 %v14301_v6, %v9003_v60 }
 0x45c   : > { %v10997_v34 = vpack.c.bf16 %v9672_v63, %v9656_v48  ;;  %v9564_v45 = vadd.f32 %v14301_v6, %v9005_v51 }
 0x45d   : > { %v9627_v35 = vmax.f32 %v9563_v47, 0.0 }
 0x45e   : > { %v9009_v8 = vpop.f32.mrb[10].mxu0  ;;  %10998 = vmatprep.subr.bf16.mxu0 %v10997_v34  ;;  %v9628_v40 = vmax.f32 %v9564_v45, 0.0 }
 0x45f   : > { %v9579_v3 = vadd.f32 %v14303_v54, %v9009_v8  ;;  %v9011_v30 = vpop.f32.mrb[11].mxu0  ;;  %11000 = vmatpush1.bf16.msra.mxu0 %v10999_v1 }
 0x460   : > { %v8914_v29 = vpop.f32.mrb[0].mxu1  ;;  %v9580_v7 = vadd.f32 %v14303_v54, %v9011_v30 }
 0x461   : > { %v8916_v44 = vpop.f32.mrb[1].mxu1  ;;  %v9643_v15 = vmax.f32 %v9579_v3, 0.0  ;;  %v9561_v58 = vadd.f32 %v14301_v6, %v8914_v29 }
 0x462   : > { %v9644_v18 = vmax.f32 %v9580_v7, 0.0  ;;  %v9015_v21 = vpop.f32.mrb[12].mxu0  ;;  %10978 = vmatmul.mubr.msk.f32.vlgmr.msra.gmra.mrb[32].mxu0 %vm9698_vm9, %v14323_v56  ;;  %v9562_v39 = vadd.f32 %v14301_v6, %v8916_v44 }
 0x463   : > { %v11011_v49 = vpack.c.bf16 %v9643_v15, %v9627_v35  ;;  %v9017_v32 = vpop.f32.mrb[13].mxu0  ;;  %9908 = vmatprep.mubr.f32.mxu0 %v14520_v17  ;;  %v9595_v61 = vadd.f32 %v14309_v14, %v9015_v21  ;;  %v9625_v24 = vmax.f32 %v9561_v58, 0.0 }
 0x464   : > { %v8920_v27 = vpop.f32.mrb[2].mxu1  ;;  %v11009_v22 = vpack.c.bf16 %v9644_v18, %v9628_v40  ;;  %v9596_v28 = vadd.f32 %v14309_v14, %v9017_v32  ;;  %v9626_v41 = vmax.f32 %v9562_v39, 0.0 }
 0x465   : > { %v9577_v42 = vadd.f32 %v14303_v54, %v8920_v27  ;;  %v8922_v62 = vpop.f32.mrb[3].mxu1  ;;  %v9659_v43 = vmax.f32 %v9595_v61, 0.0 }
 0x466   : > { %v9578_v10 = vadd.f32 %v14303_v54, %v8922_v62  ;;  %v9021_v53 = vpop.f32.mrb[14].mxu0  ;;  %11010 = vmatprep.subr.bf16.mxu0 %v11009_v22  ;;  %v9660_v33 = vmax.f32 %v9596_v28, 0.0 }
 0x467   : > { %v9641_v0 = vmax.f32 %v9577_v42, 0.0  ;;  %v9611_v37 = vadd.f32 %v14311_v13, %v9021_v53  ;;  %v9023_v19 = vpop.f32.mrb[15].mxu0  ;;  %11012 = vmatpush1.bf16.msra.mxu0 %v11011_v49 }
 0x468   : > { %v9642_v46 = vmax.f32 %v9578_v10, 0.0  ;;  %v8926_v12 = vpop.f32.mrb[4].mxu1  ;;  %v9612_v9 = vadd.f32 %v14311_v13, %v9023_v19 }
 0x469   : > { %v11003_v57 = vpack.c.bf16 %v9641_v0, %v9625_v24  ;;  %v8928_v38 = vpop.f32.mrb[5].mxu1  ;;  %v9675_v36 = vmax.f32 %v9611_v37, 0.0  ;;  %v9593_v50 = vadd.f32 %v14309_v14, %v8926_v12 }
 0x46a   : > { %v11001_v31 = vpack.c.bf16 %v9642_v46, %v9626_v41  ;;  %v9676_v59 = vmax.f32 %v9612_v9, 0.0  ;;  %v9181_v5 = vpop.f32.mrb[16].mxu0  ;;  %v9594_v26 = vadd.f32 %v14309_v14, %v8928_v38 }
 0x46b   : > { %v11015_v52 = vpack.c.bf16 %v9675_v36, %v9659_v43  ;;  %v9183_v23 = vpop.f32.mrb[17].mxu0  ;;  %v9567_v20 = vadd.f32 %v14301_v6, %v9181_v5  ;;  %v9657_v60 = vmax.f32 %v9593_v50, 0.0 }
 0x46c   : > { %v8932_v55 = vpop.f32.mrb[6].mxu1  ;;  %11002 = vmatprep.subr.bf16.mxu1 %v11001_v31  ;;  %v11013_v11 = vpack.c.bf16 %v9676_v59, %v9660_v33  ;;  %v9568_v48 = vadd.f32 %v14301_v6, %v9183_v23  ;;  %v9658_v47 = vmax.f32 %v9594_v26, 0.0 }
 0x46d   : > { %v9609_v4 = vadd.f32 %v14311_v13, %v8932_v55  ;;  %v8934_v2 = vpop.f32.mrb[7].mxu1  ;;  %11004 = vmatpush1.bf16.msra.mxu1 %v11003_v57  ;;  %v9631_v7 = vmax.f32 %v9567_v20, 0.0 }
 0x46e   : > { %v9610_v25 = vadd.f32 %v14311_v13, %v8934_v2  ;;  %v9187_v63 = vpop.f32.mrb[18].mxu0  ;;  %11014 = vmatprep.subr.bf16.mxu0 %v11013_v11  ;;  %v9632_v15 = vmax.f32 %v9568_v48, 0.0 }
 0x46f   : > { %v9673_v1 = vmax.f32 %v9609_v4, 0.0  ;;  %v9583_v51 = vadd.f32 %v14303_v54, %v9187_v63  ;;  %v9189_v34 = vpop.f32.mrb[19].mxu0  ;;  %11016 = vmatpush1.bf16.msra.mxu0 %v11015_v52 }
 0x470   : > { %v9674_v45 = vmax.f32 %v9610_v25, 0.0  ;;  %v9092_v8 = vpop.f32.mrb[8].mxu1  ;;  %v9584_v3 = vadd.f32 %v14303_v54, %v9189_v34 }
 0x471   : > { %v11007_v30 = vpack.c.bf16 %v9673_v1, %v9657_v60  ;;  %v9094_v29 = vpop.f32.mrb[9].mxu1  ;;  %v9647_v44 = vmax.f32 %v9583_v51, 0.0  ;;  %v9565_v21 = vadd.f32 %v14301_v6, %v9092_v8 }
 0x472   : > { %v11005_v35 = vpack.c.bf16 %v9674_v45, %v9658_v47  ;;  %v9648_v40 = vmax.f32 %v9584_v3, 0.0  ;;  %v9193_v18 = vpop.f32.mrb[20].mxu0  ;;  %10980 = vmatmul.mubr.msk.f32.vlgmr.msra.gmra.mrb[34].mxu0 %vm9698_vm9, %v14323_v56  ;;  %v9566_v32 = vadd.f32 %v14301_v6, %v9094_v29 }
 0x473   : > { %v11027_v58 = vpack.c.bf16 %v9647_v44, %v9631_v7  ;;  %v9195_v49 = vpop.f32.mrb[21].mxu0  ;;  %10050 = vmatprep.mubr.f32.mxu0 %v14520_v17  ;;  %v9599_v62 = vadd.f32 %v14309_v14, %v9193_v18  ;;  %v9629_v53 = vmax.f32 %v9565_v21, 0.0 }
 0x474   : > { %v9098_v39 = vpop.f32.mrb[10].mxu1  ;;  %11006 = vmatprep.subr.bf16.mxu1 %v11005_v35  ;;  %v11025_v27 = vpack.c.bf16 %v9648_v40, %v9632_v15  ;;  %v9600_v10 = vadd.f32 %v14309_v14, %v9195_v49  ;;  %v9630_v19 = vmax.f32 %v9566_v32, 0.0 }
 0x475   : > { %v9581_v22 = vadd.f32 %v14303_v54, %v9098_v39  ;;  %v9100_v42 = vpop.f32.mrb[11].mxu1  ;;  %11008 = vmatpush1.bf16.msra.mxu1 %v11007_v30  ;;  %v9663_v38 = vmax.f32 %v9599_v62, 0.0 }
 0x476   : > { %v9582_v61 = vadd.f32 %v14303_v54, %v9100_v42  ;;  %v9199_v28 = vpop.f32.mrb[22].mxu0  ;;  %11026 = vmatprep.subr.bf16.mxu0 %v11025_v27  ;;  %v9664_v31 = vmax.f32 %v9600_v10, 0.0 }
 0x477   : > { %v9645_v24 = vmax.f32 %v9581_v22, 0.0  ;;  %v9615_v0 = vadd.f32 %v14311_v13, %v9199_v28  ;;  %v9201_v37 = vpop.f32.mrb[23].mxu0  ;;  %11028 = vmatpush1.bf16.msra.mxu0 %v11027_v58 }
 0x478   : > { %v9646_v41 = vmax.f32 %v9582_v61, 0.0  ;;  %v9104_v46 = vpop.f32.mrb[12].mxu1  ;;  %10979 = vmatmul.mubr.msk.f32.vlgmr.msra.gmra.mrb[32].mxu1 %vm9698_vm9, %v14323_v56  ;;  %v9616_v12 = vadd.f32 %v14311_v13, %v9201_v37 }
 0x479   : > { %v11019_v9 = vpack.c.bf16 %v9645_v24, %v9629_v53  ;;  %v9106_v57 = vpop.f32.mrb[13].mxu1  ;;  %9979 = vmatprep.mubr.f32.mxu1 %v14520_v17  ;;  %v9679_v43 = vmax.f32 %v9615_v0, 0.0  ;;  %v9597_v5 = vadd.f32 %v14309_v14, %v9104_v46 }
 0x47a   : > { %v11017_v36 = vpack.c.bf16 %v9646_v41, %v9630_v19  ;;  %v9680_v33 = vmax.f32 %v9616_v12, 0.0  ;;  %v9359_v59 = vpop.f32.mrb[24].mxu0  ;;  %v9598_v23 = vadd.f32 %v14309_v14, %v9106_v57 }
 0x47b   : > { %v11031_v50 = vpack.c.bf16 %v9679_v43, %v9663_v38  ;;  %v9361_v52 = vpop.f32.mrb[25].mxu0  ;;  %v9571_v2 = vadd.f32 %v14301_v6, %v9359_v59  ;;  %v9661_v63 = vmax.f32 %v9597_v5, 0.0 }
 0x47c   : > { %v9110_v26 = vpop.f32.mrb[14].mxu1  ;;  %11018 = vmatprep.subr.bf16.mxu1 %v11017_v36  ;;  %v11029_v55 = vpack.c.bf16 %v9680_v33, %v9664_v31  ;;  %v9572_v25 = vadd.f32 %v14301_v6, %v9361_v52  ;;  %v9662_v34 = vmax.f32 %v9598_v23, 0.0 }
 0x47d   : > { %v9613_v11 = vadd.f32 %v14311_v13, %v9110_v26  ;;  %v9112_v4 = vpop.f32.mrb[15].mxu1  ;;  %11020 = vmatpush1.bf16.msra.mxu1 %v11019_v9  ;;  %v9635_v29 = vmax.f32 %v9571_v2, 0.0 }
 0x47e   : > { %v9614_v20 = vadd.f32 %v14311_v13, %v9112_v4  ;;  %v9365_v48 = vpop.f32.mrb[26].mxu0  ;;  %11030 = vmatprep.subr.bf16.mxu0 %v11029_v55  ;;  %v9636_v35 = vmax.f32 %v9572_v25, 0.0 }
 0x47f   : > { %v9677_v60 = vmax.f32 %v9613_v11, 0.0  ;;  %v9587_v1 = vadd.f32 %v14303_v54, %v9365_v48  ;;  %v9367_v51 = vpop.f32.mrb[27].mxu0  ;;  %11032 = vmatpush1.bf16.msra.mxu0 %v11031_v50 }
 0x480   : > { %v9678_v47 = vmax.f32 %v9614_v20, 0.0  ;;  %v9270_v45 = vpop.f32.mrb[16].mxu1  ;;  %v9588_v8 = vadd.f32 %v14303_v54, %v9367_v51 }
 0x481   : > { %v11023_v3 = vpack.c.bf16 %v9677_v60, %v9661_v63  ;;  %v9272_v30 = vpop.f32.mrb[17].mxu1  ;;  %v9651_v7 = vmax.f32 %v9587_v1, 0.0  ;;  %v9569_v18 = vadd.f32 %v14301_v6, %v9270_v45 }
 0x482   : > { %v11021_v44 = vpack.c.bf16 %v9678_v47, %v9662_v34  ;;  %v9652_v15 = vmax.f32 %v9588_v8, 0.0  ;;  %v9371_v40 = vpop.f32.mrb[28].mxu0  ;;  %10982 = vmatmul.mubr.msk.f32.vlgmr.msra.gmra.mrb[36].mxu0 %vm9698_vm9, %v14323_v56  ;;  %v9570_v49 = vadd.f32 %v14301_v6, %v9272_v30 }
 0x483   : > { %v11043_v21 = vpack.c.bf16 %v9651_v7, %v9635_v29  ;;  %v9373_v58 = vpop.f32.mrb[29].mxu0  ;;  %10192 = vmatprep.mubr.f32.mxu0 %v14520_v17  ;;  %v9603_v42 = vadd.f32 %v14309_v14, %v9371_v40  ;;  %v9633_v28 = vmax.f32 %v9569_v18, 0.0 }
 0x484   : > { %v9276_v32 = vpop.f32.mrb[18].mxu1  ;;  %11022 = vmatprep.subr.bf16.mxu1 %v11021_v44  ;;  %v11041_v39 = vpack.c.bf16 %v9652_v15, %v9636_v35  ;;  %v9604_v61 = vadd.f32 %v14309_v14, %v9373_v58  ;;  %v9634_v37 = vmax.f32 %v9570_v49, 0.0 }
 0x485   : > { %v9585_v27 = vadd.f32 %v14303_v54, %v9276_v32  ;;  %v9278_v22 = vpop.f32.mrb[19].mxu1  ;;  %11024 = vmatpush1.bf16.msra.mxu1 %v11023_v3  ;;  %v9667_v57 = vmax.f32 %v9603_v42, 0.0 }
 0x486   : > { %v9586_v62 = vadd.f32 %v14303_v54, %v9278_v22  ;;  %v9377_v10 = vpop.f32.mrb[30].mxu0  ;;  %11042 = vmatprep.subr.bf16.mxu0 %v11041_v39  ;;  %v9668_v36 = vmax.f32 %v9604_v61, 0.0  ;;  %v9696_v61 = vsub.s32 0, %v12004_v16 }
 0x487   : > { %v9649_v53 = vmax.f32 %v9585_v27, 0.0  ;;  %v9619_v24 = vadd.f32 %v14311_v13, %v9377_v10  ;;  %v9379_v0 = vpop.f32.mrb[31].mxu0  ;;  %11044 = vmatpush1.bf16.msra.mxu0 %v11043_v21  ;;  %v9692_v10 = vpop.permute.xlu0 %9691 }
 0x488   : > { %v9650_v19 = vmax.f32 %v9586_v62, 0.0  ;;  %v9282_v41 = vpop.f32.mrb[20].mxu1  ;;  %10981 = vmatmul.mubr.msk.f32.vlgmr.msra.gmra.mrb[34].mxu1 %vm9698_vm9, %v14323_v56  ;;  %v9620_v46 = vadd.f32 %v14311_v13, %v9379_v0 }
 0x489   : > { %v11035_v12 = vpack.c.bf16 %v9649_v53, %v9633_v28  ;;  %v9284_v9 = vpop.f32.mrb[21].mxu1  ;;  %10121 = vmatprep.mubr.f32.mxu1 %v14520_v17  ;;  %v9683_v38 = vmax.f32 %v9619_v24, 0.0  ;;  %v9601_v33 = vadd.f32 %v14309_v14, %v9282_v41  ;;  %v9697_v53 = vrot.slane %v9692_v10, %v9696_v61 }
 0x48a   : > { %v11033_v43 = vpack.c.bf16 %v9650_v19, %v9634_v37  ;;  %v9684_v31 = vmax.f32 %v9620_v46, 0.0  ;;  %v9602_v5 = vadd.f32 %v14309_v14, %v9284_v9 }
 0x48b   : > { %v11047_v59 = vpack.c.bf16 %v9683_v38, %v9667_v57  ;;  %v9665_v11 = vmax.f32 %v9601_v33, 0.0 }
 0x48c   : > { %v9288_v50 = vpop.f32.mrb[22].mxu1  ;;  %11034 = vmatprep.subr.bf16.mxu1 %v11033_v43  ;;  %v11045_v52 = vpack.c.bf16 %v9684_v31, %v9668_v36  ;;  %v9666_v2 = vmax.f32 %v9602_v5, 0.0 }
 0x48d   : > { %v9617_v23 = vadd.f32 %v14311_v13, %v9288_v50  ;;  %v9290_v26 = vpop.f32.mrb[23].mxu1  ;;  %11036 = vmatpush1.bf16.msra.mxu1 %v11035_v12 }
 0x48e   : > { %v9618_v55 = vadd.f32 %v14311_v13, %v9290_v26  ;;  %11046 = vmatprep.subr.bf16.mxu0 %v11045_v52 }
 0x48f   : > { %v9681_v4 = vmax.f32 %v9617_v23, 0.0  ;;  %11048 = vmatpush1.bf16.msra.mxu0 %v11047_v59 }
 0x490   : > { %v9682_v20 = vmax.f32 %v9618_v55, 0.0  ;;  %v9448_v25 = vpop.f32.mrb[24].mxu1 }
 0x491   : > { %v11039_v48 = vpack.c.bf16 %v9681_v4, %v9665_v11  ;;  %v9450_v63 = vpop.f32.mrb[25].mxu1  ;;  %v9573_v1 = vadd.f32 %v14301_v6, %v9448_v25 }
 0x492   : > { %v11037_v60 = vpack.c.bf16 %v9682_v20, %v9666_v2  ;;  %10984 = vmatmul.mubr.msk.f32.vlgmr.msra.gmra.mrb[38].mxu0 %vm9698_vm9, %v14323_v56  ;;  %v9574_v51 = vadd.f32 %v14301_v6, %v9450_v63 }
 0x493   : > { %v9637_v3 = vmax.f32 %v9573_v1, 0.0 }
 0x494   : > { %v9454_v34 = vpop.f32.mrb[26].mxu1  ;;  %11038 = vmatprep.subr.bf16.mxu1 %v11037_v60  ;;  %v9638_v29 = vmax.f32 %v9574_v51, 0.0 }
 0x495   : > { %v9589_v47 = vadd.f32 %v14303_v54, %v9454_v34  ;;  %v9456_v45 = vpop.f32.mrb[27].mxu1  ;;  %11040 = vmatpush1.bf16.msra.mxu1 %v11039_v48 }
 0x496   : > { %v9590_v8 = vadd.f32 %v14303_v54, %v9456_v45 }
 0x497   : > { %v9653_v30 = vmax.f32 %v9589_v47, 0.0 }
 0x498   : > { %v9654_v7 = vmax.f32 %v9590_v8, 0.0  ;;  %v9460_v44 = vpop.f32.mrb[28].mxu1  ;;  %10983 = vmatmul.mubr.msk.f32.vlgmr.msra.gmra.mrb[36].mxu1 %vm9698_vm9, %v14323_v56 }
 0x499   : > { %v11051_v35 = vpack.c.bf16 %v9653_v30, %v9637_v3  ;;  %v9462_v15 = vpop.f32.mrb[29].mxu1  ;;  %10263 = vmatprep.mubr.f32.mxu1 %v14520_v17  ;;  %v9605_v40 = vadd.f32 %v14309_v14, %v9460_v44  ;;  %v11819_v17 = vmov 1966171168  }
 0x49a   : > { %v11049_v6 = vpack.c.bf16 %v9654_v7, %v9638_v29  ;;  %v9606_v18 = vadd.f32 %v14309_v14, %v9462_v15  ;;  %v10291_v14 = vunpack.c.l.s4 %v11819_v17 }
 0x49b   : > { %v9669_v32 = vmax.f32 %v9605_v40, 0.0 }
 0x49c   : > { %v9466_v21 = vpop.f32.mrb[30].mxu1  ;;  %11050 = vmatprep.subr.bf16.mxu1 %v11049_v6  ;;  %v9670_v27 = vmax.f32 %v9606_v18, 0.0  ;;  %v10292_v28 = vunpack.c.0.s8 %v10291_v14 }
 0x49d   : > { %v9621_v54 = vadd.f32 %v14311_v13, %v9466_v21  ;;  %v9468_v58 = vpop.f32.mrb[31].mxu1  ;;  %11052 = vmatpush1.bf16.msra.mxu1 %v11051_v35 }
 0x49e   : > { %v9622_v49 = vadd.f32 %v14311_v13, %v9468_v58  ;;  %v10295_v37 = vsub.s32 %v10292_v28, %v12004_v16 }
 0x49f   : > { %v9685_v39 = vmax.f32 %v9621_v54, 0.0 }
 0x4a0   : > { %v9686_v22 = vmax.f32 %v9622_v49, 0.0 }
 0x4a1   : > { %v11055_v42 = vpack.c.bf16 %v9685_v39, %v9669_v32 }
 0x4a2   : > { %v11053_v62 = vpack.c.bf16 %v9686_v22, %v9670_v27 }
 0x4a4   : > { %11054 = vmatprep.subr.bf16.mxu1 %v11053_v62 }
 0x4a5   : > { %11056 = vmatpush1.bf16.msra.mxu1 %v11055_v42 }
 0x4a8   : > { %10985 = vmatmul.mubr.msk.f32.vlgmr.msra.gmra.mrb[38].mxu1 %vm9698_vm9, %v14323_v56 }
 0x535   : > { %v9768_v24 = vpop.f32.mrb[32].mxu0 }
 0x536   : > { %v9769_v13 = vadd.f32 %v9768_v24, %v9697_v53  ;;  %v9770_v0 = vpop.f32.mrb[33].mxu0 }
 0x537   : > { %v9771_v19 = vadd.f32 %v9770_v0, %v9697_v53 }
 0x539   : > { %v10286_v41 = vcombine.low %v9769_v13, %v9771_v19 }
 0x53b   : > { %v10296_v46 = vrot.slane %v10286_v41, %v10295_v37 }
 0x545   : > { %v9910_v12 = vpop.f32.mrb[34].mxu0 }
 0x546   : > { %v9911_v9 = vadd.f32 %v9910_v12, %v9697_v53  ;;  %v9912_v57 = vpop.f32.mrb[35].mxu0 }
 0x547   : > { %v9913_v38 = vadd.f32 %v9912_v57, %v9697_v53 }
 0x549   : > { %v10288_v56 = vcombine.low %v9911_v9, %v9913_v38 }
 0x54b   : > { %v9839_v43 = vpop.f32.mrb[32].mxu1  ;;  %v10310_v36 = vrot.slane %v10288_v56, %v10295_v37 }
 0x54c   : > { %v9840_v31 = vadd.f32 %v9839_v43, %v9697_v53  ;;  %v9841_v33 = vpop.f32.mrb[33].mxu1 }
 0x54d   : > { %v9842_v59 = vadd.f32 %v9841_v33, %v9697_v53 }
 0x54f   : > { %v10287_v5 = vcombine.low %v9840_v31, %v9842_v59 }
 0x551   : > { %v10303_v50 = vrot.slane %v10287_v5, %v10295_v37 }
 0x553   : > { %v10318_v52 = vcombine.low %v10296_v46, %v10303_v50 }
 0x555   : > { %v10326_v23 = vrot.slane %v10318_v52, %v10295_v37  ;;  %v10052_v26 = vpop.f32.mrb[36].mxu0 }
 0x556   : > { %v10053_v16 = vadd.f32 %v10052_v26, %v9697_v53  ;;  %v10054_v55 = vpop.f32.mrb[37].mxu0 }
 0x557   : > { %v10055_v11 = vadd.f32 %v10054_v55, %v9697_v53 }
 0x559   : > { %v10335_v4 = vcombine.low %v10053_v16, %v10055_v11 }
 0x55b   : > { %v9981_v2 = vpop.f32.mrb[34].mxu1  ;;  %v10345_v20 = vrot.slane %v10335_v4, %v10295_v37 }
 0x55c   : > { %v9982_v25 = vadd.f32 %v9981_v2, %v9697_v53  ;;  %v9983_v48 = vpop.f32.mrb[35].mxu1 }
 0x55d   : > { %v9984_v63 = vadd.f32 %v9983_v48, %v9697_v53 }
 0x55f   : > { %v10289_v60 = vcombine.low %v9982_v25, %v9984_v63 }
 0x561   : > { %v10317_v1 = vrot.slane %v10289_v60, %v10295_v37 }
 0x563   : > { %v10319_v51 = vcombine.low %v10310_v36, %v10317_v1 }
 0x565   : > { %v10333_v34 = vrot.slane %v10319_v51, %v10295_v37  ;;  %v10194_v47 = vpop.f32.mrb[38].mxu0 }
 0x566   : > { %v10195_v45 = vadd.f32 %v10194_v47, %v9697_v53  ;;  %v10196_v8 = vpop.f32.mrb[39].mxu0 }
 0x567   : > { %v10334_v3 = vcombine.low %v10326_v23, %v10333_v34  ;;  %v10197_v30 = vadd.f32 %v10196_v8, %v9697_v53 }
 0x569   : > { %v10337_v29 = vcombine.low %v10195_v45, %v10197_v30  ;;  %10386 = vst [vmem:[%s296_s9] sm:$0xff] %v10334_v3 }
 0x56b   : > { %v10123_v7 = vpop.f32.mrb[36].mxu1  ;;  %v10359_v44 = vrot.slane %v10337_v29, %v10295_v37 }
 0x56c   : > { %v10124_v35 = vadd.f32 %v10123_v7, %v9697_v53  ;;  %v10125_v15 = vpop.f32.mrb[37].mxu1 }
 0x56d   : > { %v10126_v6 = vadd.f32 %v10125_v15, %v9697_v53 }
 0x56f   : > { %v10336_v40 = vcombine.low %v10124_v35, %v10126_v6 }
 0x571   : > { %v10352_v18 = vrot.slane %v10336_v40, %v10295_v37 }
 0x573   : > { %v10367_v21 = vcombine.low %v10345_v20, %v10352_v18 }
 0x575   : > { %v10375_v54 = vrot.slane %v10367_v21, %v10295_v37 }
 0x57b   : > { %v10265_v58 = vpop.f32.mrb[38].mxu1 }
 0x57c   : > { %v10266_v49 = vadd.f32 %v10265_v58, %v9697_v53  ;;  %v10267_v32 = vpop.f32.mrb[39].mxu1 }
 0x57d   : > { %v10268_v39 = vadd.f32 %v10267_v32, %v9697_v53 }
 0x57f   : > { %v10338_v27 = vcombine.low %v10266_v49, %v10268_v39 }
 0x581   : > { %v10366_v22 = vrot.slane %v10338_v27, %v10295_v37 }
 0x583   : > { %v10368_v42 = vcombine.low %v10359_v44, %v10366_v22 }
 0x585   : > { %v10382_v62 = vrot.slane %v10368_v42, %v10295_v37 }
 0x587   : > { %v10383_v17 = vcombine.low %v10375_v54, %v10382_v62 }
 0x589   : > { %10387 = vst [vmem:[%s296_s9 + $0x8] sm:$0xff] %v10383_v17 }
 0x58a   : > { %11746 = shalt.err (!%p11743_p3)
}
 0x58b   : > { %s11747_s30 = scalar_lea.hbm %s14407_s25, 256  ;;  %s11751_s22 = scalar_lea.hbm %s14457_s7, 768 }
 0x58c   : > { %p11748_p5 = scmp.ne.s32.totalorder %s14407_s25, %s11747_s30  ;;  %p11752_p13 = scmp.lt.u32.totalorder %s14407_s25, %s14457_s7 }
 0x58d   : > { %p11753_p0 = scmp.lt.u32.totalorder %s11751_s22, %s11747_s30  ;;  %p11755_p6 = scmp.lt.u32.totalorder %s11747_s30, %s14407_s25 }
 0x58e   : > { %p11749_p7 = pnand %p11748_p5, %p14781_p10 }
 0x58f   : > { %p11754_p2 = por %p11753_p0, %p11752_p13 }
 0x590   : > { %p11750_p8 = pneg %p11749_p7 }
 0x591   : > { %p11756_p11 = por %p11755_p6, %p11754_p2 }
 0x593   : > { %p11757_p12 = pnand %p11756_p11, %p11750_p8 }
 0x595   : > { %11760 = shalt.err (!%p11757_p12)
}
 0x596   : > { %11603 = dma.vmem_to_hbm [thread:$0]  (%p14781_p10), %s14409_s21, 256, %s14407_s25, %s10389_s17  }
 0x597 PF: > { %p11614_p4 = scmp.ge.s32.totalorder %s11799_s29, 2  ;;  %s10415_s10 = sand.u32 1, %s11787_s26  }
 0x598   : > { %p14782_p9 = scmp.ne.s32.totalorder %s14481_s15, 0  ;;  %s10416_s23 = scalar_lea.sflag [#allocation5], %s10415_s10 }
 0x59a   : > { %p11610_p1 = pnand %p11614_p4, %p14782_p9 }
 0x59c   : > { %11782 = dma.done.wait (!%p11610_p1), %s10416_s23, 256  }
 0x59d   : > { %11784 = vsyncadd (!%p11610_p1), %s10416_s23, 4294967040  ;;  %p22_p3 = scmp.ge.s32.totalorder %s11889_s8, 5   ;;  %s14783_s26 = smov %s11791_s27 }
 0x59e   : > { %s14784_s27 = smov %s11795_s28  ;;  %s14785_s28 = smov %s11901_s11 }
 0x59f   : > { %s14786_s29 = smov %s11889_s8  ;;  %24 = sbr.rel (!%p22_p3) target bundleno = 8 (0x8), region = 93 }
 0x5a6   :  { %10421 = vsyncpa [#allocation4], 1 }
 0x5a7   :  { %10423 = vsyncpa [#allocation4 + $0x1], 1 }
 0x5a8   :  { %10424 = vsyncpa [#allocation5], 1 }
 0x5a9   :  { %10426 = vsyncpa [#allocation5 + $0x1], 1 }

</bundles_post_ra>
